<compile_context>
chip_gen: v6e
topology: v6e:2x2x1
jax: 0.10.0
libtpu: 0.0.40
codegen_flags: <defaults>
</compile_context>

<pallas_src>
import math

import jax
import jax.numpy as jnp
from jax.experimental import pallas as pl
from jax.experimental.pallas import tpu as pltpu


def patch_embed_kernel(p2_ref, w2_ref, add_ref, o_ref):
    # p2_ref : (T, 2K)          two patches' pixels per row (lane-dense load)
    # w2_ref : (2K, 2E)         block-diagonal projection weight (VMEM-resident)
    # add_ref: (P2, 2E)/(T, 2E) conv bias + positional embedding, packed identically
    # o_ref  : (T, 2E)          two embedded tokens per row (lane-dense store)
    acc = jnp.dot(p2_ref[...], w2_ref[...], preferred_element_type=jnp.float32)
    t, two_e = o_ref.shape
    p2r = add_ref.shape[0]
    if p2r == t:
        # add table already tile-sized (fallback path).
        acc = acc + add_ref[...]
    else:
        # Broadcast the per-image (P/2, 2E) table across the per-image repeats.
        reps = t // p2r
        acc = (acc.reshape(reps, p2r, two_e) + add_ref[...][None]).reshape(t, two_e)
    o_ref[...] = acc.astype(o_ref.dtype)


def _round_up(a, b):
    return ((a + b - 1) // b) * b


def _choose_tile(n_packed, rows_per_image, row_bytes, out_row_bytes,
                 w2_bytes, add_bytes, *, target_step_bytes=12 << 20,
                 vmem_budget=40 << 20, min_steps=8, tile_rows=None):
    """Byte-based tile policy over packed rows (decoupled from batch size).

    The tile is a multiple of lcm(rows_per_image, 8) (sublane alignment + add
    periodicity), sized so the per-step input stream is ~target_step_bytes,
    clamped by a VMEM working-set budget, and shrunk (when data allows) so the
    grid has at least `min_steps` steps for pipelining / megacore sharding.
    """
    pim = rows_per_image
    gran = pim * 8 // math.gcd(pim, 8)          # lcm(pim, 8)
    full = n_packed                             # n_packed is always a multiple of pim

    def working_set(t):
        # double-buffered input + output tiles, resident weight + add (count 2x), slack
        return 2 * t * row_bytes + 2 * t * out_row_bytes + 2 * w2_bytes + 2 * add_bytes + (1 << 20)

    if tile_rows is not None:
        tile = _round_up(tile_rows, gran)
    else:
        tile = max(gran, (target_step_bytes // row_bytes) // gran * gran)
        while tile > gran and working_set(tile) > vmem_budget:
            tile -= gran
        if n_packed >= min_steps * gran:
            tile = min(tile, max(gran, (n_packed // min_steps) // gran * gran))
    if tile >= full:
        tile = full                              # single step: block == full array
    return tile, working_set(tile)


def embedding_forward(x, conv_w, conv_b, cls_token, pos_embed, *,
                      img_size=65, patch_size=8, use_bf16_matmul=True,
                      tile_rows=None):
    """x: (B,H,W,C) channels-last or (B,C,H,W). Returns (B, num_patches+1, E) f32.

    NOTE: like the PyTorch module, channels-last is detected via
    `x.shape[1] == img_size`, which is ambiguous when in_chans == img_size
    (both interpretations coincide for the square default config).
    """
    E, C = conv_w.shape[0], conv_w.shape[1]
    ps = patch_size
    g = img_size // ps
    num_patches = g * g
    K = C * ps * ps
    B = x.shape[0]
    # 2-token packing assumptions (module defaults satisfy both):
    assert num_patches % 2 == 0, "2-token packing needs an even patch count"

    in_dtype = jnp.bfloat16 if use_bf16_matmul else jnp.float32

    # ---- im2col: ONE transpose of x, patch-vector order (py, px, C). -------
    if x.ndim == 4 and x.shape[1] == img_size:
        # channels-last (B,H,W,C)
        xc = x[:, :g * ps, :g * ps, :]
        patches = xc.reshape(B, g, ps, g, ps, C).transpose(0, 1, 3, 2, 4, 5)
    else:
        # NCHW (B,C,H,W)
        xc = x[:, :, :g * ps, :g * ps]
        patches = xc.reshape(B, C, g, ps, g, ps).transpose(0, 2, 4, 3, 5, 1)
    # Cast fuses into the transpose's materializing copy (no extra HBM pass).
    patches = patches.astype(in_dtype)
    # Pack two tokens per row (free row-major reshape) -> 128-lane-dense loads/stores.
    n_packed = B * num_patches // 2
    p2 = patches.reshape(n_packed, 2 * K)

    # ---- weight: flatten in (py, px, C) order, block-diagonal for 2-token pack.
    w = conv_w.transpose(0, 2, 3, 1).reshape(E, K).T.astype(in_dtype)   # (K, E)
    zeros = jnp.zeros_like(w)
    w2 = jnp.concatenate(
        [jnp.concatenate([w, zeros], axis=1),
         jnp.concatenate([zeros, w], axis=1)], axis=0)                  # (2K, 2E)

    # ---- conv bias + patch-token positional embedding, packed identically. --
    add = conv_b[None, :].astype(jnp.float32) + pos_embed[0, 1:, :].astype(jnp.float32)
    rows_per_image = num_patches // 2
    add_packed = add.reshape(rows_per_image, 2 * E)                     # (P/2, 2E)

    # ---- byte-based, batch-independent tile policy + explicit VMEM limit. ---
    row_bytes = 2 * K * jnp.dtype(in_dtype).itemsize
    out_row_bytes = 2 * E * 4
    w2_bytes = w2.size * jnp.dtype(in_dtype).itemsize
    add_bytes = add_packed.size * 4
    tile, ws = _choose_tile(n_packed, rows_per_image, row_bytes, out_row_bytes,
                            w2_bytes, add_bytes, tile_rows=tile_rows)
    vmem_limit = int(min(max(ws + (4 << 20), 16 << 20), 48 << 20))

    # add table: per-image period broadcast in-kernel when sublane-aligned,
    # otherwise materialize a tile-sized copy in the wrapper (tiny).
    if rows_per_image % 8 == 0 and tile % rows_per_image == 0:
        add_arg = add_packed
    else:
        add_arg = jnp.tile(add_packed, (tile // rows_per_image, 1))

    # zero-pad packed rows up to a tile multiple (pad sliced off after the call).
    n_padded = _round_up(n_packed, tile)
    if n_padded != n_packed:
        p2 = jnp.pad(p2, ((0, n_padded - n_packed), (0, 0)))
    grid = (n_padded // tile,)

    out_packed = pl.pallas_call(
        patch_embed_kernel,
        out_shape=jax.ShapeDtypeStruct((n_padded, 2 * E), jnp.float32),
        grid_spec=pltpu.PrefetchScalarGridSpec(
            num_scalar_prefetch=0,
            grid=grid,
            in_specs=[
                pl.BlockSpec((tile, 2 * K), lambda i: (i, 0)),        # token tiles
                pl.BlockSpec(w2.shape, lambda i: (0, 0)),             # resident weight
                pl.BlockSpec(add_arg.shape, lambda i: (0, 0)),        # resident bias+pos
            ],
            out_specs=pl.BlockSpec((tile, 2 * E), lambda i: (i, 0)),
        ),
        compiler_params=pltpu.CompilerParams(
            dimension_semantics=("parallel",),        # shards steps across v7x's 2 TCs
            vmem_limit_bytes=vmem_limit),
    )(p2, w2, add_arg)

    # Free reshape: packed (N_tok/2, 2E) row-major == (B, num_patches, E).
    patch_tokens = out_packed[:n_packed].reshape(B, num_patches, E)

    # cls-token row depends only on parameters; tiny broadcast+concat left to XLA.
    # TODO(synk): writing patch tokens straight into a pre-sized (B, P+1, E) buffer
    # would remove this concat's extra read+write (~2-3% of layer HBM traffic).
    cls_rows = jnp.broadcast_to(
        (cls_token + pos_embed[:, :1, :]).astype(jnp.float32), (B, 1, E))
    return jnp.concatenate([cls_rows, patch_tokens], axis=1)


def reference_forward(x, conv_w, conv_b, cls_token, pos_embed, *,
                      img_size=65, patch_size=8):
    """Plain-JAX reference mirroring the PyTorch module (conv path)."""
    if x.ndim == 4 and x.shape[1] == img_size:
        x = jnp.transpose(x, (0, 3, 1, 2))
    B = x.shape[0]
    y = jax.lax.conv_general_dilated(
        x, conv_w, window_strides=(patch_size, patch_size), padding="VALID",
        dimension_numbers=("NCHW", "OIHW", "NCHW"),
        precision=jax.lax.Precision.HIGHEST)
    y = y + conv_b[None, :, None, None]
    y = y.reshape(B, y.shape[1], -1).transpose(0, 2, 1)          # (B, P, E)
    cls = jnp.broadcast_to(cls_token, (B, 1, cls_token.shape[-1]))
    return jnp.concatenate([cls, y], axis=1) + pos_embed


if __name__ == "__main__":
    key = jax.random.PRNGKey(0)
    kx, kw, kb, kc, kp, kx2, kx3, kw3, kb3, kc3, kp3 = jax.random.split(key, 11)

    # ---- config 1: module defaults, channels-last input --------------------
    B, IMG, PS, CIN, E = 2, 65, 8, 65, 64
    P = (IMG // PS) ** 2                                          # 64
    x = jax.random.normal(kx, (B, IMG, IMG, CIN), jnp.float32)
    fan_in = CIN * PS * PS
    lim = 1.0 / math.sqrt(fan_in)
    conv_w = jax.random.uniform(kw, (E, CIN, PS, PS), jnp.float32, -lim, lim)
    conv_b = jax.random.uniform(kb, (E,), jnp.float32, -lim, lim)
    cls_token = 0.02 * jax.random.truncated_normal(kc, -2.0, 2.0, (1, 1, E), jnp.float32)
    pos_embed = 0.02 * jax.random.truncated_normal(kp, -2.0, 2.0,
                                                   (1, P + 1, E), jnp.float32)
    ref = reference_forward(x, conv_w, conv_b, cls_token, pos_embed,
                            img_size=IMG, patch_size=PS)

    # (1) default path: bf16 matmul, auto tile policy.
    out = embedding_forward(x, conv_w, conv_b, cls_token, pos_embed,
                            img_size=IMG, patch_size=PS)
    out = jax.block_until_ready(out)
    assert out.shape == (B, P + 1, E)
    err = float(jnp.max(jnp.abs(out - ref)))
    assert err < 2.5e-2, f"bf16 path mismatch, max err {err}"

    # (2) exact-f32 path, odd batch (exercises zero-padding) + forced small tile
    #     so the multi-step, pipelined, parallel grid path runs even at demo size.
    B3 = 3
    x3 = jax.random.normal(kx2, (B3, IMG, IMG, CIN), jnp.float32)
    ref3 = reference_forward(x3, conv_w, conv_b, cls_token, pos_embed,
                             img_size=IMG, patch_size=PS)
    out3 = embedding_forward(x3, conv_w, conv_b, cls_token, pos_embed,
                             img_size=IMG, patch_size=PS,
                             use_bf16_matmul=False, tile_rows=64)
    out3 = jax.block_until_ready(out3)
    err3 = float(jnp.max(jnp.abs(out3 - ref3)))
    assert jnp.allclose(out3, ref3, atol=2e-3, rtol=2e-3), f"f32 path mismatch {err3}"

    # (3) tiny NCHW input (unambiguous channel dim) exercises the NCHW im2col
    #     branch and the wrapper-tiled bias/pos fallback (P/2 not sublane-aligned).
    C4, IMG4, PS4, E4 = 4, 16, 8, 64
    P4 = (IMG4 // PS4) ** 2                                       # 4
    x4 = jax.random.normal(kx3, (2, C4, IMG4, IMG4), jnp.float32)
    lim4 = 1.0 / math.sqrt(C4 * PS4 * PS4)
    conv_w4 = jax.random.uniform(kw3, (E4, C4, PS4, PS4), jnp.float32, -lim4, lim4)
    conv_b4 = jax.random.uniform(kb3, (E4,), jnp.float32, -lim4, lim4)
    cls4 = 0.02 * jax.random.truncated_normal(kc3, -2.0, 2.0, (1, 1, E4), jnp.float32)
    pos4 = 0.02 * jax.random.truncated_normal(kp3, -2.0, 2.0,
                                              (1, P4 + 1, E4), jnp.float32)
    ref4 = reference_forward(x4, conv_w4, conv_b4, cls4, pos4,
                             img_size=IMG4, patch_size=PS4)
    out4 = embedding_forward(x4, conv_w4, conv_b4, cls4, pos4,
                             img_size=IMG4, patch_size=PS4, use_bf16_matmul=False)
    out4 = jax.block_until_ready(out4)
    err4 = float(jnp.max(jnp.abs(out4 - ref4)))
    assert jnp.allclose(out4, ref4, atol=2e-3, rtol=2e-3), f"NCHW path mismatch {err4}"

    print("KERNEL_OK")
</pallas_src>

<mosaic_0001>
module attributes {stable_mosaic.version = 11 : i64} {
  func.func @patch_embed_kernel(%arg0: i32, %arg1: memref<64x8320xbf16, #tpu.memory_space<vmem>>, %arg2: memref<8320x128xbf16, #tpu.memory_space<vmem>>, %arg3: memref<32x128xf32, #tpu.memory_space<vmem>>, %arg4: memref<64x128xf32, #tpu.memory_space<vmem>>) attributes {dimension_semantics = [#tpu.dimension_semantics<parallel>], iteration_bounds = array<i64: 1>, scalar_prefetch = 0 : i64, scratch_operands = 0 : i64, tpu.core_type = #tpu.core_type<tc>, window_params = [{transform_indices = @transform_0, window_bounds = array<i64: 64, 8320>}, {pipeline_mode = #tpu.pipeline_mode<synchronous>, transform_indices = @transform_1, window_bounds = array<i64: 8320, 128>}, {pipeline_mode = #tpu.pipeline_mode<synchronous>, transform_indices = @transform_2, window_bounds = array<i64: 32, 128>}, {transform_indices = @transform_3, window_bounds = array<i64: 64, 128>}]} {
    %c0 = arith.constant 0 : index
    %c0_0 = arith.constant 0 : index
    %0 = vector.load %arg1[%c0, %c0_0] : memref<64x8320xbf16, #tpu.memory_space<vmem>>, vector<64x8320xbf16>
    %c0_1 = arith.constant 0 : index
    %c0_2 = arith.constant 0 : index
    %1 = vector.load %arg2[%c0_1, %c0_2] : memref<8320x128xbf16, #tpu.memory_space<vmem>>, vector<8320x128xbf16>
    %cst = arith.constant dense<0.000000e+00> : vector<64x128xf32>
    %2 = tpu.matmul %0, %1, %cst {dimension_numbers = #tpu.dot_dimension_numbers<[1], [0], [0], [1], [0, 0, 1, 1], [], []>} : vector<64x8320xbf16>, vector<8320x128xbf16>, vector<64x128xf32> -> vector<64x128xf32>
    %3 = vector.shape_cast %2 : vector<64x128xf32> to vector<2x32x128xf32>
    %c0_3 = arith.constant 0 : index
    %c0_4 = arith.constant 0 : index
    %4 = vector.load %arg3[%c0_3, %c0_4] : memref<32x128xf32, #tpu.memory_space<vmem>>, vector<32x128xf32>
    %5 = vector.shape_cast %4 : vector<32x128xf32> to vector<1x32x128xf32>
    %6 = vector.broadcast %5 : vector<1x32x128xf32> to vector<2x32x128xf32>
    %7 = arith.addf %3, %6 : vector<2x32x128xf32>
    %8 = vector.shape_cast %7 : vector<2x32x128xf32> to vector<64x128xf32>
    %c0_5 = arith.constant 0 : index
    %c0_6 = arith.constant 0 : index
    %9 = vector.load %arg4[%c0_5, %c0_6] : memref<64x128xf32, #tpu.memory_space<vmem>>, vector<64x128xf32>
    tpu.vector_store %arg4[%c0_5, %c0_6], %8 {strides = array<i32>} : memref<64x128xf32, #tpu.memory_space<vmem>>, vector<64x128xf32>,
    return
  }
  func.func @transform_0(%arg0: i32) -> (i32, i32) {
    %c0_i32 = arith.constant 0 : i32
    %c0_i32_0 = arith.constant 0 : i32
    return %arg0, %c0_i32 : i32, i32
  }
  func.func @transform_1(%arg0: i32) -> (i32, i32) {
    %c0_i32 = arith.constant 0 : i32
    %c0_i32_0 = arith.constant 0 : i32
    %c0_i32_1 = arith.constant 0 : i32
    return %c0_i32, %c0_i32_0 : i32, i32
  }
  func.func @transform_2(%arg0: i32) -> (i32, i32) {
    %c0_i32 = arith.constant 0 : i32
    %c0_i32_0 = arith.constant 0 : i32
    %c0_i32_1 = arith.constant 0 : i32
    return %c0_i32, %c0_i32_0 : i32, i32
  }
  func.func @transform_3(%arg0: i32) -> (i32, i32) {
    %c0_i32 = arith.constant 0 : i32
    %c0_i32_0 = arith.constant 0 : i32
    return %arg0, %c0_i32 : i32, i32
  }
}

</mosaic_0001>

<bundles_post_ra>
// kernel: tpu_custom_call.1
= control target key start
LH: loop header
LB: loop body
LE: loop exit
PB: predicated region body
PF: predicated region fallthrough
CT: control target
= control target key end

     0   :  { %8 = vsyncpa [#allocation3], 0  ;;  %s11531_s0 = inlined_call_operand.hbm [shape: bf16[64,8320], index: 0, kind: input, shape index: {}]   ;;  %s11532_s1 = inlined_call_operand.hbm [shape: bf16[8320,128], index: 1, kind: input, shape index: {}]   ;;  %s11533_s2 = inlined_call_operand.hbm [shape: f32[32,128], index: 2, kind: input, shape index: {}]   ;;  %s11534_s3 = inlined_call_operand.hbm [shape: f32[64,128], index: 3, kind: output, shape index: {}]  }
   0x1   :  { %9 = vsyncpa [#allocation6], 0 }
   0x2   :  { %10 = vsyncpa [#allocation4], 0  ;;  %s11084_s12 = smov [#allocation5]  }
   0x3   :  { %s28_s13 = sshll.u32 %s11084_s12, 4  ;;  %s29_s13 = int_to_ptr.vmem [resolvable:$true] %s28_s13 }
   0x4   :  { %s11006_s14 = scalar_lea.vmem %s29_s13, 66560  ;;  %p11011_p1 = scmp.lt.s32.totalorder %s29_s13, %s29_s13 }
   0x5   :  { %p11007_p0 = scmp.ne.s32.totalorder %s29_s13, %s11006_s14  ;;  %p11012_p2 = scmp.lt.s32.totalorder %s11006_s14, %s11006_s14 }
   0x7   :  { %p11013_p3 = por %p11012_p2, %p11011_p1 }
   0x9   :  { %p11014_p4 = pnand %p11013_p3, %p11007_p0 }
   0xb   :  { %11017 = shalt.err (!%p11014_p4)
}
   0xc   :  { %s11085_s15 = smov 64   ;;  %s11086_s16 = smov 4  }
   0xd   :  { %34 = dma.hbm_to_vmem [thread:$0]  %s11532_s1, 66560, %s29_s13, [#allocation6], %s11085_s15, %s11085_s15, %s11086_s16  }
   0xe   :  { %s11087_s19 = smov [#allocation2]  }
   0xf   :  { %s16_s20 = sshll.u32 %s11087_s19, 4  ;;  %s17_s20 = int_to_ptr.vmem [resolvable:$true] %s16_s20 }
  0x10   :  { %s11026_s21 = scalar_lea.vmem %s17_s20, 33280  ;;  %p11031_p6 = scmp.lt.s32.totalorder %s17_s20, %s17_s20 }
  0x11   :  { %p11027_p5 = scmp.ne.s32.totalorder %s17_s20, %s11026_s21  ;;  %p11032_p7 = scmp.lt.s32.totalorder %s11026_s21, %s11026_s21 }
  0x13   :  { %p11033_p8 = por %p11032_p7, %p11031_p6 }
  0x15   :  { %p11034_p9 = pnand %p11033_p8, %p11027_p5 }
  0x17   :  { %11037 = shalt.err (!%p11034_p9)
}
  0x18   :  { %s11088_s22 = smov 4160   ;;  %s11089_s23 = smov 260  }
  0x19   :  { %22 = dma.hbm_to_vmem [thread:$0]  %s11531_s0, 33280, %s17_s20, [#allocation3], %s11088_s22, %s11088_s22, %s11089_s23  }
  0x1a   :  { %s11090_s26 = smov [#allocation7]  }
  0x1b   :  { %s40_s27 = sshll.u32 %s11090_s26, 4  ;;  %s41_s27 = int_to_ptr.vmem [resolvable:$true] %s40_s27 }
  0x1c   :  { %s11046_s1 = scalar_lea.vmem %s41_s27, 512  ;;  %p11051_p11 = scmp.lt.s32.totalorder %s41_s27, %s41_s27 }
  0x1d   :  { %p11047_p10 = scmp.ne.s32.totalorder %s41_s27, %s11046_s1  ;;  %p11052_p12 = scmp.lt.s32.totalorder %s11046_s1, %s11046_s1 }
  0x1f   :  { %p11053_p13 = por %p11052_p12, %p11051_p11 }
  0x21   :  { %p11054_p0 = pnand %p11053_p13, %p11047_p10 }
  0x23   :  { %11057 = shalt.err (!%p11054_p0)
}
  0x24   :  { %s11091_s28 = smov 128   ;;  %s11092_s29 = smov 8  }
  0x25   :  { %46 = dma.hbm_to_vmem [thread:$0]  %s11533_s2, 512, %s41_s27, [#allocation6], %s11091_s28, %s11091_s28, %s11092_s29  }
  0x26   :  { %11078 = dma.done.wait [#allocation3], 33280  }
  0x27   :  { %11079 = vsyncadd [#allocation3], 4294934016 }
  0x28   :  { %11080 = dma.done.wait [#allocation6], 67072  }
  0x29   :  { %11081 = vsyncadd [#allocation6], 4294900224  ;;  %v10090_v0 = vld [vmem:[#allocation5 + $0x78] sm:$0xff]   ;;  %v10094_v4 = vld [vmem:[#allocation5 + $0x70] sm:$0xff]   ;;  %s11093_s0 = smov [#allocation8]  }
  0x2a   :  { %v10091_v1 = vld [vmem:[#allocation5 + $0xf8] sm:$0xff]   ;;  %8748 = vmatprep.subr.bf16.mxu0 %v10090_v0  ;;  %v10095_v5 = vld [vmem:[#allocation5 + $0xf0] sm:$0xff]   ;;  %v10098_v8 = vld [vmem:[#allocation5 + $0x68] sm:$0xff]   ;;  %s7955_s2 = sshll.u32 %s11093_s0, 4  ;;  %s7956_s2 = int_to_ptr.vmem [resolvable:$true] %s7955_s2 }
  0x2b   :  { %v10092_v2 = vld [vmem:[#allocation5 + $0x38] sm:$0xff]   ;;  %8788 = vmatprep.subr.bf16.mxu1 %v10091_v1  ;;  %v10096_v6 = vld [vmem:[#allocation5 + $0x30] sm:$0xff]   ;;  %v10099_v9 = vld [vmem:[#allocation5 + $0xe8] sm:$0xff]   ;;  %s11058_s5 = scalar_lea.vmem %s7956_s2, 1024  ;;  %p11063_p2 = scmp.lt.s32.totalorder %s7956_s2, %s7956_s2 }
  0x2c   :  { %v10093_v3 = vld [vmem:[#allocation5 + $0xb8] sm:$0xff]   ;;  %8749 = vmatpush3.bf16.msra.mxu0 %v10092_v2  ;;  %v10097_v7 = vld [vmem:[#allocation5 + $0xb0] sm:$0xff]   ;;  %v10100_v10 = vld [vmem:[#allocation5 + $0x28] sm:$0xff]   ;;  %p11059_p1 = scmp.ne.s32.totalorder %s7956_s2, %s11058_s5  ;;  %p11064_p3 = scmp.lt.s32.totalorder %s11058_s5, %s11058_s5 }
  0x2d   :  { %8789 = vmatpush3.bf16.msra.mxu1 %v10093_v3  ;;  %8750 = vmatprep.subr.bf16.mxu0 %v10094_v4  ;;  %v10101_v11 = vld [vmem:[#allocation5 + $0xa8] sm:$0xff]   ;;  %v10102_v12 = vld [vmem:[#allocation5 + $0x60] sm:$0xff]   ;;  %v10106_v16 = vld [vmem:[#allocation5 + $0x58] sm:$0xff]  }
  0x2e   :  { %8790 = vmatprep.subr.bf16.mxu1 %v10095_v5  ;;  %v10103_v13 = vld [vmem:[#allocation5 + $0xe0] sm:$0xff]   ;;  %v10107_v17 = vld [vmem:[#allocation5 + $0xd8] sm:$0xff]   ;;  %v10110_v20 = vld [vmem:[#allocation5 + $0x50] sm:$0xff]   ;;  %p11065_p4 = por %p11064_p3, %p11063_p2 }
  0x2f   :  { %v10104_v14 = vld [vmem:[#allocation5 + $0x20] sm:$0xff]   ;;  %v10108_v18 = vld [vmem:[#allocation5 + $0x18] sm:$0xff]   ;;  %v10111_v21 = vld [vmem:[#allocation5 + $0xd0] sm:$0xff]  }
  0x30   :  { %8751 = vmatpush3.bf16.msra.mxu0 %v10096_v6  ;;  %v10105_v15 = vld [vmem:[#allocation5 + $0xa0] sm:$0xff]   ;;  %v10109_v19 = vld [vmem:[#allocation5 + $0x98] sm:$0xff]   ;;  %v10112_v22 = vld [vmem:[#allocation5 + $0x10] sm:$0xff]   ;;  %p11066_p5 = pnand %p11065_p4, %p11059_p1 }
  0x31   :  { %8791 = vmatpush3.bf16.msra.mxu1 %v10097_v7  ;;  %8752 = vmatprep.subr.bf16.mxu0 %v10098_v8  ;;  %v10113_v23 = vld [vmem:[#allocation5 + $0x90] sm:$0xff]   ;;  %v10114_v24 = vld [vmem:[#allocation5 + $0x48] sm:$0xff]   ;;  %v10118_v28 = vld [vmem:[#allocation5 + $0x40] sm:$0xff]  }
  0x32   :  { %8792 = vmatprep.subr.bf16.mxu1 %v10099_v9  ;;  %v10115_v25 = vld [vmem:[#allocation5 + $0xc8] sm:$0xff]   ;;  %v10119_v29 = vld [vmem:[#allocation5 + $0xc0] sm:$0xff]   ;;  %v10128_v36 = vld [vmem:[#allocation5 + $0x178] sm:$0xff]  }
  0x33   :  { %v10116_v26 = vld [vmem:[#allocation5 + $0x8] sm:$0xff]   ;;  %v10120_v30 = vld [vmem:[#allocation5] sm:$0xff]   ;;  %v10129_v37 = vld [vmem:[#allocation5 + $0x1f8] sm:$0xff]  }
  0x34   :  { %8753 = vmatpush3.bf16.msra.mxu0 %v10100_v10  ;;  %v10117_v27 = vld [vmem:[#allocation5 + $0x88] sm:$0xff]   ;;  %v10121_v31 = vld [vmem:[#allocation5 + $0x80] sm:$0xff]   ;;  %v10130_v38 = vld [vmem:[#allocation5 + $0x138] sm:$0xff]  }
  0x35   :  { %8793 = vmatpush3.bf16.msra.mxu1 %v10101_v11  ;;  %8754 = vmatprep.subr.bf16.mxu0 %v10102_v12  ;;  %v10122_v32 = vld [vmem:[#allocation2] ss:$260 sps:$4 sm:$0xff]   ;;  %v10125_v34 = vld [vmem:[#allocation2 + $0x8] ss:$260 sps:$4 sm:$0xff]   ;;  %v10131_v39 = vld [vmem:[#allocation5 + $0x1b8] sm:$0xff]  }
  0x36   :  { %8794 = vmatprep.subr.bf16.mxu1 %v10103_v13  ;;  %v10124_v33 = vld [vmem:[#allocation2 + $0x4] ss:$260 sps:$4 sm:$0xff]   ;;  %v10127_v35 = vld [vmem:[#allocation2 + $0xc] ss:$260 sps:$4 sm:$0xff]   ;;  %v10138_v45 = vld [vmem:[#allocation2 + $0x214] ss:$260 sps:$4 sm:$0xff]  }
  0x37   :  { %5817 = vmatprep.mubr.bf16.mxu0 %v10124_v33  ;;  %5882 = vmatprep.mubr.bf16.mxu1 %v10127_v35  ;;  %v10132_v40 = vld [vmem:[#allocation5 + $0x170] sm:$0xff]   ;;  %v10140_v46 = vld [vmem:[#allocation2 + $0x208] ss:$260 sps:$4 sm:$0xff]   ;;  %v10146_v52 = vld [vmem:[#allocation5 + $0x160] sm:$0xff]  }
  0x38   :  { %8755 = vmatpush3.bf16.msra.mxu0 %v10104_v14  ;;  %v10133_v41 = vld [vmem:[#allocation5 + $0x1f0] sm:$0xff]   ;;  %v10142_v48 = vld [vmem:[#allocation5 + $0x168] sm:$0xff]   ;;  %v10147_v53 = vld [vmem:[#allocation5 + $0x1e0] sm:$0xff]  }
  0x39   :  { %8795 = vmatpush3.bf16.msra.mxu1 %v10105_v15  ;;  %8756 = vmatprep.subr.bf16.mxu0 %v10106_v16  ;;  %v10134_v42 = vld [vmem:[#allocation5 + $0x130] sm:$0xff]   ;;  %v10143_v49 = vld [vmem:[#allocation5 + $0x1e8] sm:$0xff]   ;;  %v10148_v54 = vld [vmem:[#allocation5 + $0x120] sm:$0xff]  }
  0x3a   :  { %8796 = vmatprep.subr.bf16.mxu1 %v10107_v17  ;;  %v10135_v43 = vld [vmem:[#allocation5 + $0x1b0] sm:$0xff]   ;;  %v10144_v50 = vld [vmem:[#allocation5 + $0x128] sm:$0xff]   ;;  %v10149_v55 = vld [vmem:[#allocation5 + $0x1a0] sm:$0xff]  }
  0x3b   :  { %v10136_v44 = vld [vmem:[#allocation2 + $0x20c] ss:$260 sps:$4 sm:$0xff]   ;;  %v10150_v56 = vld [vmem:[#allocation2 + $0x414] ss:$260 sps:$4 sm:$0xff]   ;;  %v10152_v57 = vld [vmem:[#allocation2 + $0x41c] ss:$260 sps:$4 sm:$0xff]  }
  0x3c   :  { %8757 = vmatpush3.bf16.msra.mxu0 %v10108_v18  ;;  %v10141_v47 = vld [vmem:[#allocation2 + $0x210] ss:$260 sps:$4 sm:$0xff]   ;;  %v10145_v51 = vld [vmem:[#allocation5 + $0x1a8] sm:$0xff]   ;;  %v10155_v59 = vld [vmem:[#allocation2 + $0x418] ss:$260 sps:$4 sm:$0xff]  }
  0x3d   :  { %8797 = vmatpush3.bf16.msra.mxu1 %v10109_v19  ;;  %8758 = vmatprep.subr.bf16.mxu0 %v10110_v20  ;;  %v10154_v58 = vld [vmem:[#allocation2 + $0x410] ss:$260 sps:$4 sm:$0xff]   ;;  %v10156_v60 = vld [vmem:[#allocation5 + $0x158] sm:$0xff]   ;;  %v10166_v5 = vld [vmem:[#allocation2 + $0x624] ss:$260 sps:$4 sm:$0xff]  }
  0x3e   :  { %8798 = vmatprep.subr.bf16.mxu1 %v10111_v21  ;;  %v10157_v61 = vld [vmem:[#allocation5 + $0x1d8] sm:$0xff]   ;;  %v10160_v0 = vld [vmem:[#allocation5 + $0x150] sm:$0xff]   ;;  %v10169_v7 = vld [vmem:[#allocation2 + $0x620] ss:$260 sps:$4 sm:$0xff]  }
  0x3f   :  { %v10158_v62 = vld [vmem:[#allocation5 + $0x118] sm:$0xff]   ;;  %v10161_v1 = vld [vmem:[#allocation5 + $0x1d0] sm:$0xff]   ;;  %v10170_v8 = vld [vmem:[#allocation5 + $0x148] sm:$0xff]  }
  0x40   :  { %8759 = vmatpush3.bf16.msra.mxu0 %v10112_v22  ;;  %v10159_v63 = vld [vmem:[#allocation5 + $0x198] sm:$0xff]   ;;  %v10162_v2 = vld [vmem:[#allocation5 + $0x110] sm:$0xff]   ;;  %v10171_v9 = vld [vmem:[#allocation5 + $0x1c8] sm:$0xff]  }
  0x41   :  { %8799 = vmatpush3.bf16.msra.mxu1 %v10113_v23  ;;  %8760 = vmatprep.subr.bf16.mxu0 %v10114_v24  ;;  %v10163_v3 = vld [vmem:[#allocation5 + $0x190] sm:$0xff]   ;;  %v10164_v4 = vld [vmem:[#allocation2 + $0x61c] ss:$260 sps:$4 sm:$0xff]   ;;  %v10172_v10 = vld [vmem:[#allocation5 + $0x108] sm:$0xff]  }
  0x42   :  { %8800 = vmatprep.subr.bf16.mxu1 %v10115_v25  ;;  %v10168_v6 = vld [vmem:[#allocation2 + $0x618] ss:$260 sps:$4 sm:$0xff]   ;;  %v10173_v11 = vld [vmem:[#allocation5 + $0x188] sm:$0xff]   ;;  %v10174_v12 = vld [vmem:[#allocation5 + $0x140] sm:$0xff]  }
  0x43   :  { %v10175_v13 = vld [vmem:[#allocation5 + $0x1c0] sm:$0xff]   ;;  %v10178_v16 = vld [vmem:[#allocation2 + $0x10] ss:$260 sps:$4 sm:$0xff]   ;;  %v10181_v18 = vld [vmem:[#allocation2 + $0x18] ss:$260 sps:$4 sm:$0xff]  }
  0x44   :  { %8761 = vmatpush3.bf16.msra.mxu0 %v10116_v26  ;;  %v10176_v14 = vld [vmem:[#allocation5 + $0x100] sm:$0xff]   ;;  %v10180_v17 = vld [vmem:[#allocation2 + $0x14] ss:$260 sps:$4 sm:$0xff]   ;;  %v10199_v33 = vld [vmem:[#allocation5 + $0x2e8] sm:$0xff]  }
  0x45   :  { %8801 = vmatpush3.bf16.msra.mxu1 %v10117_v27  ;;  %8762 = vmatprep.subr.bf16.mxu0 %v10118_v28  ;;  %v10177_v15 = vld [vmem:[#allocation5 + $0x180] sm:$0xff]   ;;  %v10184_v20 = vld [vmem:[#allocation5 + $0x278] sm:$0xff]   ;;  %v10188_v24 = vld [vmem:[#allocation5 + $0x270] sm:$0xff]  }
  0x46   :  { %8802 = vmatprep.subr.bf16.mxu1 %v10119_v29  ;;  %v10183_v19 = vld [vmem:[#allocation2 + $0x1c] ss:$260 sps:$4 sm:$0xff]   ;;  %v10189_v25 = vld [vmem:[#allocation5 + $0x2f0] sm:$0xff]   ;;  %v10194_v29 = vld [vmem:[#allocation2 + $0x224] ss:$260 sps:$4 sm:$0xff]  }
  0x47   :  { %v10185_v21 = vld [vmem:[#allocation5 + $0x2f8] sm:$0xff]   ;;  %v10190_v26 = vld [vmem:[#allocation5 + $0x230] sm:$0xff]   ;;  %v10201_v35 = vld [vmem:[#allocation5 + $0x2a8] sm:$0xff]  }
  0x48   :  { %8763 = vmatpush3.bf16.msra.mxu0 %v10120_v30  ;;  %v10186_v22 = vld [vmem:[#allocation5 + $0x238] sm:$0xff]   ;;  %v10191_v27 = vld [vmem:[#allocation5 + $0x2b0] sm:$0xff]  }
  0x49   :  { %8803 = vmatpush3.bf16.msra.mxu1 %v10121_v31  ;;  %8828 = vmatprep.subr.bf16.mxu0 %v10128_v36  ;;  %v10187_v23 = vld [vmem:[#allocation5 + $0x2b8] sm:$0xff]   ;;  %v10197_v31 = vld [vmem:[#allocation2 + $0x220] ss:$260 sps:$4 sm:$0xff]  }
  0x4a   :  { %8868 = vmatprep.subr.bf16.mxu1 %v10129_v37  ;;  %v10192_v28 = vld [vmem:[#allocation2 + $0x21c] ss:$260 sps:$4 sm:$0xff]  }
  0x4b   :  { %5818 = vmatmul.mubr.bf16.vlgmr.msra.gmra.mxu0 %v10122_v32  ;;  %v10196_v30 = vld [vmem:[#allocation2 + $0x218] ss:$260 sps:$4 sm:$0xff]   ;;  %v10198_v32 = vld [vmem:[#allocation5 + $0x268] sm:$0xff]   ;;  %v10202_v36 = vld [vmem:[#allocation5 + $0x260] sm:$0xff]  }
  0x4c   :  { %5883 = vmatmul.mubr.bf16.vlgmr.msra.gmra.mxu1 %v10125_v34  ;;  %8829 = vmatpush3.bf16.msra.mxu0 %v10130_v38  ;;  %v10200_v34 = vld [vmem:[#allocation5 + $0x228] sm:$0xff]   ;;  %v10203_v37 = vld [vmem:[#allocation5 + $0x2e0] sm:$0xff]  }
  0x4d   :  { %8869 = vmatpush3.bf16.msra.mxu1 %v10131_v39  ;;  %8830 = vmatprep.subr.bf16.mxu0 %v10132_v40  ;;  %v10204_v38 = vld [vmem:[#allocation5 + $0x220] sm:$0xff]  }
  0x4e   :  { %8870 = vmatprep.subr.bf16.mxu1 %v10133_v41  ;;  %5825 = vmatprep.mubr.bf16.mxu0 %v10136_v44  ;;  %v10205_v39 = vld [vmem:[#allocation5 + $0x2a0] sm:$0xff]   ;;  %v10208_v41 = vld [vmem:[#allocation2 + $0x42c] ss:$260 sps:$4 sm:$0xff]   ;;  %v10212_v44 = vld [vmem:[#allocation5 + $0x258] sm:$0xff]  }
  0x4f   :  { %5890 = vmatprep.mubr.bf16.mxu1 %v10138_v45  ;;  %v10206_v40 = vld [vmem:[#allocation2 + $0x424] ss:$260 sps:$4 sm:$0xff]   ;;  %v10213_v45 = vld [vmem:[#allocation5 + $0x2d8] sm:$0xff]  }
  0x50   :  { %8831 = vmatpush3.bf16.msra.mxu0 %v10134_v42  ;;  %v10210_v42 = vld [vmem:[#allocation2 + $0x420] ss:$260 sps:$4 sm:$0xff]  }
  0x51   :  { %8871 = vmatpush3.bf16.msra.mxu1 %v10135_v43  ;;  %8832 = vmatprep.subr.bf16.mxu0 %v10142_v48  ;;  %v10211_v43 = vld [vmem:[#allocation2 + $0x428] ss:$260 sps:$4 sm:$0xff]   ;;  %v10216_v48 = vld [vmem:[#allocation5 + $0x250] sm:$0xff]  }
  0x52   :  { %8872 = vmatprep.subr.bf16.mxu1 %v10143_v49  ;;  %v10217_v49 = vld [vmem:[#allocation5 + $0x2d0] sm:$0xff]  }
  0x53   :  { %5826 = vmatmul.mubr.bf16.gmra.mxu0 %v10140_v46  ;;  %v10214_v46 = vld [vmem:[#allocation5 + $0x218] sm:$0xff]  }
  0x54   :  { %5891 = vmatmul.mubr.bf16.gmra.mxu1 %v10141_v47  ;;  %8833 = vmatpush3.bf16.msra.mxu0 %v10144_v50  ;;  %v10215_v47 = vld [vmem:[#allocation5 + $0x298] sm:$0xff]   ;;  %v10218_v50 = vld [vmem:[#allocation5 + $0x210] sm:$0xff]  }
  0x55   :  { %8873 = vmatpush3.bf16.msra.mxu1 %v10145_v51  ;;  %8834 = vmatprep.subr.bf16.mxu0 %v10146_v52  ;;  %v10219_v51 = vld [vmem:[#allocation5 + $0x290] sm:$0xff]  }
  0x56   :  { %8874 = vmatprep.subr.bf16.mxu1 %v10147_v53  ;;  %5833 = vmatprep.mubr.bf16.mxu0 %v10150_v56  ;;  %v10220_v52 = vld [vmem:[#allocation2 + $0x62c] ss:$260 sps:$4 sm:$0xff]   ;;  %v10222_v53 = vld [vmem:[#allocation2 + $0x634] ss:$260 sps:$4 sm:$0xff]  }
  0x57   :  { %5898 = vmatprep.mubr.bf16.mxu1 %v10152_v57  ;;  %v10226_v56 = vld [vmem:[#allocation5 + $0x248] sm:$0xff]  }
  0x58   :  { %8835 = vmatpush3.bf16.msra.mxu0 %v10148_v54  ;;  %v10224_v54 = vld [vmem:[#allocation2 + $0x628] ss:$260 sps:$4 sm:$0xff]  }
  0x59   :  { %8875 = vmatpush3.bf16.msra.mxu1 %v10149_v55  ;;  %8836 = vmatprep.subr.bf16.mxu0 %v10156_v60  ;;  %v10225_v55 = vld [vmem:[#allocation2 + $0x630] ss:$260 sps:$4 sm:$0xff]   ;;  %v10227_v57 = vld [vmem:[#allocation5 + $0x2c8] sm:$0xff]   ;;  %v10230_v60 = vld [vmem:[#allocation5 + $0x240] sm:$0xff]  }
  0x5a   :  { %8876 = vmatprep.subr.bf16.mxu1 %v10157_v61  ;;  %v10231_v61 = vld [vmem:[#allocation5 + $0x2c0] sm:$0xff]  }
  0x5b   :  { %5834 = vmatmul.mubr.bf16.gmra.mxu0 %v10154_v58  ;;  %v10228_v58 = vld [vmem:[#allocation5 + $0x208] sm:$0xff]  }
  0x5c   :  { %5899 = vmatmul.mubr.bf16.gmra.mxu1 %v10155_v59  ;;  %8837 = vmatpush3.bf16.msra.mxu0 %v10158_v62  ;;  %v10229_v59 = vld [vmem:[#allocation5 + $0x288] sm:$0xff]   ;;  %v10232_v62 = vld [vmem:[#allocation5 + $0x200] sm:$0xff]  }
  0x5d   :  { %8877 = vmatpush3.bf16.msra.mxu1 %v10159_v63  ;;  %8838 = vmatprep.subr.bf16.mxu0 %v10160_v0  ;;  %v10233_v63 = vld [vmem:[#allocation5 + $0x280] sm:$0xff]  }
  0x5e   :  { %8878 = vmatprep.subr.bf16.mxu1 %v10161_v1  ;;  %5841 = vmatprep.mubr.bf16.mxu0 %v10164_v4  ;;  %v10234_v0 = vld [vmem:[#allocation2 + $0x20] ss:$260 sps:$4 sm:$0xff]   ;;  %v10240_v4 = vld [vmem:[#allocation5 + $0x378] sm:$0xff]  }
  0x5f   :  { %5906 = vmatprep.mubr.bf16.mxu1 %v10166_v5  ;;  %v10236_v1 = vld [vmem:[#allocation2 + $0x24] ss:$260 sps:$4 sm:$0xff]   ;;  %v10241_v5 = vld [vmem:[#allocation5 + $0x3f8] sm:$0xff]  }
  0x60   :  { %8839 = vmatpush3.bf16.msra.mxu0 %v10162_v2  ;;  %v10237_v2 = vld [vmem:[#allocation2 + $0x28] ss:$260 sps:$4 sm:$0xff]  }
  0x61   :  { %8879 = vmatpush3.bf16.msra.mxu1 %v10163_v3  ;;  %8840 = vmatprep.subr.bf16.mxu0 %v10170_v8  ;;  %v10239_v3 = vld [vmem:[#allocation2 + $0x2c] ss:$260 sps:$4 sm:$0xff]  }
  0x62   :  { %8880 = vmatprep.subr.bf16.mxu1 %v10171_v9  ;;  %v10244_v8 = vld [vmem:[#allocation5 + $0x370] sm:$0xff]  }
  0x63   :  { %5842 = vmatmul.mubr.bf16.gmra.mxu0 %v10168_v6  ;;  %v10242_v6 = vld [vmem:[#allocation5 + $0x338] sm:$0xff]   ;;  %v10245_v9 = vld [vmem:[#allocation5 + $0x3f0] sm:$0xff]  }
  0x64   :  { %5907 = vmatmul.mubr.bf16.gmra.mxu1 %v10169_v7  ;;  %8841 = vmatpush3.bf16.msra.mxu0 %v10172_v10  ;;  %v10243_v7 = vld [vmem:[#allocation5 + $0x3b8] sm:$0xff]   ;;  %v10246_v10 = vld [vmem:[#allocation5 + $0x330] sm:$0xff]  }
  0x65   :  { %8881 = vmatpush3.bf16.msra.mxu1 %v10173_v11  ;;  %8842 = vmatprep.subr.bf16.mxu0 %v10174_v12  ;;  %v10247_v11 = vld [vmem:[#allocation5 + $0x3b0] sm:$0xff]  }
  0x66   :  { %8882 = vmatprep.subr.bf16.mxu1 %v10175_v13  ;;  %5947 = vmatprep.mubr.bf16.mxu0 %v10180_v17  ;;  %v10248_v12 = vld [vmem:[#allocation2 + $0x22c] ss:$260 sps:$4 sm:$0xff]   ;;  %v10250_v13 = vld [vmem:[#allocation2 + $0x234] ss:$260 sps:$4 sm:$0xff]  }
  0x67   :  { %6012 = vmatprep.mubr.bf16.mxu1 %v10183_v19  ;;  %v10255_v17 = vld [vmem:[#allocation5 + $0x3e8] sm:$0xff]  }
  0x68   :  { %8843 = vmatpush3.bf16.msra.mxu0 %v10176_v14  ;;  %v10252_v14 = vld [vmem:[#allocation2 + $0x228] ss:$260 sps:$4 sm:$0xff]  }
  0x69   :  { %8883 = vmatpush3.bf16.msra.mxu1 %v10177_v15  ;;  %8908 = vmatprep.subr.bf16.mxu0 %v10184_v20  ;;  %v10253_v15 = vld [vmem:[#allocation2 + $0x230] ss:$260 sps:$4 sm:$0xff]   ;;  %v10257_v19 = vld [vmem:[#allocation5 + $0x3a8] sm:$0xff]   ;;  %v10258_v20 = vld [vmem:[#allocation5 + $0x360] sm:$0xff]  }
  0x6a   :  { %8948 = vmatprep.subr.bf16.mxu1 %v10185_v21  ;;  %v10259_v21 = vld [vmem:[#allocation5 + $0x3e0] sm:$0xff]  }
  0x6b   :  { %5948 = vmatmul.mubr.bf16.vlgmr.msra.gmra.mxu0 %v10178_v16  ;;  %v10254_v16 = vld [vmem:[#allocation5 + $0x368] sm:$0xff]  }
  0x6c   :  { %6013 = vmatmul.mubr.bf16.vlgmr.msra.gmra.mxu1 %v10181_v18  ;;  %8909 = vmatpush3.bf16.msra.mxu0 %v10186_v22  ;;  %v10256_v18 = vld [vmem:[#allocation5 + $0x328] sm:$0xff]   ;;  %v10260_v22 = vld [vmem:[#allocation5 + $0x320] sm:$0xff]  }
  0x6d   :  { %8949 = vmatpush3.bf16.msra.mxu1 %v10187_v23  ;;  %8910 = vmatprep.subr.bf16.mxu0 %v10188_v24  ;;  %v10261_v23 = vld [vmem:[#allocation5 + $0x3a0] sm:$0xff]   ;;  %v10262_v24 = vld [vmem:[#allocation2 + $0x434] ss:$260 sps:$4 sm:$0xff]  }
  0x6e   :  { %8950 = vmatprep.subr.bf16.mxu1 %v10189_v25  ;;  %5955 = vmatprep.mubr.bf16.mxu0 %v10192_v28  ;;  %v10264_v25 = vld [vmem:[#allocation2 + $0x43c] ss:$260 sps:$4 sm:$0xff]  }
  0x6f   :  { %6020 = vmatprep.mubr.bf16.mxu1 %v10194_v29  ;;  %v10268_v28 = vld [vmem:[#allocation5 + $0x358] sm:$0xff]  }
  0x70   :  { %8911 = vmatpush3.bf16.msra.mxu0 %v10190_v26  ;;  %v10266_v26 = vld [vmem:[#allocation2 + $0x430] ss:$260 sps:$4 sm:$0xff]   ;;  %v10269_v29 = vld [vmem:[#allocation5 + $0x3d8] sm:$0xff]  }
  0x71   :  { %8951 = vmatpush3.bf16.msra.mxu1 %v10191_v27  ;;  %8912 = vmatprep.subr.bf16.mxu0 %v10198_v32  ;;  %v10267_v27 = vld [vmem:[#allocation2 + $0x438] ss:$260 sps:$4 sm:$0xff]   ;;  %v10272_v32 = vld [vmem:[#allocation5 + $0x350] sm:$0xff]  }
  0x72   :  { %8952 = vmatprep.subr.bf16.mxu1 %v10199_v33  ;;  %v10273_v33 = vld [vmem:[#allocation5 + $0x3d0] sm:$0xff]  }
  0x73   :  { %5956 = vmatmul.mubr.bf16.gmra.mxu0 %v10196_v30  ;;  %v10270_v30 = vld [vmem:[#allocation5 + $0x318] sm:$0xff]  }
  0x74   :  { %6021 = vmatmul.mubr.bf16.gmra.mxu1 %v10197_v31  ;;  %8913 = vmatpush3.bf16.msra.mxu0 %v10200_v34  ;;  %v10271_v31 = vld [vmem:[#allocation5 + $0x398] sm:$0xff]   ;;  %v10274_v34 = vld [vmem:[#allocation5 + $0x310] sm:$0xff]  }
  0x75   :  { %8953 = vmatpush3.bf16.msra.mxu1 %v10201_v35  ;;  %8914 = vmatprep.subr.bf16.mxu0 %v10202_v36  ;;  %v10275_v35 = vld [vmem:[#allocation5 + $0x390] sm:$0xff]   ;;  %v10276_v36 = vld [vmem:[#allocation2 + $0x63c] ss:$260 sps:$4 sm:$0xff]  }
  0x76   :  { %8954 = vmatprep.subr.bf16.mxu1 %v10203_v37  ;;  %5963 = vmatprep.mubr.bf16.mxu0 %v10206_v40  ;;  %v10278_v37 = vld [vmem:[#allocation2 + $0x644] ss:$260 sps:$4 sm:$0xff]  }
  0x77   :  { %6028 = vmatprep.mubr.bf16.mxu1 %v10208_v41  ;;  %v10282_v40 = vld [vmem:[#allocation5 + $0x348] sm:$0xff]  }
  0x78   :  { %8915 = vmatpush3.bf16.msra.mxu0 %v10204_v38  ;;  %v10280_v38 = vld [vmem:[#allocation2 + $0x638] ss:$260 sps:$4 sm:$0xff]   ;;  %v10283_v41 = vld [vmem:[#allocation5 + $0x3c8] sm:$0xff]  }
  0x79   :  { %8955 = vmatpush3.bf16.msra.mxu1 %v10205_v39  ;;  %8916 = vmatprep.subr.bf16.mxu0 %v10212_v44  ;;  %v10281_v39 = vld [vmem:[#allocation2 + $0x640] ss:$260 sps:$4 sm:$0xff]  }
  0x7a   :  { %8956 = vmatprep.subr.bf16.mxu1 %v10213_v45  ;;  %v10286_v44 = vld [vmem:[#allocation5 + $0x340] sm:$0xff]  }
  0x7b   :  { %5964 = vmatmul.mubr.bf16.gmra.mxu0 %v10210_v42  ;;  %v10284_v42 = vld [vmem:[#allocation5 + $0x308] sm:$0xff]   ;;  %v10287_v45 = vld [vmem:[#allocation5 + $0x3c0] sm:$0xff]  }
  0x7c   :  { %6029 = vmatmul.mubr.bf16.gmra.mxu1 %v10211_v43  ;;  %8917 = vmatpush3.bf16.msra.mxu0 %v10214_v46  ;;  %v10285_v43 = vld [vmem:[#allocation5 + $0x388] sm:$0xff]   ;;  %v10288_v46 = vld [vmem:[#allocation5 + $0x300] sm:$0xff]  }
  0x7d   :  { %8957 = vmatpush3.bf16.msra.mxu1 %v10215_v47  ;;  %8918 = vmatprep.subr.bf16.mxu0 %v10216_v48  ;;  %v10289_v47 = vld [vmem:[#allocation5 + $0x380] sm:$0xff]   ;;  %v10290_v48 = vld [vmem:[#allocation2 + $0x30] ss:$260 sps:$4 sm:$0xff]  }
  0x7e   :  { %8958 = vmatprep.subr.bf16.mxu1 %v10217_v49  ;;  %5971 = vmatprep.mubr.bf16.mxu0 %v10220_v52  ;;  %v10292_v49 = vld [vmem:[#allocation2 + $0x34] ss:$260 sps:$4 sm:$0xff]  }
  0x7f   :  { %6036 = vmatprep.mubr.bf16.mxu1 %v10222_v53  ;;  %v10296_v52 = vld [vmem:[#allocation5 + $0x478] sm:$0xff]  }
  0x80   :  { %8919 = vmatpush3.bf16.msra.mxu0 %v10218_v50  ;;  %v10293_v50 = vld [vmem:[#allocation2 + $0x38] ss:$260 sps:$4 sm:$0xff]  }
  0x81   :  { %8959 = vmatpush3.bf16.msra.mxu1 %v10219_v51  ;;  %8920 = vmatprep.subr.bf16.mxu0 %v10226_v56  ;;  %v10295_v51 = vld [vmem:[#allocation2 + $0x3c] ss:$260 sps:$4 sm:$0xff]   ;;  %v10300_v56 = vld [vmem:[#allocation5 + $0x470] sm:$0xff]  }
  0x82   :  { %8960 = vmatprep.subr.bf16.mxu1 %v10227_v57  ;;  %v10297_v53 = vld [vmem:[#allocation5 + $0x4f8] sm:$0xff]   ;;  %v10301_v57 = vld [vmem:[#allocation5 + $0x4f0] sm:$0xff]  }
  0x83   :  { %5972 = vmatmul.mubr.bf16.gmra.mxu0 %v10224_v54  ;;  %v10298_v54 = vld [vmem:[#allocation5 + $0x438] sm:$0xff]  }
  0x84   :  { %6037 = vmatmul.mubr.bf16.gmra.mxu1 %v10225_v55  ;;  %8921 = vmatpush3.bf16.msra.mxu0 %v10228_v58  ;;  %v10299_v55 = vld [vmem:[#allocation5 + $0x4b8] sm:$0xff]   ;;  %v10302_v58 = vld [vmem:[#allocation5 + $0x430] sm:$0xff]  }
  0x85   :  { %8961 = vmatpush3.bf16.msra.mxu1 %v10229_v59  ;;  %8922 = vmatprep.subr.bf16.mxu0 %v10230_v60  ;;  %v10303_v59 = vld [vmem:[#allocation5 + $0x4b0] sm:$0xff]   ;;  %v10304_v60 = vld [vmem:[#allocation2 + $0x23c] ss:$260 sps:$4 sm:$0xff]  }
  0x86   :  { %8962 = vmatprep.subr.bf16.mxu1 %v10231_v61  ;;  %6077 = vmatprep.mubr.bf16.mxu0 %v10236_v1  ;;  %v10306_v61 = vld [vmem:[#allocation2 + $0x244] ss:$260 sps:$4 sm:$0xff]  }
  0x87   :  { %6142 = vmatprep.mubr.bf16.mxu1 %v10239_v3  ;;  %v10311_v1 = vld [vmem:[#allocation5 + $0x4e8] sm:$0xff]  }
  0x88   :  { %8923 = vmatpush3.bf16.msra.mxu0 %v10232_v62  ;;  %v10308_v62 = vld [vmem:[#allocation2 + $0x238] ss:$260 sps:$4 sm:$0xff]   ;;  %v10313_v3 = vld [vmem:[#allocation5 + $0x4a8] sm:$0xff]  }
  0x89   :  { %8963 = vmatpush3.bf16.msra.mxu1 %v10233_v63  ;;  %8988 = vmatprep.subr.bf16.mxu0 %v10240_v4  ;;  %v10309_v63 = vld [vmem:[#allocation2 + $0x240] ss:$260 sps:$4 sm:$0xff]  }
  0x8a   :  { %9028 = vmatprep.subr.bf16.mxu1 %v10241_v5  ;;  %v10314_v4 = vld [vmem:[#allocation5 + $0x460] sm:$0xff]  }
  0x8b   :  { %6078 = vmatmul.mubr.bf16.vlgmr.msra.gmra.mxu0 %v10234_v0  ;;  %v10310_v0 = vld [vmem:[#allocation5 + $0x468] sm:$0xff]   ;;  %v10315_v5 = vld [vmem:[#allocation5 + $0x4e0] sm:$0xff]  }
  0x8c   :  { %6143 = vmatmul.mubr.bf16.vlgmr.msra.gmra.mxu1 %v10237_v2  ;;  %8989 = vmatpush3.bf16.msra.mxu0 %v10242_v6  ;;  %v10312_v2 = vld [vmem:[#allocation5 + $0x428] sm:$0xff]   ;;  %v10316_v6 = vld [vmem:[#allocation5 + $0x420] sm:$0xff]  }
  0x8d   :  { %9029 = vmatpush3.bf16.msra.mxu1 %v10243_v7  ;;  %8990 = vmatprep.subr.bf16.mxu0 %v10244_v8  ;;  %v10317_v7 = vld [vmem:[#allocation5 + $0x4a0] sm:$0xff]  }
  0x8e   :  { %9030 = vmatprep.subr.bf16.mxu1 %v10245_v9  ;;  %6085 = vmatprep.mubr.bf16.mxu0 %v10248_v12  ;;  %v10318_v8 = vld [vmem:[#allocation2 + $0x444] ss:$260 sps:$4 sm:$0xff]   ;;  %v10320_v9 = vld [vmem:[#allocation2 + $0x44c] ss:$260 sps:$4 sm:$0xff]   ;;  %v10324_v12 = vld [vmem:[#allocation5 + $0x458] sm:$0xff]  }
  0x8f   :  { %6150 = vmatprep.mubr.bf16.mxu1 %v10250_v13  ;;  %v10325_v13 = vld [vmem:[#allocation5 + $0x4d8] sm:$0xff]  }
  0x90   :  { %8991 = vmatpush3.bf16.msra.mxu0 %v10246_v10  ;;  %v10322_v10 = vld [vmem:[#allocation2 + $0x440] ss:$260 sps:$4 sm:$0xff]  }
  0x91   :  { %9031 = vmatpush3.bf16.msra.mxu1 %v10247_v11  ;;  %8992 = vmatprep.subr.bf16.mxu0 %v10254_v16  ;;  %v10323_v11 = vld [vmem:[#allocation2 + $0x448] ss:$260 sps:$4 sm:$0xff]   ;;  %v10328_v16 = vld [vmem:[#allocation5 + $0x450] sm:$0xff]  }
  0x92   :  { %9032 = vmatprep.subr.bf16.mxu1 %v10255_v17  ;;  %v10329_v17 = vld [vmem:[#allocation5 + $0x4d0] sm:$0xff]  }
  0x93   :  { %6086 = vmatmul.mubr.bf16.gmra.mxu0 %v10252_v14  ;;  %v10326_v14 = vld [vmem:[#allocation5 + $0x418] sm:$0xff]  }
  0x94   :  { %6151 = vmatmul.mubr.bf16.gmra.mxu1 %v10253_v15  ;;  %8993 = vmatpush3.bf16.msra.mxu0 %v10256_v18  ;;  %v10327_v15 = vld [vmem:[#allocation5 + $0x498] sm:$0xff]   ;;  %v10330_v18 = vld [vmem:[#allocation5 + $0x410] sm:$0xff]  }
  0x95   :  { %9033 = vmatpush3.bf16.msra.mxu1 %v10257_v19  ;;  %8994 = vmatprep.subr.bf16.mxu0 %v10258_v20  ;;  %v10331_v19 = vld [vmem:[#allocation5 + $0x490] sm:$0xff]  }
  0x96   :  { %9034 = vmatprep.subr.bf16.mxu1 %v10259_v21  ;;  %6093 = vmatprep.mubr.bf16.mxu0 %v10262_v24  ;;  %v10332_v20 = vld [vmem:[#allocation2 + $0x64c] ss:$260 sps:$4 sm:$0xff]   ;;  %v10334_v21 = vld [vmem:[#allocation2 + $0x654] ss:$260 sps:$4 sm:$0xff]  }
  0x97   :  { %6158 = vmatprep.mubr.bf16.mxu1 %v10264_v25  ;;  %v10338_v24 = vld [vmem:[#allocation5 + $0x448] sm:$0xff]  }
  0x98   :  { %8995 = vmatpush3.bf16.msra.mxu0 %v10260_v22  ;;  %v10336_v22 = vld [vmem:[#allocation2 + $0x648] ss:$260 sps:$4 sm:$0xff]  }
  0x99   :  { %9035 = vmatpush3.bf16.msra.mxu1 %v10261_v23  ;;  %8996 = vmatprep.subr.bf16.mxu0 %v10268_v28  ;;  %v10337_v23 = vld [vmem:[#allocation2 + $0x650] ss:$260 sps:$4 sm:$0xff]   ;;  %v10339_v25 = vld [vmem:[#allocation5 + $0x4c8] sm:$0xff]   ;;  %v10342_v28 = vld [vmem:[#allocation5 + $0x440] sm:$0xff]  }
  0x9a   :  { %9036 = vmatprep.subr.bf16.mxu1 %v10269_v29  ;;  %v10343_v29 = vld [vmem:[#allocation5 + $0x4c0] sm:$0xff]  }
  0x9b   :  { %6094 = vmatmul.mubr.bf16.gmra.mxu0 %v10266_v26  ;;  %v10340_v26 = vld [vmem:[#allocation5 + $0x408] sm:$0xff]  }
  0x9c   :  { %6159 = vmatmul.mubr.bf16.gmra.mxu1 %v10267_v27  ;;  %8997 = vmatpush3.bf16.msra.mxu0 %v10270_v30  ;;  %v10341_v27 = vld [vmem:[#allocation5 + $0x488] sm:$0xff]   ;;  %v10344_v30 = vld [vmem:[#allocation5 + $0x400] sm:$0xff]  }
  0x9d   :  { %9037 = vmatpush3.bf16.msra.mxu1 %v10271_v31  ;;  %8998 = vmatprep.subr.bf16.mxu0 %v10272_v32  ;;  %v10345_v31 = vld [vmem:[#allocation5 + $0x480] sm:$0xff]  }
  0x9e   :  { %9038 = vmatprep.subr.bf16.mxu1 %v10273_v33  ;;  %6101 = vmatprep.mubr.bf16.mxu0 %v10276_v36  ;;  %v10346_v32 = vld [vmem:[#allocation2 + $0x40] ss:$260 sps:$4 sm:$0xff]   ;;  %v10352_v36 = vld [vmem:[#allocation5 + $0x578] sm:$0xff]  }
  0x9f   :  { %6166 = vmatprep.mubr.bf16.mxu1 %v10278_v37  ;;  %v10348_v33 = vld [vmem:[#allocation2 + $0x44] ss:$260 sps:$4 sm:$0xff]   ;;  %v10353_v37 = vld [vmem:[#allocation5 + $0x5f8] sm:$0xff]  }
  0xa0   :  { %8999 = vmatpush3.bf16.msra.mxu0 %v10274_v34  ;;  %v10349_v34 = vld [vmem:[#allocation2 + $0x48] ss:$260 sps:$4 sm:$0xff]  }
  0xa1   :  { %9039 = vmatpush3.bf16.msra.mxu1 %v10275_v35  ;;  %9000 = vmatprep.subr.bf16.mxu0 %v10282_v40  ;;  %v10351_v35 = vld [vmem:[#allocation2 + $0x4c] ss:$260 sps:$4 sm:$0xff]  }
  0xa2   :  { %9040 = vmatprep.subr.bf16.mxu1 %v10283_v41  ;;  %v10356_v40 = vld [vmem:[#allocation5 + $0x570] sm:$0xff]  }
  0xa3   :  { %6102 = vmatmul.mubr.bf16.gmra.mxu0 %v10280_v38  ;;  %v10354_v38 = vld [vmem:[#allocation5 + $0x538] sm:$0xff]   ;;  %v10357_v41 = vld [vmem:[#allocation5 + $0x5f0] sm:$0xff]  }
  0xa4   :  { %6167 = vmatmul.mubr.bf16.gmra.mxu1 %v10281_v39  ;;  %9001 = vmatpush3.bf16.msra.mxu0 %v10284_v42  ;;  %v10355_v39 = vld [vmem:[#allocation5 + $0x5b8] sm:$0xff]   ;;  %v10358_v42 = vld [vmem:[#allocation5 + $0x530] sm:$0xff]  }
  0xa5   :  { %9041 = vmatpush3.bf16.msra.mxu1 %v10285_v43  ;;  %9002 = vmatprep.subr.bf16.mxu0 %v10286_v44  ;;  %v10359_v43 = vld [vmem:[#allocation5 + $0x5b0] sm:$0xff]  }
  0xa6   :  { %9042 = vmatprep.subr.bf16.mxu1 %v10287_v45  ;;  %6207 = vmatprep.mubr.bf16.mxu0 %v10292_v49  ;;  %v10360_v44 = vld [vmem:[#allocation2 + $0x24c] ss:$260 sps:$4 sm:$0xff]   ;;  %v10362_v45 = vld [vmem:[#allocation2 + $0x254] ss:$260 sps:$4 sm:$0xff]  }
  0xa7   :  { %6272 = vmatprep.mubr.bf16.mxu1 %v10295_v51  ;;  %v10367_v49 = vld [vmem:[#allocation5 + $0x5e8] sm:$0xff]  }
  0xa8   :  { %9003 = vmatpush3.bf16.msra.mxu0 %v10288_v46  ;;  %v10364_v46 = vld [vmem:[#allocation2 + $0x248] ss:$260 sps:$4 sm:$0xff]  }
  0xa9   :  { %9043 = vmatpush3.bf16.msra.mxu1 %v10289_v47  ;;  %9068 = vmatprep.subr.bf16.mxu0 %v10296_v52  ;;  %v10365_v47 = vld [vmem:[#allocation2 + $0x250] ss:$260 sps:$4 sm:$0xff]   ;;  %v10369_v51 = vld [vmem:[#allocation5 + $0x5a8] sm:$0xff]   ;;  %v10370_v52 = vld [vmem:[#allocation5 + $0x560] sm:$0xff]  }
  0xaa   :  { %9108 = vmatprep.subr.bf16.mxu1 %v10297_v53  ;;  %v10371_v53 = vld [vmem:[#allocation5 + $0x5e0] sm:$0xff]  }
  0xab   :  { %6208 = vmatmul.mubr.bf16.vlgmr.msra.gmra.mxu0 %v10290_v48  ;;  %v10366_v48 = vld [vmem:[#allocation5 + $0x568] sm:$0xff]  }
  0xac   :  { %6273 = vmatmul.mubr.bf16.vlgmr.msra.gmra.mxu1 %v10293_v50  ;;  %9069 = vmatpush3.bf16.msra.mxu0 %v10298_v54  ;;  %v10368_v50 = vld [vmem:[#allocation5 + $0x528] sm:$0xff]   ;;  %v10372_v54 = vld [vmem:[#allocation5 + $0x520] sm:$0xff]  }
  0xad   :  { %9109 = vmatpush3.bf16.msra.mxu1 %v10299_v55  ;;  %9070 = vmatprep.subr.bf16.mxu0 %v10300_v56  ;;  %v10373_v55 = vld [vmem:[#allocation5 + $0x5a0] sm:$0xff]   ;;  %v10374_v56 = vld [vmem:[#allocation2 + $0x454] ss:$260 sps:$4 sm:$0xff]  }
  0xae   :  { %9110 = vmatprep.subr.bf16.mxu1 %v10301_v57  ;;  %6215 = vmatprep.mubr.bf16.mxu0 %v10304_v60  ;;  %v10376_v57 = vld [vmem:[#allocation2 + $0x45c] ss:$260 sps:$4 sm:$0xff]  }
  0xaf   :  { %6280 = vmatprep.mubr.bf16.mxu1 %v10306_v61  ;;  %v10380_v60 = vld [vmem:[#allocation5 + $0x558] sm:$0xff]  }
  0xb0   :  { %9071 = vmatpush3.bf16.msra.mxu0 %v10302_v58  ;;  %v10378_v58 = vld [vmem:[#allocation2 + $0x450] ss:$260 sps:$4 sm:$0xff]   ;;  %v10381_v61 = vld [vmem:[#allocation5 + $0x5d8] sm:$0xff]  }
  0xb1   :  { %9111 = vmatpush3.bf16.msra.mxu1 %v10303_v59  ;;  %9072 = vmatprep.subr.bf16.mxu0 %v10310_v0  ;;  %v10379_v59 = vld [vmem:[#allocation2 + $0x458] ss:$260 sps:$4 sm:$0xff]  }
  0xb2   :  { %9112 = vmatprep.subr.bf16.mxu1 %v10311_v1  ;;  %v10383_v1 = vld [vmem:[#allocation5 + $0x598] sm:$0xff]  }
  0xb3   :  { %6216 = vmatmul.mubr.bf16.gmra.mxu0 %v10308_v62 }
  0xb4   :  { %6281 = vmatmul.mubr.bf16.gmra.mxu1 %v10309_v63  ;;  %9073 = vmatpush3.bf16.msra.mxu0 %v10312_v2  ;;  %v10382_v63 = vld [vmem:[#allocation5 + $0x518] sm:$0xff]  }
  0xb5   :  { %9113 = vmatpush3.bf16.msra.mxu1 %v10313_v3  ;;  %9074 = vmatprep.subr.bf16.mxu0 %v10314_v4  ;;  %v10384_v3 = vld [vmem:[#allocation5 + $0x550] sm:$0xff]  }
  0xb6   :  { %9114 = vmatprep.subr.bf16.mxu1 %v10315_v5  ;;  %6223 = vmatprep.mubr.bf16.mxu0 %v10318_v8 }
  0xb7   :  { %6288 = vmatprep.mubr.bf16.mxu1 %v10320_v9  ;;  %v10386_v9 = vld [vmem:[#allocation5 + $0x510] sm:$0xff]  }
  0xb8   :  { %9075 = vmatpush3.bf16.msra.mxu0 %v10316_v6  ;;  %v10385_v6 = vld [vmem:[#allocation5 + $0x5d0] sm:$0xff]  }
  0xb9   :  { %9115 = vmatpush3.bf16.msra.mxu1 %v10317_v7  ;;  %9076 = vmatprep.subr.bf16.mxu0 %v10324_v12 }
  0xba   :  { %9116 = vmatprep.subr.bf16.mxu1 %v10325_v13 }
  0xbb   :  { %6224 = vmatmul.mubr.bf16.gmra.mxu0 %v10322_v10 }
  0xbc   :  { %6289 = vmatmul.mubr.bf16.gmra.mxu1 %v10323_v11  ;;  %9077 = vmatpush3.bf16.msra.mxu0 %v10326_v14  ;;  %v10387_v11 = vld [vmem:[#allocation5 + $0x590] sm:$0xff]   ;;  %v10388_v14 = vld [vmem:[#allocation2 + $0x65c] ss:$260 sps:$4 sm:$0xff]  }
  0xbd   :  { %9117 = vmatpush3.bf16.msra.mxu1 %v10327_v15  ;;  %9078 = vmatprep.subr.bf16.mxu0 %v10328_v16 }
  0xbe   :  { %9118 = vmatprep.subr.bf16.mxu1 %v10329_v17  ;;  %6231 = vmatprep.mubr.bf16.mxu0 %v10332_v20  ;;  %v10390_v17 = vld [vmem:[#allocation2 + $0x664] ss:$260 sps:$4 sm:$0xff]  }
  0xbf   :  { %6296 = vmatprep.mubr.bf16.mxu1 %v10334_v21  ;;  %v10393_v20 = vld [vmem:[#allocation2 + $0x660] ss:$260 sps:$4 sm:$0xff]   ;;  %v10394_v21 = vld [vmem:[#allocation5 + $0x548] sm:$0xff]  }
  0xc0   :  { %9079 = vmatpush3.bf16.msra.mxu0 %v10330_v18  ;;  %v10392_v18 = vld [vmem:[#allocation2 + $0x658] ss:$260 sps:$4 sm:$0xff]  }
  0xc1   :  { %9119 = vmatpush3.bf16.msra.mxu1 %v10331_v19  ;;  %9080 = vmatprep.subr.bf16.mxu0 %v10338_v24  ;;  %v10395_v24 = vld [vmem:[#allocation5 + $0x5c8] sm:$0xff]  }
  0xc2   :  { %9120 = vmatprep.subr.bf16.mxu1 %v10339_v25 }
  0xc3   :  { %6232 = vmatmul.mubr.bf16.gmra.mxu0 %v10336_v22 }
  0xc4   :  { %6297 = vmatmul.mubr.bf16.gmra.mxu1 %v10337_v23  ;;  %9081 = vmatpush3.bf16.msra.mxu0 %v10340_v26  ;;  %v10396_v26 = vld [vmem:[#allocation5 + $0x508] sm:$0xff]  }
  0xc5   :  { %9121 = vmatpush3.bf16.msra.mxu1 %v10341_v27  ;;  %9082 = vmatprep.subr.bf16.mxu0 %v10342_v28  ;;  %v10397_v28 = vld [vmem:[#allocation5 + $0x588] sm:$0xff]  }
  0xc6   :  { %9122 = vmatprep.subr.bf16.mxu1 %v10343_v29  ;;  %6337 = vmatprep.mubr.bf16.mxu0 %v10348_v33 }
  0xc7   :  { %6402 = vmatprep.mubr.bf16.mxu1 %v10351_v35 }
  0xc8   :  { %9083 = vmatpush3.bf16.msra.mxu0 %v10344_v30 }
  0xc9   :  { %9123 = vmatpush3.bf16.msra.mxu1 %v10345_v31  ;;  %9148 = vmatprep.subr.bf16.mxu0 %v10352_v36  ;;  %v10398_v31 = vld [vmem:[#allocation5 + $0x540] sm:$0xff]  }
  0xca   :  { %9188 = vmatprep.subr.bf16.mxu1 %v10353_v37  ;;  %v10400_v36 = vld [vmem:[#allocation5 + $0x500] sm:$0xff]  }
  0xcb   :  { %6338 = vmatmul.mubr.bf16.vlgmr.msra.gmra.mxu0 %v10346_v32 }
  0xcc   :  { %6403 = vmatmul.mubr.bf16.vlgmr.msra.gmra.mxu1 %v10349_v34  ;;  %9149 = vmatpush3.bf16.msra.mxu0 %v10354_v38  ;;  %v10399_v34 = vld [vmem:[#allocation5 + $0x5c0] sm:$0xff]  }
  0xcd   :  { %9189 = vmatpush3.bf16.msra.mxu1 %v10355_v39  ;;  %9150 = vmatprep.subr.bf16.mxu0 %v10356_v40  ;;  %v10401_v39 = vld [vmem:[#allocation5 + $0x580] sm:$0xff]  }
  0xce   :  { %9190 = vmatprep.subr.bf16.mxu1 %v10357_v41  ;;  %6345 = vmatprep.mubr.bf16.mxu0 %v10360_v44 }
  0xcf   :  { %6410 = vmatprep.mubr.bf16.mxu1 %v10362_v45  ;;  %v10405_v45 = vld [vmem:[#allocation2 + $0x58] ss:$260 sps:$4 sm:$0xff]  }
  0xd0   :  { %9151 = vmatpush3.bf16.msra.mxu0 %v10358_v42  ;;  %v10402_v42 = vld [vmem:[#allocation2 + $0x50] ss:$260 sps:$4 sm:$0xff]  }
  0xd1   :  { %9191 = vmatpush3.bf16.msra.mxu1 %v10359_v43  ;;  %9152 = vmatprep.subr.bf16.mxu0 %v10366_v48  ;;  %v10404_v43 = vld [vmem:[#allocation2 + $0x54] ss:$260 sps:$4 sm:$0xff]  }
  0xd2   :  { %9192 = vmatprep.subr.bf16.mxu1 %v10367_v49  ;;  %v10409_v49 = vld [vmem:[#allocation5 + $0x6f8] sm:$0xff]  }
  0xd3   :  { %6346 = vmatmul.mubr.bf16.gmra.mxu0 %v10364_v46  ;;  %v10407_v46 = vld [vmem:[#allocation2 + $0x5c] ss:$260 sps:$4 sm:$0xff]  }
  0xd4   :  { %6411 = vmatmul.mubr.bf16.gmra.mxu1 %v10365_v47  ;;  %9153 = vmatpush3.bf16.msra.mxu0 %v10368_v50  ;;  %v10408_v47 = vld [vmem:[#allocation5 + $0x678] sm:$0xff]  }
  0xd5   :  { %9193 = vmatpush3.bf16.msra.mxu1 %v10369_v51  ;;  %9154 = vmatprep.subr.bf16.mxu0 %v10370_v52  ;;  %v10410_v51 = vld [vmem:[#allocation5 + $0x638] sm:$0xff]  }
  0xd6   :  { %9194 = vmatprep.subr.bf16.mxu1 %v10371_v53  ;;  %6353 = vmatprep.mubr.bf16.mxu0 %v10374_v56  ;;  %v10411_v53 = vld [vmem:[#allocation5 + $0x6b8] sm:$0xff]  }
  0xd7   :  { %6418 = vmatprep.mubr.bf16.mxu1 %v10376_v57 }
  0xd8   :  { %9155 = vmatpush3.bf16.msra.mxu0 %v10372_v54 }
  0xd9   :  { %9195 = vmatpush3.bf16.msra.mxu1 %v10373_v55  ;;  %9156 = vmatprep.subr.bf16.mxu0 %v10380_v60  ;;  %v10412_v55 = vld [vmem:[#allocation5 + $0x670] sm:$0xff]  }
  0xda   :  { %9196 = vmatprep.subr.bf16.mxu1 %v10381_v61  ;;  %v10414_v61 = vld [vmem:[#allocation5 + $0x630] sm:$0xff]  }
  0xdb   :  { %6354 = vmatmul.mubr.bf16.gmra.mxu0 %v10378_v58  ;;  %v10413_v58 = vld [vmem:[#allocation5 + $0x6f0] sm:$0xff]  }
  0xdc   :  { %6419 = vmatmul.mubr.bf16.gmra.mxu1 %v10379_v59  ;;  %9157 = vmatpush3.bf16.msra.mxu0 %v10382_v63  ;;  %v10415_v63 = vld [vmem:[#allocation5 + $0x6b0] sm:$0xff]  }
  0xdd   :  { %9197 = vmatpush3.bf16.msra.mxu1 %v10383_v1  ;;  %9158 = vmatprep.subr.bf16.mxu0 %v10384_v3 }
  0xde   :  { %9198 = vmatprep.subr.bf16.mxu1 %v10385_v6  ;;  %6361 = vmatprep.mubr.bf16.mxu0 %v10388_v14 }
  0xdf   :  { %6426 = vmatprep.mubr.bf16.mxu1 %v10390_v17 }
  0xe0   :  { %9159 = vmatpush3.bf16.msra.mxu0 %v10386_v9  ;;  %v10422_v9 = vld [vmem:[#allocation5 + $0x668] sm:$0xff]  }
  0xe1   :  { %9199 = vmatpush3.bf16.msra.mxu1 %v10387_v11  ;;  %9160 = vmatprep.subr.bf16.mxu0 %v10394_v21  ;;  %v10423_v11 = vld [vmem:[#allocation5 + $0x6e8] sm:$0xff]  }
  0xe2   :  { %9200 = vmatprep.subr.bf16.mxu1 %v10395_v24 }
  0xe3   :  { %6362 = vmatmul.mubr.bf16.gmra.mxu0 %v10392_v18 }
  0xe4   :  { %6427 = vmatmul.mubr.bf16.gmra.mxu1 %v10393_v20  ;;  %9161 = vmatpush3.bf16.msra.mxu0 %v10396_v26  ;;  %v10428_v26 = vld [vmem:[#allocation5 + $0x620] sm:$0xff]  }
  0xe5   :  { %9201 = vmatpush3.bf16.msra.mxu1 %v10397_v28  ;;  %9162 = vmatprep.subr.bf16.mxu0 %v10398_v31  ;;  %v10429_v28 = vld [vmem:[#allocation5 + $0x6a0] sm:$0xff]  }
  0xe6   :  { %9202 = vmatprep.subr.bf16.mxu1 %v10399_v34  ;;  %6467 = vmatprep.mubr.bf16.mxu0 %v10404_v43  ;;  %v10430_v31 = vld [vmem:[#allocation2 + $0x464] ss:$260 sps:$4 sm:$0xff]   ;;  %v10432_v34 = vld [vmem:[#allocation2 + $0x46c] ss:$260 sps:$4 sm:$0xff]  }
  0xe7   :  { %6532 = vmatprep.mubr.bf16.mxu1 %v10407_v46 }
  0xe8   :  { %9163 = vmatpush3.bf16.msra.mxu0 %v10400_v36  ;;  %v10435_v36 = vld [vmem:[#allocation2 + $0x468] ss:$260 sps:$4 sm:$0xff]  }
  0xe9   :  { %9203 = vmatpush3.bf16.msra.mxu1 %v10401_v39  ;;  %9228 = vmatprep.subr.bf16.mxu0 %v10408_v47  ;;  %v10436_v39 = vld [vmem:[#allocation5 + $0x658] sm:$0xff]   ;;  %v10440_v47 = vld [vmem:[#allocation5 + $0x650] sm:$0xff]  }
  0xea   :  { %9268 = vmatprep.subr.bf16.mxu1 %v10409_v49 }
  0xeb   :  { %6468 = vmatmul.mubr.bf16.vlgmr.msra.gmra.mxu0 %v10402_v42  ;;  %v10438_v42 = vld [vmem:[#allocation5 + $0x618] sm:$0xff]  }
  0xec   :  { %6533 = vmatmul.mubr.bf16.vlgmr.msra.gmra.mxu1 %v10405_v45  ;;  %9229 = vmatpush3.bf16.msra.mxu0 %v10410_v51  ;;  %v10439_v45 = vld [vmem:[#allocation5 + $0x698] sm:$0xff]   ;;  %v10441_v51 = vld [vmem:[#allocation5 + $0x6d0] sm:$0xff]  }
  0xed   :  { %9269 = vmatpush3.bf16.msra.mxu1 %v10411_v53  ;;  %9230 = vmatprep.subr.bf16.mxu0 %v10412_v55 }
  0xee   :  { %9270 = vmatprep.subr.bf16.mxu1 %v10413_v58 }
  0xf0   :  { %9231 = vmatpush3.bf16.msra.mxu0 %v10414_v61 }
  0xf1   :  { %9271 = vmatpush3.bf16.msra.mxu1 %v10415_v63  ;;  %9232 = vmatprep.subr.bf16.mxu0 %v10422_v9  ;;  %v10448_v63 = vld [vmem:[#allocation2 + $0x668] ss:$260 sps:$4 sm:$0xff]  }
  0xf2   :  { %9272 = vmatprep.subr.bf16.mxu1 %v10423_v11  ;;  %v10453_v9 = vld [vmem:[#allocation5 + $0x688] sm:$0xff]  }
 0x10b   :  { %v8764_v62 = vpop.f32.mrf.mxu0 }
 0x10c   :  { %v8804_v0 = vpop.f32.mrf.mxu1 }
 0x10d   :  { %v8765_v2 = vpop.f32.mrf.mxu0 }
 0x10e   :  { %v8766_v4 = vadd.f32 %v8765_v2, %v8764_v62  ;;  %v8805_v5 = vpop.f32.mrf.mxu1  ;;  %v10416_v2 = vld [vmem:[#allocation2 + $0x25c] ss:$260 sps:$4 sm:$0xff]  }
 0x10f   :  { %v8806_v7 = vadd.f32 %v8805_v5, %v8804_v0  ;;  %v8767_v8 = vpop.f32.mrf.mxu0  ;;  %v10418_v5 = vld [vmem:[#allocation2 + $0x264] ss:$260 sps:$4 sm:$0xff]   ;;  %6475 = vmatprep.mubr.bf16.mxu0 %v10416_v2 }
 0x110   :  { %v8807_v10 = vpop.f32.mrf.mxu1  ;;  %6540 = vmatprep.mubr.bf16.mxu1 %v10418_v5 }
 0x111   :  { %v11126_v12 = vadd.f32 %v8806_v7, %v8766_v4  ;;  %v8768_v13 = vpop.f32.mrf.mxu0  ;;  %v10420_v7 = vld [vmem:[#allocation2 + $0x258] ss:$260 sps:$4 sm:$0xff]  }
 0x112   :  { %v8769_v15 = vadd.f32 %v8768_v13, %v8767_v8  ;;  %v8808_v16 = vpop.f32.mrf.mxu1  ;;  %v10421_v8 = vld [vmem:[#allocation2 + $0x260] ss:$260 sps:$4 sm:$0xff]   ;;  %6476 = vmatmul.mubr.bf16.gmra.mxu0 %v10420_v7  ;;  %v10452_v7 = vld [vmem:[#allocation5 + $0x608] sm:$0xff]  }
 0x113   :  { %v8809_v19 = vadd.f32 %v8808_v16, %v8807_v10  ;;  %v8770_v23 = vpop.f32.mrf.mxu0  ;;  %6541 = vmatmul.mubr.bf16.gmra.mxu1 %v10421_v8  ;;  %v10425_v16 = vld [vmem:[#allocation5 + $0x6a8] sm:$0xff]   ;;  %6483 = vmatprep.mubr.bf16.mxu0 %v10430_v31 }
 0x114   :  { %v8810_v25 = vpop.f32.mrf.mxu1  ;;  %9273 = vmatpush3.bf16.msra.mxu1 %v10425_v16  ;;  %6548 = vmatprep.mubr.bf16.mxu1 %v10432_v34  ;;  %v10463_v31 = vld [vmem:[#allocation2 + $0x6c] ss:$260 sps:$4 sm:$0xff]   ;;  %v10464_v34 = vld [vmem:[#allocation5 + $0x778] sm:$0xff]  }
 0x115   :  { %v11128_v22 = vadd.f32 %v8809_v19, %v8769_v15  ;;  %v8771_v27 = vpop.f32.mrf.mxu0  ;;  %v10424_v15 = vld [vmem:[#allocation5 + $0x628] sm:$0xff]   ;;  %v10426_v19 = vld [vmem:[#allocation5 + $0x660] sm:$0xff]  }
 0x116   :  { %v8772_v29 = vadd.f32 %v8771_v27, %v8770_v23  ;;  %v8811_v30 = vpop.f32.mrf.mxu1  ;;  %9233 = vmatpush3.bf16.msra.mxu0 %v10424_v15  ;;  %v10427_v23 = vld [vmem:[#allocation5 + $0x6e0] sm:$0xff]  }
 0x117   :  { %v8812_v32 = vadd.f32 %v8811_v30, %v8810_v25  ;;  %v8773_v33 = vpop.f32.mrf.mxu0  ;;  %9234 = vmatprep.subr.bf16.mxu0 %v10426_v19  ;;  %9274 = vmatprep.subr.bf16.mxu1 %v10427_v23  ;;  %v10455_v15 = vld [vmem:[#allocation5 + $0x6c0] sm:$0xff]  }
 0x118   :  { %v8813_v35 = vpop.f32.mrf.mxu1  ;;  %9275 = vmatpush3.bf16.msra.mxu1 %v10429_v28 }
 0x119   :  { %v11130_v37 = vadd.f32 %v8812_v32, %v8772_v29  ;;  %v8774_v38 = vpop.f32.mrf.mxu0 }
 0x11a   :  { %v8775_v40 = vadd.f32 %v8774_v38, %v8773_v33  ;;  %v8814_v41 = vpop.f32.mrf.mxu1  ;;  %9235 = vmatpush3.bf16.msra.mxu0 %v10428_v26 }
 0x11b   :  { %v8815_v44 = vadd.f32 %v8814_v41, %v8813_v35  ;;  %v8776_v50 = vpop.f32.mrf.mxu0  ;;  %v10434_v35 = vld [vmem:[#allocation2 + $0x460] ss:$260 sps:$4 sm:$0xff]   ;;  %6549 = vmatmul.mubr.bf16.gmra.mxu1 %v10435_v36  ;;  %v10437_v41 = vld [vmem:[#allocation5 + $0x6d8] sm:$0xff]   ;;  %9236 = vmatprep.subr.bf16.mxu0 %v10436_v39 }
 0x11c   :  { %v8816_v52 = vpop.f32.mrf.mxu1  ;;  %6484 = vmatmul.mubr.bf16.gmra.mxu0 %v10434_v35  ;;  %9276 = vmatprep.subr.bf16.mxu1 %v10437_v41  ;;  %v10467_v41 = vld [vmem:[#allocation5 + $0x7b8] sm:$0xff]  }
 0x11d   :  { %v11132_v48 = vadd.f32 %v8815_v44, %v8775_v40  ;;  %v8777_v54 = vpop.f32.mrf.mxu0  ;;  %9277 = vmatpush3.bf16.msra.mxu1 %v10439_v45 }
 0x11e   :  { %v8778_v56 = vadd.f32 %v8777_v54, %v8776_v50  ;;  %v8817_v57 = vpop.f32.mrf.mxu1  ;;  %9237 = vmatpush3.bf16.msra.mxu0 %v10438_v42  ;;  %v10442_v54 = vld [vmem:[#allocation5 + $0x610] sm:$0xff]   ;;  %9278 = vmatprep.subr.bf16.mxu1 %v10441_v51 }
 0x11f   :  { %v8818_v59 = vadd.f32 %v8817_v57, %v8816_v52  ;;  %v8779_v60 = vpop.f32.mrf.mxu0  ;;  %9238 = vmatprep.subr.bf16.mxu0 %v10440_v47  ;;  %v10443_v57 = vld [vmem:[#allocation5 + $0x690] sm:$0xff]  }
 0x120   :  { %v8819_v62 = vpop.f32.mrf.mxu1 }
 0x121   :  { %v11134_v0 = vadd.f32 %v8818_v59, %v8778_v56  ;;  %v8780_v1 = vpop.f32.mrf.mxu0  ;;  %9279 = vmatpush3.bf16.msra.mxu1 %v10443_v57 }
 0x122   :  { %v8781_v3 = vadd.f32 %v8780_v1, %v8779_v60  ;;  %v8820_v4 = vpop.f32.mrf.mxu1  ;;  %9239 = vmatpush3.bf16.msra.mxu0 %v10442_v54  ;;  %v10444_v60 = vld [vmem:[#allocation2 + $0x66c] ss:$260 sps:$4 sm:$0xff]  }
 0x123   :  { %v8821_v6 = vadd.f32 %v8820_v4, %v8819_v62  ;;  %v8782_v13 = vpop.f32.mrf.mxu0  ;;  %v10446_v62 = vld [vmem:[#allocation2 + $0x674] ss:$260 sps:$4 sm:$0xff]   ;;  %6491 = vmatprep.mubr.bf16.mxu0 %v10444_v60  ;;  %v10451_v4 = vld [vmem:[#allocation5 + $0x6c8] sm:$0xff]  }
 0x124   :  { %v8822_v14 = vpop.f32.mrf.mxu1  ;;  %v10449_v1 = vld [vmem:[#allocation2 + $0x670] ss:$260 sps:$4 sm:$0xff]   ;;  %6556 = vmatprep.mubr.bf16.mxu1 %v10446_v62  ;;  %6492 = vmatmul.mubr.bf16.gmra.mxu0 %v10448_v63  ;;  %v10476_v60 = vld [vmem:[#allocation2 + $0x268] ss:$260 sps:$4 sm:$0xff]  }
 0x125   :  { %v11136_v10 = vadd.f32 %v8821_v6, %v8781_v3  ;;  %v8783_v17 = vpop.f32.mrf.mxu0  ;;  %v10450_v3 = vld [vmem:[#allocation5 + $0x648] sm:$0xff]   ;;  %6557 = vmatmul.mubr.bf16.gmra.mxu1 %v10449_v1  ;;  %9280 = vmatprep.subr.bf16.mxu1 %v10451_v4 }
 0x126   :  { %v8823_v18 = vpop.f32.mrf.mxu1  ;;  %v8784_v20 = vadd.f32 %v8783_v17, %v8782_v13  ;;  %9240 = vmatprep.subr.bf16.mxu0 %v10450_v3  ;;  %v10454_v13 = vld [vmem:[#allocation5 + $0x640] sm:$0xff]   ;;  %9281 = vmatpush3.bf16.msra.mxu1 %v10453_v9  ;;  %v10480_v4 = vld [vmem:[#allocation5 + $0x728] sm:$0xff]  }
 0x127   :  { %v8824_v21 = vadd.f32 %v8823_v18, %v8822_v14  ;;  %v8785_v24 = vpop.f32.mrf.mxu0  ;;  %9241 = vmatpush3.bf16.msra.mxu0 %v10452_v7  ;;  %v10456_v18 = vld [vmem:[#allocation5 + $0x600] sm:$0xff]   ;;  %9282 = vmatprep.subr.bf16.mxu1 %v10455_v15  ;;  %v10481_v7 = vld [vmem:[#allocation5 + $0x7a8] sm:$0xff]  }
 0x128   :  { %v8825_v25 = vpop.f32.mrf.mxu1  ;;  %9242 = vmatprep.subr.bf16.mxu0 %v10454_v13  ;;  %6662 = vmatprep.mubr.bf16.mxu1 %v10463_v31  ;;  %v10493_v31 = vld [vmem:[#allocation5 + $0x7d8] sm:$0xff]  }
 0x129   :  { %v11138_v27 = vadd.f32 %v8824_v21, %v8784_v20  ;;  %v8786_v29 = vpop.f32.mrf.mxu0  ;;  %v10457_v21 = vld [vmem:[#allocation5 + $0x680] sm:$0xff]  }
 0x12a   :  { %v8826_v30 = vpop.f32.mrf.mxu1  ;;  %v8787_v32 = vadd.f32 %v8786_v29, %v8785_v24  ;;  %v10458_v24 = vld [vmem:[#allocation2 + $0x60] ss:$260 sps:$4 sm:$0xff]   ;;  %9283 = vmatpush3.bf16.msra.mxu1 %v10457_v21 }
 0x12b   :  { %v8827_v33 = vadd.f32 %v8826_v30, %v8825_v25  ;;  %v8844_v40 = vpop.f32.mrf.mxu0  ;;  %9243 = vmatpush3.bf16.msra.mxu0 %v10456_v18  ;;  %v10460_v29 = vld [vmem:[#allocation2 + $0x64] ss:$260 sps:$4 sm:$0xff]  }
 0x12c   :  { %v8884_v43 = vpop.f32.mrf.mxu1  ;;  %v10461_v30 = vld [vmem:[#allocation2 + $0x68] ss:$260 sps:$4 sm:$0xff]   ;;  %6597 = vmatprep.mubr.bf16.mxu0 %v10460_v29  ;;  %9308 = vmatprep.subr.bf16.mxu0 %v10464_v34  ;;  %v10485_v18 = vld [vmem:[#allocation5 + $0x7a0] sm:$0xff]   ;;  %v10494_v34 = vld [vmem:[#allocation5 + $0x718] sm:$0xff]  }
 0x12d   :  { %v11140_v38 = vadd.f32 %v8827_v33, %v8787_v32  ;;  %v8845_v44 = vpop.f32.mrf.mxu0  ;;  %6663 = vmatmul.mubr.bf16.vlgmr.msra.gmra.mxu1 %v10461_v30 }
 0x12e   :  { %v8846_v46 = vadd.f32 %v8845_v44, %v8844_v40  ;;  %v8885_v49 = vpop.f32.mrf.mxu1  ;;  %6598 = vmatmul.mubr.bf16.vlgmr.msra.gmra.mxu0 %v10458_v24  ;;  %v10466_v40 = vld [vmem:[#allocation5 + $0x738] sm:$0xff]   ;;  %v10468_v44 = vld [vmem:[#allocation5 + $0x770] sm:$0xff]  }
 0x12f   :  { %v8847_v50 = vpop.f32.mrf.mxu0  ;;  %v8886_v53 = vadd.f32 %v8885_v49, %v8884_v43  ;;  %9309 = vmatpush3.bf16.msra.mxu0 %v10466_v40  ;;  %v10488_v24 = vld [vmem:[#allocation2 + $0x47c] ss:$260 sps:$4 sm:$0xff]   ;;  %v10496_v40 = vld [vmem:[#allocation5 + $0x750] sm:$0xff]  }
 0x130   :  { %v5950_v52 = vadd.f32 %v8846_v46, %v11126_v12  ;;  %v8887_v55 = vpop.f32.mrf.mxu1  ;;  %v10469_v46 = vld [vmem:[#allocation5 + $0x7f0] sm:$0xff]   ;;  %9310 = vmatprep.subr.bf16.mxu0 %v10468_v44 }
 0x131   :  { %v8848_v56 = vpop.f32.mrf.mxu0 }
 0x132   :  { %v11143_v58 = vadd.f32 %v8886_v53, %v5950_v52  ;;  %v8849_v59 = vadd.f32 %v8848_v56, %v8847_v50  ;;  %v8888_v61 = vpop.f32.mrf.mxu1  ;;  %v10470_v50 = vld [vmem:[#allocation5 + $0x730] sm:$0xff]  }
 0x133   :  { %v8889_v12 = vadd.f32 %v8888_v61, %v8887_v55  ;;  %v8850_v6 = vpop.f32.mrf.mxu0  ;;  %v10471_v52 = vld [vmem:[#allocation5 + $0x7b0] sm:$0xff]   ;;  %9311 = vmatpush3.bf16.msra.mxu0 %v10470_v50  ;;  %v10500_v50 = vld [vmem:[#allocation2 + $0x67c] ss:$260 sps:$4 sm:$0xff]  }
 0x134   :  { %v5953_v2 = vadd.f32 %v8849_v59, %v11128_v22  ;;  %v8890_v8 = vpop.f32.mrf.mxu1  ;;  %v10472_v55 = vld [vmem:[#allocation2 + $0x26c] ss:$260 sps:$4 sm:$0xff]   ;;  %v10474_v59 = vld [vmem:[#allocation2 + $0x274] ss:$260 sps:$4 sm:$0xff]  }
 0x135   :  { %v8851_v11 = vpop.f32.mrf.mxu0  ;;  %6605 = vmatprep.mubr.bf16.mxu0 %v10472_v55  ;;  %v10477_v61 = vld [vmem:[#allocation2 + $0x270] ss:$260 sps:$4 sm:$0xff]   ;;  %6670 = vmatprep.mubr.bf16.mxu1 %v10474_v59  ;;  %v10504_v55 = vld [vmem:[#allocation2 + $0x678] ss:$260 sps:$4 sm:$0xff]  }
 0x136   :  { %v11146_v5 = vadd.f32 %v8889_v12, %v5953_v2  ;;  %v8852_v14 = vadd.f32 %v8851_v11, %v8850_v6  ;;  %v8891_v22 = vpop.f32.mrf.mxu1  ;;  %6606 = vmatmul.mubr.bf16.gmra.mxu0 %v10476_v60  ;;  %6671 = vmatmul.mubr.bf16.gmra.mxu1 %v10477_v61  ;;  %v10479_v2 = vld [vmem:[#allocation5 + $0x7e8] sm:$0xff]   ;;  %v10482_v11 = vld [vmem:[#allocation5 + $0x760] sm:$0xff]  }
 0x137   :  { %v8892_v16 = vadd.f32 %v8891_v22, %v8890_v8  ;;  %v8853_v17 = vpop.f32.mrf.mxu0  ;;  %6678 = vmatprep.mubr.bf16.mxu1 %v10488_v24  ;;  %v10507_v61 = vld [vmem:[#allocation5 + $0x7c8] sm:$0xff]  }
 0x138   :  { %v5958_v19 = vadd.f32 %v8852_v14, %v11130_v37  ;;  %v8893_v20 = vpop.f32.mrf.mxu1  ;;  %v10465_v37 = vld [vmem:[#allocation5 + $0x7f8] sm:$0xff]   ;;  %v10483_v14 = vld [vmem:[#allocation5 + $0x7e0] sm:$0xff]  }
 0x139   :  { %v8854_v23 = vpop.f32.mrf.mxu0  ;;  %9348 = vmatprep.subr.bf16.mxu1 %v10465_v37 }
 0x13a   :  { %v11149_v25 = vadd.f32 %v8892_v16, %v5958_v19  ;;  %v8855_v26 = vadd.f32 %v8854_v23, %v8853_v17  ;;  %v8894_v28 = vpop.f32.mrf.mxu1  ;;  %9349 = vmatpush3.bf16.msra.mxu1 %v10467_v41  ;;  %v10484_v16 = vld [vmem:[#allocation5 + $0x720] sm:$0xff]   ;;  %v10486_v23 = vld [vmem:[#allocation2 + $0x474] ss:$260 sps:$4 sm:$0xff]  }
 0x13b   :  { %v8895_v33 = vadd.f32 %v8894_v28, %v8893_v20  ;;  %v8856_v36 = vpop.f32.mrf.mxu0  ;;  %9350 = vmatprep.subr.bf16.mxu1 %v10469_v46  ;;  %v10491_v28 = vld [vmem:[#allocation2 + $0x478] ss:$260 sps:$4 sm:$0xff]   ;;  %6613 = vmatprep.mubr.bf16.mxu0 %v10486_v23 }
 0x13c   :  { %v5961_v32 = vadd.f32 %v8855_v26, %v11132_v48  ;;  %v8896_v39 = vpop.f32.mrf.mxu1  ;;  %v10490_v26 = vld [vmem:[#allocation2 + $0x470] ss:$260 sps:$4 sm:$0xff]   ;;  %v10519_v23 = vld [vmem:[#allocation2 + $0x7c] ss:$260 sps:$4 sm:$0xff]  }
 0x13d   :  { %v8857_v42 = vpop.f32.mrf.mxu0 }
 0x13e   :  { %v11152_v35 = vadd.f32 %v8895_v33, %v5961_v32  ;;  %v8897_v43 = vpop.f32.mrf.mxu1  ;;  %v8858_v48 = vadd.f32 %v8857_v42, %v8856_v36  ;;  %9351 = vmatpush3.bf16.msra.mxu1 %v10471_v52  ;;  %6614 = vmatmul.mubr.bf16.gmra.mxu0 %v10490_v26  ;;  %v10495_v36 = vld [vmem:[#allocation5 + $0x798] sm:$0xff]   ;;  %v10497_v42 = vld [vmem:[#allocation5 + $0x7d0] sm:$0xff]  }
 0x13f   :  { %v8898_v45 = vadd.f32 %v8897_v43, %v8896_v39  ;;  %v8859_v47 = vpop.f32.mrf.mxu0  ;;  %9352 = vmatprep.subr.bf16.mxu1 %v10479_v2  ;;  %6679 = vmatmul.mubr.bf16.gmra.mxu1 %v10491_v28  ;;  %v10509_v2 = vld [vmem:[#allocation5 + $0x788] sm:$0xff]   ;;  %v10520_v28 = vld [vmem:[#allocation5 + $0x878] sm:$0xff]  }
 0x140   :  { %v8899_v49 = vpop.f32.mrf.mxu1  ;;  %v5966_v51 = vadd.f32 %v8858_v48, %v11134_v0  ;;  %v10478_v0 = vld [vmem:[#allocation5 + $0x768] sm:$0xff]   ;;  %v10498_v48 = vld [vmem:[#allocation5 + $0x710] sm:$0xff]   ;;  %6621 = vmatprep.mubr.bf16.mxu0 %v10500_v50  ;;  %v10530_v50 = vld [vmem:[#allocation2 + $0x27c] ss:$260 sps:$4 sm:$0xff]  }
 0x141   :  { %v8860_v53 = vpop.f32.mrf.mxu0  ;;  %9312 = vmatprep.subr.bf16.mxu0 %v10478_v0 }
 0x142   :  { %v8900_v54 = vpop.f32.mrf.mxu1  ;;  %v11155_v56 = vadd.f32 %v8898_v45, %v5966_v51  ;;  %v8861_v57 = vadd.f32 %v8860_v53, %v8859_v47  ;;  %9313 = vmatpush3.bf16.msra.mxu0 %v10480_v4  ;;  %9353 = vmatpush3.bf16.msra.mxu1 %v10481_v7  ;;  %v10499_v47 = vld [vmem:[#allocation5 + $0x790] sm:$0xff]  }
 0x143   :  { %v8901_v63 = vadd.f32 %v8900_v54, %v8899_v49  ;;  %v8862_v1 = vpop.f32.mrf.mxu0  ;;  %9314 = vmatprep.subr.bf16.mxu0 %v10482_v11  ;;  %9354 = vmatprep.subr.bf16.mxu1 %v10483_v14  ;;  %v10502_v54 = vld [vmem:[#allocation2 + $0x684] ss:$260 sps:$4 sm:$0xff]  }
 0x144   :  { %v5969_v62 = vadd.f32 %v8861_v57, %v11136_v10  ;;  %v8902_v3 = vpop.f32.mrf.mxu1  ;;  %v10505_v57 = vld [vmem:[#allocation2 + $0x680] ss:$260 sps:$4 sm:$0xff]   ;;  %6686 = vmatprep.mubr.bf16.mxu1 %v10502_v54 }
 0x145   :  { %v8863_v6 = vpop.f32.mrf.mxu0  ;;  %v10513_v14 = vld [vmem:[#allocation5 + $0x780] sm:$0xff]  }
 0x146   :  { %v11158_v12 = vadd.f32 %v8901_v63, %v5969_v62  ;;  %v8864_v8 = vadd.f32 %v8863_v6, %v8862_v1  ;;  %v8903_v9 = vpop.f32.mrf.mxu1  ;;  %9315 = vmatpush3.bf16.msra.mxu0 %v10484_v16  ;;  %9355 = vmatpush3.bf16.msra.mxu1 %v10485_v18  ;;  %v10508_v1 = vld [vmem:[#allocation5 + $0x708] sm:$0xff]   ;;  %v10510_v6 = vld [vmem:[#allocation5 + $0x740] sm:$0xff]   ;;  %v10514_v16 = vld [vmem:[#allocation2 + $0x70] ss:$260 sps:$4 sm:$0xff]  }
 0x147   :  { %v8904_v10 = vadd.f32 %v8903_v9, %v8902_v3  ;;  %v8865_v13 = vpop.f32.mrf.mxu0  ;;  %9356 = vmatprep.subr.bf16.mxu1 %v10493_v31  ;;  %6622 = vmatmul.mubr.bf16.gmra.mxu0 %v10504_v55  ;;  %v10522_v31 = vld [vmem:[#allocation5 + $0x838] sm:$0xff]  }
 0x148   :  { %v5974_v22 = vadd.f32 %v8864_v8, %v11138_v27  ;;  %v8905_v15 = vpop.f32.mrf.mxu1  ;;  %v10492_v27 = vld [vmem:[#allocation5 + $0x758] sm:$0xff]   ;;  %6687 = vmatmul.mubr.bf16.gmra.mxu1 %v10505_v57  ;;  %v10511_v8 = vld [vmem:[#allocation5 + $0x7c0] sm:$0xff]   ;;  %v10535_v57 = vld [vmem:[#allocation5 + $0x8e8] sm:$0xff]  }
 0x149   :  { %v8866_v17 = vpop.f32.mrf.mxu0  ;;  %9316 = vmatprep.subr.bf16.mxu0 %v10492_v27  ;;  %6792 = vmatprep.mubr.bf16.mxu1 %v10519_v23  ;;  %v10548_v23 = vld [vmem:[#allocation5 + $0x858] sm:$0xff]  }
 0x14a   :  { %v11161_v19 = vadd.f32 %v8904_v10, %v5974_v22  ;;  %v8867_v20 = vadd.f32 %v8866_v17, %v8865_v13  ;;  %v8906_v21 = vpop.f32.mrf.mxu1  ;;  %9317 = vmatpush3.bf16.msra.mxu0 %v10494_v34  ;;  %9357 = vmatpush3.bf16.msra.mxu1 %v10495_v36  ;;  %v10512_v10 = vld [vmem:[#allocation5 + $0x700] sm:$0xff]   ;;  %v10516_v17 = vld [vmem:[#allocation2 + $0x74] ss:$260 sps:$4 sm:$0xff]  }
 0x14b   :  { %v8907_v30 = vadd.f32 %v8906_v21, %v8905_v15  ;;  %v8924_v33 = vpop.f32.mrf.mxu0  ;;  %9318 = vmatprep.subr.bf16.mxu0 %v10496_v40  ;;  %9358 = vmatprep.subr.bf16.mxu1 %v10497_v42  ;;  %v10517_v21 = vld [vmem:[#allocation2 + $0x78] ss:$260 sps:$4 sm:$0xff]  }
 0x14c   :  { %v5977_v29 = vadd.f32 %v8867_v20, %v11140_v38  ;;  %v8964_v37 = vpop.f32.mrf.mxu1  ;;  %6727 = vmatprep.mubr.bf16.mxu0 %v10516_v17  ;;  %v10523_v34 = vld [vmem:[#allocation5 + $0x8b8] sm:$0xff]   ;;  %v10547_v17 = vld [vmem:[#allocation2 + $0x48c] ss:$260 sps:$4 sm:$0xff]  }
 0x14d   :  { %v8925_v39 = vpop.f32.mrf.mxu0 }
 0x14e   :  { %v11164_v32 = vadd.f32 %v8907_v30, %v5977_v29  ;;  %v8926_v41 = vadd.f32 %v8925_v39, %v8924_v33  ;;  %v8965_v38 = vpop.f32.mrf.mxu1  ;;  %9319 = vmatpush3.bf16.msra.mxu0 %v10498_v48  ;;  %9359 = vmatpush3.bf16.msra.mxu1 %v10499_v47  ;;  %v10521_v29 = vld [vmem:[#allocation5 + $0x8f8] sm:$0xff]   ;;  %v10524_v39 = vld [vmem:[#allocation5 + $0x870] sm:$0xff]  }
 0x14f   :  { %v8966_v43 = vadd.f32 %v8965_v38, %v8964_v37  ;;  %v8927_v44 = vpop.f32.mrf.mxu0  ;;  %9360 = vmatprep.subr.bf16.mxu1 %v10507_v61  ;;  %v10527_v48 = vld [vmem:[#allocation5 + $0x8b0] sm:$0xff]  }
 0x150   :  { %v6080_v45 = vadd.f32 %v8926_v41, %v11143_v58  ;;  %v8967_v46 = vpop.f32.mrf.mxu1  ;;  %v10506_v58 = vld [vmem:[#allocation5 + $0x748] sm:$0xff]   ;;  %v10525_v41 = vld [vmem:[#allocation5 + $0x8f0] sm:$0xff]  }
 0x151   :  { %v8928_v49 = vpop.f32.mrf.mxu0  ;;  %9320 = vmatprep.subr.bf16.mxu0 %v10506_v58  ;;  %v10536_v58 = vld [vmem:[#allocation5 + $0x828] sm:$0xff]  }
 0x152   :  { %v11167_v51 = vadd.f32 %v8966_v43, %v6080_v45  ;;  %v8929_v52 = vadd.f32 %v8928_v49, %v8927_v44  ;;  %v8968_v53 = vpop.f32.mrf.mxu1  ;;  %9321 = vmatpush3.bf16.msra.mxu0 %v10508_v1  ;;  %9361 = vmatpush3.bf16.msra.mxu1 %v10509_v2  ;;  %v10526_v43 = vld [vmem:[#allocation5 + $0x830] sm:$0xff]   ;;  %v10528_v49 = vld [vmem:[#allocation2 + $0x278] ss:$260 sps:$4 sm:$0xff]   ;;  %v10538_v1 = vld [vmem:[#allocation5 + $0x860] sm:$0xff]  }
 0x153   :  { %v8969_v60 = vadd.f32 %v8968_v53, %v8967_v46  ;;  %v8930_v63 = vpop.f32.mrf.mxu0  ;;  %9322 = vmatprep.subr.bf16.mxu0 %v10510_v6  ;;  %9362 = vmatprep.subr.bf16.mxu1 %v10511_v8  ;;  %v10533_v53 = vld [vmem:[#allocation2 + $0x284] ss:$260 sps:$4 sm:$0xff]  }
 0x154   :  { %v6083_v59 = vadd.f32 %v8929_v52, %v11146_v5  ;;  %v8970_v0 = vpop.f32.mrf.mxu1  ;;  %v10531_v52 = vld [vmem:[#allocation2 + $0x280] ss:$260 sps:$4 sm:$0xff]  }
 0x155   :  { %v8931_v3 = vpop.f32.mrf.mxu0 }
 0x156   :  { %v11170_v62 = vadd.f32 %v8969_v60, %v6083_v59  ;;  %v8971_v4 = vpop.f32.mrf.mxu1  ;;  %v8932_v7 = vadd.f32 %v8931_v3, %v8930_v63  ;;  %9323 = vmatpush3.bf16.msra.mxu0 %v10512_v10  ;;  %9363 = vmatpush3.bf16.msra.mxu1 %v10513_v14  ;;  %v10537_v63 = vld [vmem:[#allocation5 + $0x8a8] sm:$0xff]   ;;  %v10539_v3 = vld [vmem:[#allocation5 + $0x8e0] sm:$0xff]  }
 0x157   :  { %v8972_v5 = vadd.f32 %v8971_v4, %v8970_v0  ;;  %v8933_v9 = vpop.f32.mrf.mxu0  ;;  %9388 = vmatprep.subr.bf16.mxu0 %v10520_v28  ;;  %9428 = vmatprep.subr.bf16.mxu1 %v10521_v29  ;;  %v10542_v10 = vld [vmem:[#allocation2 + $0x480] ss:$260 sps:$4 sm:$0xff]   ;;  %v10550_v28 = vld [vmem:[#allocation5 + $0x818] sm:$0xff]  }
 0x158   :  { %v8973_v11 = vpop.f32.mrf.mxu1  ;;  %v6088_v13 = vadd.f32 %v8932_v7, %v11149_v25  ;;  %v10540_v7 = vld [vmem:[#allocation5 + $0x820] sm:$0xff]   ;;  %v10551_v29 = vld [vmem:[#allocation5 + $0x898] sm:$0xff]  }
 0x159   :  { %v8934_v22 = vpop.f32.mrf.mxu0  ;;  %6728 = vmatmul.mubr.bf16.vlgmr.msra.gmra.mxu0 %v10514_v16  ;;  %6793 = vmatmul.mubr.bf16.vlgmr.msra.gmra.mxu1 %v10517_v21  ;;  %v10545_v16 = vld [vmem:[#allocation2 + $0x488] ss:$260 sps:$4 sm:$0xff]  }
 0x15a   :  { %v8974_v15 = vpop.f32.mrf.mxu1  ;;  %v11173_v18 = vadd.f32 %v8972_v5, %v6088_v13  ;;  %v8935_v20 = vadd.f32 %v8934_v22, %v8933_v9  ;;  %9389 = vmatpush3.bf16.msra.mxu0 %v10522_v31  ;;  %9429 = vmatpush3.bf16.msra.mxu1 %v10523_v34  ;;  %v10541_v9 = vld [vmem:[#allocation5 + $0x8a0] sm:$0xff]   ;;  %v10552_v31 = vld [vmem:[#allocation5 + $0x850] sm:$0xff]  }
 0x15b   :  { %v8975_v26 = vadd.f32 %v8974_v15, %v8973_v11  ;;  %v8936_v25 = vpop.f32.mrf.mxu0  ;;  %9390 = vmatprep.subr.bf16.mxu0 %v10524_v39  ;;  %9430 = vmatprep.subr.bf16.mxu1 %v10525_v41  ;;  %v10544_v15 = vld [vmem:[#allocation2 + $0x484] ss:$260 sps:$4 sm:$0xff]   ;;  %v10553_v34 = vld [vmem:[#allocation5 + $0x8d0] sm:$0xff]  }
 0x15c   :  { %v6091_v24 = vadd.f32 %v8935_v20, %v11152_v35  ;;  %v8976_v27 = vpop.f32.mrf.mxu1  ;;  %6735 = vmatprep.mubr.bf16.mxu0 %v10530_v50  ;;  %6800 = vmatprep.mubr.bf16.mxu1 %v10533_v53  ;;  %v10554_v39 = vld [vmem:[#allocation5 + $0x810] sm:$0xff]  }
 0x15d   :  { %v8937_v33 = vpop.f32.mrf.mxu0  ;;  %v10555_v41 = vld [vmem:[#allocation5 + $0x890] sm:$0xff]  }
 0x15e   :  { %v11176_v30 = vadd.f32 %v8975_v26, %v6091_v24  ;;  %v8938_v37 = vadd.f32 %v8937_v33, %v8936_v25  ;;  %v8977_v36 = vpop.f32.mrf.mxu1  ;;  %9391 = vmatpush3.bf16.msra.mxu0 %v10526_v43  ;;  %9431 = vmatpush3.bf16.msra.mxu1 %v10527_v48  ;;  %v10558_v43 = vld [vmem:[#allocation2 + $0x68c] ss:$260 sps:$4 sm:$0xff]  }
 0x15f   :  { %v8978_v35 = vadd.f32 %v8977_v36, %v8976_v27  ;;  %v8939_v40 = vpop.f32.mrf.mxu0  ;;  %9432 = vmatprep.subr.bf16.mxu1 %v10535_v57  ;;  %v10564_v57 = vld [vmem:[#allocation5 + $0x808] sm:$0xff]  }
 0x160   :  { %v6096_v38 = vadd.f32 %v8938_v37, %v11155_v56  ;;  %v8979_v42 = vpop.f32.mrf.mxu1  ;;  %v10534_v56 = vld [vmem:[#allocation5 + $0x868] sm:$0xff]  }
 0x161   :  { %v8940_v44 = vpop.f32.mrf.mxu0  ;;  %6736 = vmatmul.mubr.bf16.gmra.mxu0 %v10528_v49  ;;  %6801 = vmatmul.mubr.bf16.gmra.mxu1 %v10531_v52  ;;  %v10561_v49 = vld [vmem:[#allocation2 + $0x694] ss:$260 sps:$4 sm:$0xff]  }
 0x162   :  { %v11179_v45 = vadd.f32 %v8978_v35, %v6096_v38  ;;  %v8941_v46 = vadd.f32 %v8940_v44, %v8939_v40  ;;  %v8980_v47 = vpop.f32.mrf.mxu1  ;;  %9392 = vmatprep.subr.bf16.mxu0 %v10534_v56  ;;  %9433 = vmatpush3.bf16.msra.mxu1 %v10537_v63 }
 0x163   :  { %v8981_v55 = vadd.f32 %v8980_v47, %v8979_v42  ;;  %v8942_v60 = vpop.f32.mrf.mxu0  ;;  %9393 = vmatpush3.bf16.msra.mxu0 %v10536_v58  ;;  %9434 = vmatprep.subr.bf16.mxu1 %v10539_v3  ;;  %v10556_v42 = vld [vmem:[#allocation2 + $0x688] ss:$260 sps:$4 sm:$0xff]   ;;  %v10559_v47 = vld [vmem:[#allocation2 + $0x690] ss:$260 sps:$4 sm:$0xff]  }
 0x164   :  { %v6099_v54 = vadd.f32 %v8941_v46, %v11158_v12  ;;  %v8982_v61 = vpop.f32.mrf.mxu1  ;;  %9394 = vmatprep.subr.bf16.mxu0 %v10538_v1  ;;  %6743 = vmatprep.mubr.bf16.mxu0 %v10544_v15  ;;  %v10565_v58 = vld [vmem:[#allocation5 + $0x888] sm:$0xff]  }
 0x165   :  { %v8943_v0 = vpop.f32.mrf.mxu0  ;;  %6808 = vmatprep.mubr.bf16.mxu1 %v10547_v17  ;;  %v10577_v17 = vld [vmem:[#allocation5 + $0x9f8] sm:$0xff]  }
 0x166   :  { %v11182_v59 = vadd.f32 %v8981_v55, %v6099_v54  ;;  %v8944_v2 = vadd.f32 %v8943_v0, %v8942_v60  ;;  %v8983_v12 = vpop.f32.mrf.mxu1  ;;  %9435 = vmatpush3.bf16.msra.mxu1 %v10541_v9  ;;  %v10563_v54 = vld [vmem:[#allocation5 + $0x8c8] sm:$0xff]   ;;  %v10566_v0 = vld [vmem:[#allocation5 + $0x840] sm:$0xff]  }
 0x167   :  { %v8984_v4 = vadd.f32 %v8983_v12, %v8982_v61  ;;  %v8945_v6 = vpop.f32.mrf.mxu0  ;;  %9395 = vmatpush3.bf16.msra.mxu0 %v10540_v7  ;;  %v10569_v7 = vld [vmem:[#allocation5 + $0x880] sm:$0xff]  }
 0x168   :  { %v6104_v5 = vadd.f32 %v8944_v2, %v11161_v19  ;;  %v8985_v8 = vpop.f32.mrf.mxu1  ;;  %v10549_v19 = vld [vmem:[#allocation5 + $0x8d8] sm:$0xff]   ;;  %9396 = vmatprep.subr.bf16.mxu0 %v10548_v23  ;;  %v10567_v2 = vld [vmem:[#allocation5 + $0x8c0] sm:$0xff]  }
 0x169   :  { %v8946_v11 = vpop.f32.mrf.mxu0  ;;  %6744 = vmatmul.mubr.bf16.gmra.mxu0 %v10542_v10  ;;  %6809 = vmatmul.mubr.bf16.gmra.mxu1 %v10545_v16  ;;  %v10572_v10 = vld [vmem:[#allocation2 + $0x84] ss:$260 sps:$4 sm:$0xff]   ;;  %v10578_v23 = vld [vmem:[#allocation5 + $0x938] sm:$0xff]  }
 0x16a   :  { %v11185_v13 = vadd.f32 %v8984_v4, %v6104_v5  ;;  %v8947_v14 = vadd.f32 %v8946_v11, %v8945_v6  ;;  %v8986_v22 = vpop.f32.mrf.mxu1  ;;  %9436 = vmatprep.subr.bf16.mxu1 %v10549_v19  ;;  %6751 = vmatprep.mubr.bf16.mxu0 %v10558_v43  ;;  %v10568_v4 = vld [vmem:[#allocation5 + $0x800] sm:$0xff]   ;;  %v10587_v43 = vld [vmem:[#allocation2 + $0x290] ss:$260 sps:$4 sm:$0xff]  }
 0x16b   :  { %v8987_v21 = vadd.f32 %v8986_v22, %v8985_v8  ;;  %v9004_v26 = vpop.f32.mrf.mxu0  ;;  %9397 = vmatpush3.bf16.msra.mxu0 %v10550_v28  ;;  %9437 = vmatpush3.bf16.msra.mxu1 %v10551_v29  ;;  %v10570_v11 = vld [vmem:[#allocation2 + $0x80] ss:$260 sps:$4 sm:$0xff]   ;;  %v10575_v22 = vld [vmem:[#allocation2 + $0x8c] ss:$260 sps:$4 sm:$0xff]  }
 0x16c   :  { %v6107_v20 = vadd.f32 %v8947_v14, %v11164_v32  ;;  %v9044_v25 = vpop.f32.mrf.mxu1  ;;  %9398 = vmatprep.subr.bf16.mxu0 %v10552_v31  ;;  %9438 = vmatprep.subr.bf16.mxu1 %v10553_v34  ;;  %v10573_v14 = vld [vmem:[#allocation2 + $0x88] ss:$260 sps:$4 sm:$0xff]  }
 0x16d   :  { %v9005_v27 = vpop.f32.mrf.mxu0  ;;  %6816 = vmatprep.mubr.bf16.mxu1 %v10561_v49  ;;  %v10590_v49 = vld [vmem:[#allocation5 + $0x968] sm:$0xff]  }
 0x16e   :  { %v11188_v24 = vadd.f32 %v8987_v21, %v6107_v20  ;;  %v9006_v33 = vadd.f32 %v9005_v27, %v9004_v26  ;;  %v9045_v32 = vpop.f32.mrf.mxu1  ;;  %v10579_v26 = vld [vmem:[#allocation5 + $0x9b8] sm:$0xff]   ;;  %v10581_v27 = vld [vmem:[#allocation5 + $0x9f0] sm:$0xff]  }
 0x16f   :  { %v9046_v37 = vadd.f32 %v9045_v32, %v9044_v25  ;;  %v9007_v36 = vpop.f32.mrf.mxu0  ;;  %9399 = vmatpush3.bf16.msra.mxu0 %v10554_v39  ;;  %9439 = vmatpush3.bf16.msra.mxu1 %v10555_v41  ;;  %v10580_v25 = vld [vmem:[#allocation5 + $0x970] sm:$0xff]  }
 0x170   :  { %v6210_v35 = vadd.f32 %v9006_v33, %v11167_v51  ;;  %v9047_v40 = vpop.f32.mrf.mxu1  ;;  %v10562_v51 = vld [vmem:[#allocation5 + $0x848] sm:$0xff]   ;;  %9440 = vmatprep.subr.bf16.mxu1 %v10563_v54  ;;  %v10582_v32 = vld [vmem:[#allocation5 + $0x930] sm:$0xff]  }
 0x171   :  { %v9008_v38 = vpop.f32.mrf.mxu0  ;;  %6752 = vmatmul.mubr.bf16.gmra.mxu0 %v10556_v42  ;;  %6817 = vmatmul.mubr.bf16.gmra.mxu1 %v10559_v47  ;;  %v10586_v42 = vld [vmem:[#allocation2 + $0x28c] ss:$260 sps:$4 sm:$0xff]  }
 0x172   :  { %v11191_v44 = vadd.f32 %v9046_v37, %v6210_v35  ;;  %v9009_v48 = vadd.f32 %v9008_v38, %v9007_v36  ;;  %v9048_v46 = vpop.f32.mrf.mxu1  ;;  %9400 = vmatprep.subr.bf16.mxu0 %v10562_v51  ;;  %6857 = vmatprep.mubr.bf16.mxu0 %v10572_v10  ;;  %v10583_v36 = vld [vmem:[#allocation5 + $0x9b0] sm:$0xff]   ;;  %v10584_v35 = vld [vmem:[#allocation2 + $0x288] ss:$260 sps:$4 sm:$0xff]  }
 0x173   :  { %v9049_v52 = vadd.f32 %v9048_v46, %v9047_v40  ;;  %v9010_v53 = vpop.f32.mrf.mxu0  ;;  %9401 = vmatpush3.bf16.msra.mxu0 %v10564_v57  ;;  %9441 = vmatpush3.bf16.msra.mxu1 %v10565_v58  ;;  %v10593_v54 = vld [vmem:[#allocation5 + $0x9a8] sm:$0xff]  }
 0x174   :  { %v6213_v50 = vadd.f32 %v9009_v48, %v11170_v62  ;;  %v9050_v56 = vpop.f32.mrf.mxu1  ;;  %9402 = vmatprep.subr.bf16.mxu0 %v10566_v0  ;;  %9442 = vmatprep.subr.bf16.mxu1 %v10567_v2  ;;  %v10589_v48 = vld [vmem:[#allocation2 + $0x294] ss:$260 sps:$4 sm:$0xff]   ;;  %v10597_v2 = vld [vmem:[#allocation5 + $0x9a0] sm:$0xff]  }
 0x175   :  { %v9011_v60 = vpop.f32.mrf.mxu0  ;;  %6922 = vmatprep.mubr.bf16.mxu1 %v10575_v22  ;;  %v10604_v22 = vld [vmem:[#allocation5 + $0x958] sm:$0xff]  }
 0x176   :  { %v11194_v55 = vadd.f32 %v9049_v52, %v6213_v50  ;;  %v9012_v61 = vadd.f32 %v9011_v60, %v9010_v53  ;;  %v9051_v63 = vpop.f32.mrf.mxu1  ;;  %v10592_v53 = vld [vmem:[#allocation5 + $0x928] sm:$0xff]   ;;  %v10594_v60 = vld [vmem:[#allocation5 + $0x960] sm:$0xff]  }
 0x177   :  { %v9052_v62 = vadd.f32 %v9051_v63, %v9050_v56  ;;  %v9013_v1 = vpop.f32.mrf.mxu0  ;;  %9403 = vmatpush3.bf16.msra.mxu0 %v10568_v4  ;;  %9443 = vmatpush3.bf16.msra.mxu1 %v10569_v7  ;;  %v10598_v4 = vld [vmem:[#allocation2 + $0x490] ss:$260 sps:$4 sm:$0xff]  }
 0x178   :  { %v6218_v12 = vadd.f32 %v9012_v61, %v11173_v18  ;;  %v9053_v3 = vpop.f32.mrf.mxu1  ;;  %v10576_v18 = vld [vmem:[#allocation5 + $0x978] sm:$0xff]   ;;  %9508 = vmatprep.subr.bf16.mxu1 %v10577_v17  ;;  %v10595_v61 = vld [vmem:[#allocation5 + $0x9e0] sm:$0xff]  }
 0x179   :  { %v9014_v6 = vpop.f32.mrf.mxu0  ;;  %9468 = vmatprep.subr.bf16.mxu0 %v10576_v18  ;;  %v10606_v18 = vld [vmem:[#allocation5 + $0x918] sm:$0xff]  }
 0x17a   :  { %v11197_v5 = vadd.f32 %v9052_v62, %v6218_v12  ;;  %v9015_v8 = vadd.f32 %v9014_v6, %v9013_v1  ;;  %v9054_v9 = vpop.f32.mrf.mxu1  ;;  %6858 = vmatmul.mubr.bf16.vlgmr.msra.gmra.mxu0 %v10570_v11  ;;  %6923 = vmatmul.mubr.bf16.vlgmr.msra.gmra.mxu1 %v10573_v14  ;;  %v10596_v62 = vld [vmem:[#allocation5 + $0x920] sm:$0xff]   ;;  %v10600_v6 = vld [vmem:[#allocation2 + $0x494] ss:$260 sps:$4 sm:$0xff]  }
 0x17b   :  { %v9055_v16 = vadd.f32 %v9054_v9, %v9053_v3  ;;  %v9016_v21 = vpop.f32.mrf.mxu0  ;;  %9469 = vmatpush3.bf16.msra.mxu0 %v10578_v23  ;;  %9509 = vmatpush3.bf16.msra.mxu1 %v10579_v26  ;;  %v10601_v9 = vld [vmem:[#allocation2 + $0x498] ss:$260 sps:$4 sm:$0xff]   ;;  %v10608_v26 = vld [vmem:[#allocation5 + $0x950] sm:$0xff]  }
 0x17c   :  { %v6221_v15 = vadd.f32 %v9015_v8, %v11176_v30  ;;  %v9056_v19 = vpop.f32.mrf.mxu1  ;;  %9470 = vmatprep.subr.bf16.mxu0 %v10580_v25  ;;  %9510 = vmatprep.subr.bf16.mxu1 %v10581_v27  ;;  %v10603_v11 = vld [vmem:[#allocation2 + $0x49c] ss:$260 sps:$4 sm:$0xff]   ;;  %v10609_v25 = vld [vmem:[#allocation5 + $0x9d0] sm:$0xff]  }
 0x17d   :  { %v9017_v28 = vpop.f32.mrf.mxu0  ;;  %6865 = vmatprep.mubr.bf16.mxu0 %v10586_v42  ;;  %6930 = vmatprep.mubr.bf16.mxu1 %v10589_v48  ;;  %v10607_v23 = vld [vmem:[#allocation5 + $0x998] sm:$0xff]   ;;  %v10610_v27 = vld [vmem:[#allocation5 + $0x910] sm:$0xff]   ;;  %v10619_v48 = vld [vmem:[#allocation5 + $0x9c8] sm:$0xff]  }
 0x17e   :  { %v11200_v20 = vadd.f32 %v9055_v16, %v6221_v15  ;;  %v9018_v29 = vadd.f32 %v9017_v28, %v9016_v21  ;;  %v9057_v30 = vpop.f32.mrf.mxu1  ;;  %v10605_v15 = vld [vmem:[#allocation5 + $0x9d8] sm:$0xff]  }
 0x17f   :  { %v9058_v31 = vadd.f32 %v9057_v30, %v9056_v19  ;;  %v9019_v33 = vpop.f32.mrf.mxu0  ;;  %9471 = vmatpush3.bf16.msra.mxu0 %v10582_v32  ;;  %9511 = vmatpush3.bf16.msra.mxu1 %v10583_v36  ;;  %v10611_v32 = vld [vmem:[#allocation5 + $0x990] sm:$0xff]   ;;  %v10612_v36 = vld [vmem:[#allocation2 + $0x698] ss:$260 sps:$4 sm:$0xff]  }
 0x180   :  { %v6226_v34 = vadd.f32 %v9018_v29, %v11179_v45  ;;  %v9059_v37 = vpop.f32.mrf.mxu1  ;;  %v10591_v45 = vld [vmem:[#allocation5 + $0x9e8] sm:$0xff]   ;;  %9472 = vmatprep.subr.bf16.mxu0 %v10590_v49 }
 0x181   :  { %v9020_v39 = vpop.f32.mrf.mxu0  ;;  %9512 = vmatprep.subr.bf16.mxu1 %v10591_v45  ;;  %v10620_v49 = vld [vmem:[#allocation5 + $0x908] sm:$0xff]  }
 0x182   :  { %v11203_v40 = vadd.f32 %v9058_v31, %v6226_v34  ;;  %v9021_v41 = vadd.f32 %v9020_v39, %v9019_v33  ;;  %v9060_v38 = vpop.f32.mrf.mxu1  ;;  %6866 = vmatmul.mubr.bf16.gmra.mxu0 %v10584_v35  ;;  %6931 = vmatmul.mubr.bf16.gmra.mxu1 %v10587_v43  ;;  %v10614_v39 = vld [vmem:[#allocation2 + $0x69c] ss:$260 sps:$4 sm:$0xff]   ;;  %v10618_v43 = vld [vmem:[#allocation5 + $0x948] sm:$0xff]  }
 0x183   :  { %v9061_v47 = vadd.f32 %v9060_v38, %v9059_v37  ;;  %v9022_v52 = vpop.f32.mrf.mxu0  ;;  %9473 = vmatpush3.bf16.msra.mxu0 %v10592_v53  ;;  %9513 = vmatpush3.bf16.msra.mxu1 %v10593_v54  ;;  %v10617_v38 = vld [vmem:[#allocation2 + $0x6a4] ss:$260 sps:$4 sm:$0xff]  }
 0x184   :  { %v6229_v46 = vadd.f32 %v9021_v41, %v11182_v59  ;;  %v9062_v51 = vpop.f32.mrf.mxu1  ;;  %9474 = vmatprep.subr.bf16.mxu0 %v10594_v60  ;;  %9514 = vmatprep.subr.bf16.mxu1 %v10595_v61  ;;  %v10615_v41 = vld [vmem:[#allocation2 + $0x6a0] ss:$260 sps:$4 sm:$0xff]  }
 0x185   :  { %v9023_v56 = vpop.f32.mrf.mxu0  ;;  %6873 = vmatprep.mubr.bf16.mxu0 %v10600_v6  ;;  %6938 = vmatprep.mubr.bf16.mxu1 %v10603_v11  ;;  %v10622_v53 = vld [vmem:[#allocation5 + $0x940] sm:$0xff]   ;;  %v10632_v11 = vld [vmem:[#allocation5 + $0xa78] sm:$0xff]  }
 0x186   :  { %v11206_v50 = vadd.f32 %v9061_v47, %v6229_v46  ;;  %v9063_v57 = vpop.f32.mrf.mxu1  ;;  %v9024_v59 = vadd.f32 %v9023_v56, %v9022_v52  ;;  %v10621_v52 = vld [vmem:[#allocation5 + $0x988] sm:$0xff]   ;;  %v10623_v56 = vld [vmem:[#allocation5 + $0x9c0] sm:$0xff]  }
 0x187   :  { %v9064_v58 = vadd.f32 %v9063_v57, %v9062_v51  ;;  %v9025_v63 = vpop.f32.mrf.mxu0  ;;  %9475 = vmatpush3.bf16.msra.mxu0 %v10596_v62  ;;  %9515 = vmatpush3.bf16.msra.mxu1 %v10597_v2  ;;  %v10626_v62 = vld [vmem:[#allocation2 + $0x90] ss:$260 sps:$4 sm:$0xff]   ;;  %v10631_v6 = vld [vmem:[#allocation2 + $0x9c] ss:$260 sps:$4 sm:$0xff]  }
 0x188   :  { %v9065_v0 = vpop.f32.mrf.mxu1  ;;  %v6234_v1 = vadd.f32 %v9024_v59, %v11185_v13  ;;  %9476 = vmatprep.subr.bf16.mxu0 %v10604_v22  ;;  %9516 = vmatprep.subr.bf16.mxu1 %v10605_v15  ;;  %v10624_v59 = vld [vmem:[#allocation5 + $0x900] sm:$0xff]   ;;  %v10635_v15 = vld [vmem:[#allocation5 + $0xab8] sm:$0xff]  }
 0x189   :  { %v9026_v12 = vpop.f32.mrf.mxu0 }
 0x18a   :  { %v9066_v3 = vpop.f32.mrf.mxu1  ;;  %v11209_v7 = vadd.f32 %v9064_v58, %v6234_v1  ;;  %v9027_v8 = vadd.f32 %v9026_v12, %v9025_v63  ;;  %6874 = vmatmul.mubr.bf16.gmra.mxu0 %v10598_v4  ;;  %6939 = vmatmul.mubr.bf16.gmra.mxu1 %v10601_v9  ;;  %v10625_v63 = vld [vmem:[#allocation5 + $0x980] sm:$0xff]   ;;  %v10629_v4 = vld [vmem:[#allocation2 + $0x98] ss:$260 sps:$4 sm:$0xff]  }
 0x18b   :  { %v9067_v14 = vadd.f32 %v9066_v3, %v9065_v0  ;;  %v9084_v13 = vpop.f32.mrf.mxu0  ;;  %9477 = vmatpush3.bf16.msra.mxu0 %v10606_v18  ;;  %9517 = vmatpush3.bf16.msra.mxu1 %v10607_v23  ;;  %v10628_v3 = vld [vmem:[#allocation2 + $0x94] ss:$260 sps:$4 sm:$0xff]  }
 0x18c   :  { %v6237_v10 = vadd.f32 %v9027_v8, %v11188_v24  ;;  %v9124_v17 = vpop.f32.mrf.mxu1  ;;  %9478 = vmatprep.subr.bf16.mxu0 %v10608_v26  ;;  %9518 = vmatprep.subr.bf16.mxu1 %v10609_v25 }
 0x18d   :  { %v9085_v21 = vpop.f32.mrf.mxu0  ;;  %6881 = vmatprep.mubr.bf16.mxu0 %v10614_v39  ;;  %6946 = vmatprep.mubr.bf16.mxu1 %v10617_v38  ;;  %v10645_v39 = vld [vmem:[#allocation2 + $0x2a4] ss:$260 sps:$4 sm:$0xff]  }
 0x18e   :  { %v11212_v16 = vadd.f32 %v9067_v14, %v6237_v10  ;;  %v9086_v19 = vadd.f32 %v9085_v21, %v9084_v13  ;;  %v9125_v28 = vpop.f32.mrf.mxu1  ;;  %v10634_v13 = vld [vmem:[#allocation5 + $0xa38] sm:$0xff]   ;;  %v10636_v21 = vld [vmem:[#allocation5 + $0xa70] sm:$0xff]   ;;  %v10646_v38 = vld [vmem:[#allocation5 + $0xa68] sm:$0xff]  }
 0x18f   :  { %v9087_v24 = vpop.f32.mrf.mxu0  ;;  %v9126_v30 = vadd.f32 %v9125_v28, %v9124_v17  ;;  %9479 = vmatpush3.bf16.msra.mxu0 %v10610_v27  ;;  %9519 = vmatpush3.bf16.msra.mxu1 %v10611_v32 }
 0x190   :  { %v6340_v29 = vadd.f32 %v9086_v19, %v11191_v44  ;;  %v9127_v31 = vpop.f32.mrf.mxu1  ;;  %9480 = vmatprep.subr.bf16.mxu0 %v10618_v43  ;;  %9520 = vmatprep.subr.bf16.mxu1 %v10619_v48  ;;  %v10637_v19 = vld [vmem:[#allocation5 + $0xaf0] sm:$0xff]   ;;  %v10648_v48 = vld [vmem:[#allocation5 + $0xa28] sm:$0xff]  }
 0x191   :  { %v9088_v33 = vpop.f32.mrf.mxu0 }
 0x192   :  { %v11215_v34 = vadd.f32 %v9126_v30, %v6340_v29  ;;  %v9089_v37 = vadd.f32 %v9088_v33, %v9087_v24  ;;  %v9128_v35 = vpop.f32.mrf.mxu1  ;;  %6882 = vmatmul.mubr.bf16.gmra.mxu0 %v10612_v36  ;;  %6947 = vmatmul.mubr.bf16.gmra.mxu1 %v10615_v41  ;;  %v10638_v24 = vld [vmem:[#allocation5 + $0xa30] sm:$0xff]   ;;  %v10642_v33 = vld [vmem:[#allocation2 + $0x29c] ss:$260 sps:$4 sm:$0xff]  }
 0x193   :  { %v9129_v44 = vadd.f32 %v9128_v35, %v9127_v31  ;;  %v9090_v47 = vpop.f32.mrf.mxu0  ;;  %9481 = vmatpush3.bf16.msra.mxu0 %v10620_v49  ;;  %9521 = vmatpush3.bf16.msra.mxu1 %v10621_v52  ;;  %v10639_v29 = vld [vmem:[#allocation5 + $0xab0] sm:$0xff]   ;;  %v10640_v31 = vld [vmem:[#allocation2 + $0x298] ss:$260 sps:$4 sm:$0xff]   ;;  %v10643_v36 = vld [vmem:[#allocation2 + $0x2a0] ss:$260 sps:$4 sm:$0xff]  }
 0x194   :  { %v6343_v42 = vadd.f32 %v9089_v37, %v11194_v55  ;;  %v9130_v45 = vpop.f32.mrf.mxu1  ;;  %9482 = vmatprep.subr.bf16.mxu0 %v10622_v53  ;;  %9522 = vmatprep.subr.bf16.mxu1 %v10623_v56  ;;  %v10649_v49 = vld [vmem:[#allocation5 + $0xaa8] sm:$0xff]  }
 0x195   :  { %v9091_v51 = vpop.f32.mrf.mxu0  ;;  %6987 = vmatprep.mubr.bf16.mxu0 %v10628_v3  ;;  %7052 = vmatprep.mubr.bf16.mxu1 %v10631_v6  ;;  %v10661_v6 = vld [vmem:[#allocation5 + $0xad8] sm:$0xff]  }
 0x196   :  { %v11218_v46 = vadd.f32 %v9129_v44, %v6343_v42  ;;  %v9092_v54 = vadd.f32 %v9091_v51, %v9090_v47  ;;  %v9131_v55 = vpop.f32.mrf.mxu1  ;;  %v10647_v42 = vld [vmem:[#allocation5 + $0xae8] sm:$0xff]   ;;  %v10650_v51 = vld [vmem:[#allocation5 + $0xa60] sm:$0xff]  }
 0x197   :  { %v9132_v57 = vadd.f32 %v9131_v55, %v9130_v45  ;;  %v9093_v60 = vpop.f32.mrf.mxu0  ;;  %9483 = vmatpush3.bf16.msra.mxu0 %v10624_v59  ;;  %9523 = vmatpush3.bf16.msra.mxu1 %v10625_v63  ;;  %v10653_v59 = vld [vmem:[#allocation5 + $0xaa0] sm:$0xff]  }
 0x198   :  { %v6348_v58 = vadd.f32 %v9092_v54, %v11197_v5  ;;  %v9133_v61 = vpop.f32.mrf.mxu1  ;;  %v10633_v5 = vld [vmem:[#allocation5 + $0xaf8] sm:$0xff]   ;;  %9548 = vmatprep.subr.bf16.mxu0 %v10632_v11  ;;  %v10651_v54 = vld [vmem:[#allocation5 + $0xae0] sm:$0xff]  }
 0x199   :  { %v9094_v0 = vpop.f32.mrf.mxu0  ;;  %9588 = vmatprep.subr.bf16.mxu1 %v10633_v5  ;;  %v10662_v11 = vld [vmem:[#allocation5 + $0xa18] sm:$0xff]  }
 0x19a   :  { %v11221_v1 = vadd.f32 %v9132_v57, %v6348_v58  ;;  %v9095_v2 = vadd.f32 %v9094_v0, %v9093_v60  ;;  %v9134_v12 = vpop.f32.mrf.mxu1  ;;  %6988 = vmatmul.mubr.bf16.vlgmr.msra.gmra.mxu0 %v10626_v62  ;;  %7053 = vmatmul.mubr.bf16.vlgmr.msra.gmra.mxu1 %v10629_v4  ;;  %v10652_v57 = vld [vmem:[#allocation5 + $0xa20] sm:$0xff]  }
 0x19b   :  { %v9135_v9 = vadd.f32 %v9134_v12, %v9133_v61  ;;  %v9096_v14 = vpop.f32.mrf.mxu0  ;;  %9549 = vmatpush3.bf16.msra.mxu0 %v10634_v13  ;;  %9589 = vmatpush3.bf16.msra.mxu1 %v10635_v15  ;;  %v10654_v0 = vld [vmem:[#allocation2 + $0x4a0] ss:$260 sps:$4 sm:$0xff]   ;;  %v10659_v12 = vld [vmem:[#allocation2 + $0x4ac] ss:$260 sps:$4 sm:$0xff]  }
 0x19c   :  { %v6351_v8 = vadd.f32 %v9095_v2, %v11200_v20  ;;  %v9136_v22 = vpop.f32.mrf.mxu1  ;;  %9550 = vmatprep.subr.bf16.mxu0 %v10636_v21  ;;  %9590 = vmatprep.subr.bf16.mxu1 %v10637_v19  ;;  %v10656_v62 = vld [vmem:[#allocation2 + $0x4a4] ss:$260 sps:$4 sm:$0xff]   ;;  %v10664_v13 = vld [vmem:[#allocation5 + $0xa50] sm:$0xff]  }
 0x19d   :  { %v9097_v18 = vpop.f32.mrf.mxu0  ;;  %6995 = vmatprep.mubr.bf16.mxu0 %v10642_v33  ;;  %7060 = vmatprep.mubr.bf16.mxu1 %v10645_v39  ;;  %v10657_v2 = vld [vmem:[#allocation2 + $0x4a8] ss:$260 sps:$4 sm:$0xff]   ;;  %v10673_v33 = vld [vmem:[#allocation2 + $0x6b4] ss:$260 sps:$4 sm:$0xff]  }
 0x19e   :  { %v11224_v10 = vadd.f32 %v9135_v9, %v6351_v8  ;;  %v9137_v17 = vpop.f32.mrf.mxu1  ;;  %v9098_v20 = vadd.f32 %v9097_v18, %v9096_v14  ;;  %v10663_v14 = vld [vmem:[#allocation5 + $0xa98] sm:$0xff]   ;;  %v10665_v18 = vld [vmem:[#allocation5 + $0xad0] sm:$0xff]   ;;  %v10674_v39 = vld [vmem:[#allocation5 + $0xa48] sm:$0xff]  }
 0x19f   :  { %v9138_v23 = vadd.f32 %v9137_v17, %v9136_v22  ;;  %v9099_v26 = vpop.f32.mrf.mxu0  ;;  %9551 = vmatpush3.bf16.msra.mxu0 %v10638_v24  ;;  %9591 = vmatpush3.bf16.msra.mxu1 %v10639_v29  ;;  %v10668_v24 = vld [vmem:[#allocation2 + $0x6a8] ss:$260 sps:$4 sm:$0xff]  }
 0x1a0   :  { %v9139_v28 = vpop.f32.mrf.mxu1  ;;  %v6356_v25 = vadd.f32 %v9098_v20, %v11203_v40  ;;  %9552 = vmatprep.subr.bf16.mxu0 %v10646_v38  ;;  %9592 = vmatprep.subr.bf16.mxu1 %v10647_v42  ;;  %v10666_v20 = vld [vmem:[#allocation5 + $0xa10] sm:$0xff]   ;;  %v10677_v42 = vld [vmem:[#allocation5 + $0xa88] sm:$0xff]  }
 0x1a1   :  { %v9100_v30 = vpop.f32.mrf.mxu0 }
 0x1a2   :  { %v9140_v27 = vpop.f32.mrf.mxu1  ;;  %v11227_v32 = vadd.f32 %v9138_v23, %v6356_v25  ;;  %v9101_v37 = vadd.f32 %v9100_v30, %v9099_v26  ;;  %6996 = vmatmul.mubr.bf16.gmra.mxu0 %v10640_v31  ;;  %7061 = vmatmul.mubr.bf16.gmra.mxu1 %v10643_v36  ;;  %v10667_v26 = vld [vmem:[#allocation5 + $0xa90] sm:$0xff]  }
 0x1a3   :  { %v9141_v41 = vadd.f32 %v9140_v27, %v9139_v28  ;;  %v9102_v40 = vpop.f32.mrf.mxu0  ;;  %9553 = vmatpush3.bf16.msra.mxu0 %v10648_v48  ;;  %9593 = vmatpush3.bf16.msra.mxu1 %v10649_v49  ;;  %v10670_v27 = vld [vmem:[#allocation2 + $0x6ac] ss:$260 sps:$4 sm:$0xff]  }
 0x1a4   :  { %v6359_v35 = vadd.f32 %v9101_v37, %v11206_v50  ;;  %v9142_v43 = vpop.f32.mrf.mxu1  ;;  %9554 = vmatprep.subr.bf16.mxu0 %v10650_v51  ;;  %9594 = vmatprep.subr.bf16.mxu1 %v10651_v54  ;;  %v10671_v31 = vld [vmem:[#allocation2 + $0x6b0] ss:$260 sps:$4 sm:$0xff]   ;;  %v10681_v54 = vld [vmem:[#allocation5 + $0xa80] sm:$0xff]  }
 0x1a5   :  { %v9103_v47 = vpop.f32.mrf.mxu0  ;;  %7003 = vmatprep.mubr.bf16.mxu0 %v10656_v62  ;;  %7068 = vmatprep.mubr.bf16.mxu1 %v10659_v12  ;;  %v10688_v12 = vld [vmem:[#allocation5 + $0xb78] sm:$0xff]  }
 0x1a6   :  { %v11230_v44 = vadd.f32 %v9141_v41, %v6359_v35  ;;  %v9104_v45 = vadd.f32 %v9103_v47, %v9102_v40  ;;  %v9143_v52 = vpop.f32.mrf.mxu1  ;;  %v10676_v40 = vld [vmem:[#allocation5 + $0xa08] sm:$0xff]   ;;  %v10678_v47 = vld [vmem:[#allocation5 + $0xa40] sm:$0xff]  }
 0x1a7   :  { %v9144_v50 = vadd.f32 %v9143_v52, %v9142_v43  ;;  %v9105_v53 = vpop.f32.mrf.mxu0  ;;  %9555 = vmatpush3.bf16.msra.mxu0 %v10652_v57  ;;  %9595 = vmatpush3.bf16.msra.mxu1 %v10653_v59  ;;  %v10682_v57 = vld [vmem:[#allocation2 + $0xa0] ss:$260 sps:$4 sm:$0xff]  }
 0x1a8   :  { %v6364_v55 = vadd.f32 %v9104_v45, %v11209_v7  ;;  %v9145_v56 = vpop.f32.mrf.mxu1  ;;  %v10660_v7 = vld [vmem:[#allocation5 + $0xa58] sm:$0xff]   ;;  %9596 = vmatprep.subr.bf16.mxu1 %v10661_v6  ;;  %v10679_v45 = vld [vmem:[#allocation5 + $0xac0] sm:$0xff]  }
 0x1a9   :  { %v9106_v60 = vpop.f32.mrf.mxu0  ;;  %9556 = vmatprep.subr.bf16.mxu0 %v10660_v7  ;;  %v10690_v6 = vld [vmem:[#allocation5 + $0xb38] sm:$0xff]  }
 0x1aa   :  { %v11233_v58 = vadd.f32 %v9144_v50, %v6364_v55  ;;  %v9107_v61 = vadd.f32 %v9106_v60, %v9105_v53  ;;  %v9146_v63 = vpop.f32.mrf.mxu1  ;;  %7004 = vmatmul.mubr.bf16.gmra.mxu0 %v10654_v0  ;;  %7069 = vmatmul.mubr.bf16.gmra.mxu1 %v10657_v2  ;;  %v10680_v50 = vld [vmem:[#allocation5 + $0xa00] sm:$0xff]   ;;  %v10687_v0 = vld [vmem:[#allocation2 + $0xac] ss:$260 sps:$4 sm:$0xff]  }
 0x1ab   :  { %v9147_v4 = vadd.f32 %v9146_v63, %v9145_v56  ;;  %v9164_v9 = vpop.f32.mrf.mxu0  ;;  %9557 = vmatpush3.bf16.msra.mxu0 %v10662_v11  ;;  %9597 = vmatpush3.bf16.msra.mxu1 %v10663_v14  ;;  %v10684_v60 = vld [vmem:[#allocation2 + $0xa4] ss:$260 sps:$4 sm:$0xff]   ;;  %v10691_v11 = vld [vmem:[#allocation5 + $0xbb8] sm:$0xff]  }
 0x1ac   :  { %v6367_v3 = vadd.f32 %v9107_v61, %v11212_v16  ;;  %v9204_v5 = vpop.f32.mrf.mxu1  ;;  %9558 = vmatprep.subr.bf16.mxu0 %v10664_v13  ;;  %9598 = vmatprep.subr.bf16.mxu1 %v10665_v18  ;;  %v10685_v63 = vld [vmem:[#allocation2 + $0xa8] ss:$260 sps:$4 sm:$0xff]  }
 0x1ad   :  { %v9165_v22 = vpop.f32.mrf.mxu0  ;;  %7011 = vmatprep.mubr.bf16.mxu0 %v10670_v27  ;;  %7076 = vmatprep.mubr.bf16.mxu1 %v10673_v33  ;;  %v10703_v33 = vld [vmem:[#allocation5 + $0xbe8] sm:$0xff]  }
 0x1ae   :  { %v11236_v8 = vadd.f32 %v9147_v4, %v6367_v3  ;;  %v9166_v15 = vadd.f32 %v9165_v22, %v9164_v9  ;;  %v9205_v16 = vpop.f32.mrf.mxu1  ;;  %v10689_v3 = vld [vmem:[#allocation5 + $0xbf8] sm:$0xff]   ;;  %v10692_v22 = vld [vmem:[#allocation5 + $0xb70] sm:$0xff]  }
 0x1af   :  { %v9206_v17 = vadd.f32 %v9205_v16, %v9204_v5  ;;  %v9167_v21 = vpop.f32.mrf.mxu0  ;;  %9559 = vmatpush3.bf16.msra.mxu0 %v10666_v20  ;;  %9599 = vmatpush3.bf16.msra.mxu1 %v10667_v26  ;;  %v10695_v20 = vld [vmem:[#allocation5 + $0xbb0] sm:$0xff]  }
 0x1b0   :  { %v6470_v23 = vadd.f32 %v9166_v15, %v11215_v34  ;;  %v9207_v19 = vpop.f32.mrf.mxu1  ;;  %v10675_v34 = vld [vmem:[#allocation5 + $0xac8] sm:$0xff]   ;;  %9560 = vmatprep.subr.bf16.mxu0 %v10674_v39  ;;  %v10693_v15 = vld [vmem:[#allocation5 + $0xbf0] sm:$0xff]  }
 0x1b1   :  { %v9168_v28 = vpop.f32.mrf.mxu0  ;;  %9600 = vmatprep.subr.bf16.mxu1 %v10675_v34  ;;  %v10704_v39 = vld [vmem:[#allocation5 + $0xb28] sm:$0xff]  }
 0x1b2   :  { %v11239_v25 = vadd.f32 %v9206_v17, %v6470_v23  ;;  %v9169_v29 = vadd.f32 %v9168_v28, %v9167_v21  ;;  %v9208_v30 = vpop.f32.mrf.mxu1  ;;  %7012 = vmatmul.mubr.bf16.gmra.mxu0 %v10668_v24  ;;  %7077 = vmatmul.mubr.bf16.gmra.mxu1 %v10671_v31  ;;  %v10694_v17 = vld [vmem:[#allocation5 + $0xb30] sm:$0xff]   ;;  %v10696_v28 = vld [vmem:[#allocation2 + $0x2a8] ss:$260 sps:$4 sm:$0xff]  }
 0x1b3   :  { %v9209_v36 = vadd.f32 %v9208_v30, %v9207_v19  ;;  %9561 = vmatpush3.bf16.msra.mxu0 %v10676_v40  ;;  %9601 = vmatpush3.bf16.msra.mxu1 %v10677_v42  ;;  %v10698_v24 = vld [vmem:[#allocation2 + $0x2ac] ss:$260 sps:$4 sm:$0xff]   ;;  %v10701_v30 = vld [vmem:[#allocation2 + $0x2b4] ss:$260 sps:$4 sm:$0xff]   ;;  %v10706_v40 = vld [vmem:[#allocation5 + $0xb60] sm:$0xff]  }
 0x1b4   :  { %v6473_v37 = vadd.f32 %v9169_v29, %v11218_v46  ;;  %9562 = vmatprep.subr.bf16.mxu0 %v10678_v47  ;;  %9602 = vmatprep.subr.bf16.mxu1 %v10679_v45  ;;  %v10699_v29 = vld [vmem:[#allocation2 + $0x2b0] ss:$260 sps:$4 sm:$0xff]  }
 0x1b5   :  { %7117 = vmatprep.mubr.bf16.mxu0 %v10684_v60  ;;  %7182 = vmatprep.mubr.bf16.mxu1 %v10687_v0  ;;  %v10715_v60 = vld [vmem:[#allocation2 + $0x4bc] ss:$260 sps:$4 sm:$0xff]  }
 0x1b6   :  { %v11242_v35 = vadd.f32 %v9209_v36, %v6473_v37  ;;  %v10716_v0 = vld [vmem:[#allocation5 + $0xb58] sm:$0xff]  }
 0x1b7   :  { %9563 = vmatpush3.bf16.msra.mxu0 %v10680_v50  ;;  %9603 = vmatpush3.bf16.msra.mxu1 %v10681_v54  ;;  %v10710_v50 = vld [vmem:[#allocation2 + $0x4b0] ss:$260 sps:$4 sm:$0xff]  }
 0x1b8   :  { %9628 = vmatprep.subr.bf16.mxu0 %v10688_v12  ;;  %9668 = vmatprep.subr.bf16.mxu1 %v10689_v3  ;;  %v10718_v12 = vld [vmem:[#allocation5 + $0xb18] sm:$0xff]  }
 0x1b9   :  { %v10719_v3 = vld [vmem:[#allocation5 + $0xb98] sm:$0xff]  }
 0x1ba   :  { %7118 = vmatmul.mubr.bf16.vlgmr.msra.gmra.mxu0 %v10682_v57  ;;  %7183 = vmatmul.mubr.bf16.vlgmr.msra.gmra.mxu1 %v10685_v63  ;;  %v10713_v57 = vld [vmem:[#allocation2 + $0x4b8] ss:$260 sps:$4 sm:$0xff]  }
 0x1bb   :  { %9629 = vmatpush3.bf16.msra.mxu0 %v10690_v6  ;;  %9669 = vmatpush3.bf16.msra.mxu1 %v10691_v11  ;;  %v10720_v6 = vld [vmem:[#allocation5 + $0xb50] sm:$0xff]  }
 0x1bc   :  { %9630 = vmatprep.subr.bf16.mxu0 %v10692_v22  ;;  %9670 = vmatprep.subr.bf16.mxu1 %v10693_v15  ;;  %v10721_v11 = vld [vmem:[#allocation5 + $0xbd0] sm:$0xff]  }
 0x1bd   :  { %7125 = vmatprep.mubr.bf16.mxu0 %v10698_v24  ;;  %7190 = vmatprep.mubr.bf16.mxu1 %v10701_v30  ;;  %v10722_v22 = vld [vmem:[#allocation5 + $0xb10] sm:$0xff]  }
 0x1be   :  { %v10723_v15 = vld [vmem:[#allocation5 + $0xb90] sm:$0xff]  }
 0x1bf   :  { %9631 = vmatpush3.bf16.msra.mxu0 %v10694_v17  ;;  %9671 = vmatpush3.bf16.msra.mxu1 %v10695_v20  ;;  %v10726_v17 = vld [vmem:[#allocation2 + $0x6bc] ss:$260 sps:$4 sm:$0xff]  }
 0x1c0   :  { %9672 = vmatprep.subr.bf16.mxu1 %v10703_v33  ;;  %v10732_v33 = vld [vmem:[#allocation5 + $0xb08] sm:$0xff]  }
 0x1c2   :  { %7126 = vmatmul.mubr.bf16.gmra.mxu0 %v10696_v28  ;;  %7191 = vmatmul.mubr.bf16.gmra.mxu1 %v10699_v29  ;;  %v10729_v28 = vld [vmem:[#allocation2 + $0x6c4] ss:$260 sps:$4 sm:$0xff]  }
 0x1c3   :  { %7198 = vmatprep.mubr.bf16.mxu1 %v10715_v60  ;;  %v10745_v60 = vld [vmem:[#allocation5 + $0xcf8] sm:$0xff]  }
 0x1ca   :  { %7199 = vmatmul.mubr.bf16.gmra.mxu1 %v10713_v57 }
 0x1cb   :  { %7206 = vmatprep.mubr.bf16.mxu1 %v10729_v28  ;;  %v10758_v28 = vld [vmem:[#allocation5 + $0xc68] sm:$0xff]  }
 0x1d2   :  { %v9170_v41 = vpop.f32.mrf.mxu0 }
 0x1d3   :  { %v9210_v38 = vpop.f32.mrf.mxu1 }
 0x1d4   :  { %v9171_v43 = vpop.f32.mrf.mxu0 }
 0x1d5   :  { %v9211_v48 = vpop.f32.mrf.mxu1  ;;  %v9172_v46 = vadd.f32 %v9171_v43, %v9170_v41  ;;  %v10705_v41 = vld [vmem:[#allocation5 + $0xba8] sm:$0xff]   ;;  %v10707_v43 = vld [vmem:[#allocation5 + $0xbe0] sm:$0xff]  }
 0x1d6   :  { %v9212_v49 = vadd.f32 %v9211_v48, %v9210_v38  ;;  %v9173_v52 = vpop.f32.mrf.mxu0  ;;  %9673 = vmatpush3.bf16.msra.mxu1 %v10705_v41 }
 0x1d7   :  { %v9213_v51 = vpop.f32.mrf.mxu1  ;;  %v6478_v53 = vadd.f32 %v9172_v46, %v11221_v1  ;;  %v10708_v46 = vld [vmem:[#allocation5 + $0xb20] sm:$0xff]   ;;  %9674 = vmatprep.subr.bf16.mxu1 %v10707_v43 }
 0x1d8   :  { %v9174_v55 = vpop.f32.mrf.mxu0 }
 0x1d9   :  { %v9214_v56 = vpop.f32.mrf.mxu1  ;;  %v11245_v59 = vadd.f32 %v9212_v49, %v6478_v53  ;;  %v9175_v61 = vadd.f32 %v9174_v55, %v9173_v52  ;;  %v10709_v52 = vld [vmem:[#allocation5 + $0xba0] sm:$0xff]  }
 0x1da   :  { %v9215_v2 = vadd.f32 %v9214_v56, %v9213_v51  ;;  %9675 = vmatpush3.bf16.msra.mxu1 %v10709_v52  ;;  %v10712_v56 = vld [vmem:[#allocation2 + $0x4b4] ss:$260 sps:$4 sm:$0xff]  }
 0x1db   :  { %v6481_v62 = vadd.f32 %v9175_v61, %v11224_v10  ;;  %v9216_v7 = vpop.f32.mrf.mxu1  ;;  %7133 = vmatprep.mubr.bf16.mxu0 %v10712_v56 }
 0x1dc   :  { %v9176_v1 = vpop.f32.mrf.mxu0  ;;  %7134 = vmatmul.mubr.bf16.gmra.mxu0 %v10710_v50  ;;  %v10740_v50 = vld [vmem:[#allocation2 + $0xb4] ss:$260 sps:$4 sm:$0xff]  }
 0x1dd   :  { %v11248_v4 = vadd.f32 %v9215_v2, %v6481_v62  ;;  %v9217_v14 = vpop.f32.mrf.mxu1  ;;  %7141 = vmatprep.mubr.bf16.mxu0 %v10726_v17  ;;  %v10755_v17 = vld [vmem:[#allocation2 + $0x2c0] ss:$260 sps:$4 sm:$0xff]  }
 0x1de   :  { %v9177_v9 = vpop.f32.mrf.mxu0  ;;  %v9218_v10 = vadd.f32 %v9217_v14, %v9216_v7 }
 0x1df   :  { %v9178_v5 = vadd.f32 %v9177_v9, %v9176_v1  ;;  %v9219_v18 = vpop.f32.mrf.mxu1 }
 0x1e0   :  { %v9179_v13 = vpop.f32.mrf.mxu0 }
 0x1e1   :  { %v6486_v16 = vadd.f32 %v9178_v5, %v11227_v32  ;;  %v9220_v26 = vpop.f32.mrf.mxu1  ;;  %v10702_v32 = vld [vmem:[#allocation5 + $0xb68] sm:$0xff]  }
 0x1e2   :  { %v9180_v21 = vpop.f32.mrf.mxu0  ;;  %v9221_v31 = vadd.f32 %v9220_v26, %v9219_v18  ;;  %9632 = vmatprep.subr.bf16.mxu0 %v10702_v32  ;;  %v10724_v18 = vld [vmem:[#allocation2 + $0x6b8] ss:$260 sps:$4 sm:$0xff]   ;;  %v10727_v26 = vld [vmem:[#allocation2 + $0x6c0] ss:$260 sps:$4 sm:$0xff]  }
 0x1e3   :  { %v11251_v23 = vadd.f32 %v9218_v10, %v6486_v16  ;;  %v9181_v19 = vadd.f32 %v9180_v21, %v9179_v13  ;;  %9633 = vmatpush3.bf16.msra.mxu0 %v10704_v39  ;;  %7207 = vmatmul.mubr.bf16.gmra.mxu1 %v10727_v26  ;;  %v10733_v39 = vld [vmem:[#allocation5 + $0xb88] sm:$0xff]  }
 0x1e4   :  { %v9182_v36 = vpop.f32.mrf.mxu0  ;;  %9634 = vmatprep.subr.bf16.mxu0 %v10706_v40  ;;  %7142 = vmatmul.mubr.bf16.gmra.mxu0 %v10724_v18  ;;  %v10754_v18 = vld [vmem:[#allocation2 + $0x2bc] ss:$260 sps:$4 sm:$0xff]  }
 0x1e5   :  { %v6489_v27 = vadd.f32 %v9181_v19, %v11230_v44  ;;  %v9222_v34 = vpop.f32.mrf.mxu1  ;;  %7247 = vmatprep.mubr.bf16.mxu0 %v10740_v50 }
 0x1e6   :  { %v9183_v38 = vpop.f32.mrf.mxu0 }
 0x1e7   :  { %v11254_v37 = vadd.f32 %v9221_v31, %v6489_v27  ;;  %v9184_v42 = vadd.f32 %v9183_v38, %v9182_v36  ;;  %v9223_v44 = vpop.f32.mrf.mxu1  ;;  %9635 = vmatpush3.bf16.msra.mxu0 %v10708_v46  ;;  %v10731_v27 = vld [vmem:[#allocation5 + $0xbc8] sm:$0xff]   ;;  %v10734_v38 = vld [vmem:[#allocation5 + $0xb40] sm:$0xff]  }
 0x1e8   :  { %v9224_v48 = vadd.f32 %v9223_v44, %v9222_v34  ;;  %v9185_v47 = vpop.f32.mrf.mxu0  ;;  %9636 = vmatprep.subr.bf16.mxu0 %v10716_v0  ;;  %v10737_v46 = vld [vmem:[#allocation5 + $0xb80] sm:$0xff]   ;;  %v10746_v0 = vld [vmem:[#allocation5 + $0xc38] sm:$0xff]  }
 0x1e9   :  { %v6494_v49 = vadd.f32 %v9184_v42, %v11233_v58  ;;  %v9225_v45 = vpop.f32.mrf.mxu1  ;;  %v10717_v58 = vld [vmem:[#allocation5 + $0xbd8] sm:$0xff]   ;;  %v10735_v42 = vld [vmem:[#allocation5 + $0xbc0] sm:$0xff]  }
 0x1ea   :  { %v9186_v51 = vpop.f32.mrf.mxu0  ;;  %9676 = vmatprep.subr.bf16.mxu1 %v10717_v58 }
 0x1eb   :  { %v11257_v53 = vadd.f32 %v9224_v48, %v6494_v49  ;;  %v9187_v54 = vadd.f32 %v9186_v51, %v9185_v47  ;;  %v9226_v55 = vpop.f32.mrf.mxu1  ;;  %9637 = vmatpush3.bf16.msra.mxu0 %v10718_v12  ;;  %9677 = vmatpush3.bf16.msra.mxu1 %v10719_v3  ;;  %v10736_v48 = vld [vmem:[#allocation5 + $0xb00] sm:$0xff]   ;;  %v10738_v51 = vld [vmem:[#allocation2 + $0xb0] ss:$260 sps:$4 sm:$0xff]  }
 0x1ec   :  { %v9227_v63 = vadd.f32 %v9226_v55, %v9225_v45  ;;  %9638 = vmatprep.subr.bf16.mxu0 %v10720_v6  ;;  %9678 = vmatprep.subr.bf16.mxu1 %v10721_v11  ;;  %v10743_v55 = vld [vmem:[#allocation2 + $0xbc] ss:$260 sps:$4 sm:$0xff]  }
 0x1ed   :  { %v6497_v61 = vadd.f32 %v9187_v54, %v11236_v8  ;;  %v9284_v1 = vpop.f32.mrf.mxu1  ;;  %v10741_v54 = vld [vmem:[#allocation2 + $0xb8] ss:$260 sps:$4 sm:$0xff]   ;;  %7312 = vmatprep.mubr.bf16.mxu1 %v10743_v55 }
 0x1ee   :  { %v9244_v2 = vpop.f32.mrf.mxu0  ;;  %v10772_v55 = vld [vmem:[#allocation5 + $0xc58] sm:$0xff]  }
 0x1ef   :  { %v11260_v62 = vadd.f32 %v9227_v63, %v6497_v61  ;;  %v9285_v8 = vpop.f32.mrf.mxu1  ;;  %9639 = vmatpush3.bf16.msra.mxu0 %v10722_v22  ;;  %9679 = vmatpush3.bf16.msra.mxu1 %v10723_v15 }
 0x1f0   :  { %v9245_v7 = vpop.f32.mrf.mxu0  ;;  %v9286_v5 = vadd.f32 %v9285_v8, %v9284_v1  ;;  %9680 = vmatprep.subr.bf16.mxu1 %v10731_v27  ;;  %v10748_v1 = vld [vmem:[#allocation5 + $0xc70] sm:$0xff]   ;;  %v10761_v27 = vld [vmem:[#allocation5 + $0xca8] sm:$0xff]  }
 0x1f1   :  { %v9246_v9 = vadd.f32 %v9245_v7, %v9244_v2  ;;  %v9287_v13 = vpop.f32.mrf.mxu1  ;;  %v10747_v2 = vld [vmem:[#allocation5 + $0xcb8] sm:$0xff]   ;;  %v10749_v7 = vld [vmem:[#allocation5 + $0xcf0] sm:$0xff]  }
 0x1f2   :  { %v9247_v14 = vpop.f32.mrf.mxu0  ;;  %v10750_v8 = vld [vmem:[#allocation5 + $0xc30] sm:$0xff]  }
 0x1f3   :  { %v6600_v10 = vadd.f32 %v9246_v9, %v11239_v25  ;;  %v9288_v19 = vpop.f32.mrf.mxu1  ;;  %v10730_v25 = vld [vmem:[#allocation5 + $0xb48] sm:$0xff]   ;;  %9681 = vmatpush3.bf16.msra.mxu1 %v10733_v39 }
 0x1f4   :  { %v9248_v16 = vpop.f32.mrf.mxu0  ;;  %v9289_v29 = vadd.f32 %v9288_v19, %v9287_v13  ;;  %9640 = vmatprep.subr.bf16.mxu0 %v10730_v25  ;;  %9682 = vmatprep.subr.bf16.mxu1 %v10735_v42  ;;  %v10765_v42 = vld [vmem:[#allocation5 + $0xca0] sm:$0xff]  }
 0x1f5   :  { %v11263_v21 = vadd.f32 %v9286_v5, %v6600_v10  ;;  %v9249_v20 = vadd.f32 %v9248_v16, %v9247_v14  ;;  %9641 = vmatpush3.bf16.msra.mxu0 %v10732_v33  ;;  %v10751_v14 = vld [vmem:[#allocation5 + $0xcb0] sm:$0xff]   ;;  %v10752_v10 = vld [vmem:[#allocation2 + $0x2b8] ss:$260 sps:$4 sm:$0xff]  }
 0x1f6   :  { %v9250_v30 = vpop.f32.mrf.mxu0  ;;  %v9290_v32 = vpop.f32.mrf.mxu1  ;;  %9642 = vmatprep.subr.bf16.mxu0 %v10734_v38 }
 0x1f7   :  { %v6603_v24 = vadd.f32 %v9249_v20, %v11242_v35  ;;  %9683 = vmatpush3.bf16.msra.mxu1 %v10737_v46  ;;  %v10757_v20 = vld [vmem:[#allocation2 + $0x2c4] ss:$260 sps:$4 sm:$0xff]  }
 0x1f8   :  { %v9251_v36 = vpop.f32.mrf.mxu0  ;;  %v9291_v41 = vpop.f32.mrf.mxu1  ;;  %9748 = vmatprep.subr.bf16.mxu1 %v10745_v60 }
 0x1f9   :  { %v11266_v31 = vadd.f32 %v9289_v29, %v6603_v24  ;;  %v9252_v34 = vadd.f32 %v9251_v36, %v9250_v30  ;;  %v9292_v35 = vadd.f32 %v9291_v41, %v9290_v32  ;;  %9643 = vmatpush3.bf16.msra.mxu0 %v10736_v48  ;;  %v10760_v30 = vld [vmem:[#allocation5 + $0xc28] sm:$0xff]   ;;  %v10762_v36 = vld [vmem:[#allocation5 + $0xc60] sm:$0xff]  }
 0x1fa   :  { %v9253_v40 = vpop.f32.mrf.mxu0  ;;  %v9293_v43 = vpop.f32.mrf.mxu1  ;;  %7313 = vmatmul.mubr.bf16.vlgmr.msra.gmra.mxu1 %v10741_v54  ;;  %v10766_v48 = vld [vmem:[#allocation2 + $0x4c0] ss:$260 sps:$4 sm:$0xff]  }
 0x1fb   :  { %v6608_v44 = vadd.f32 %v9252_v34, %v11245_v59  ;;  %v10744_v59 = vld [vmem:[#allocation5 + $0xc78] sm:$0xff]   ;;  %9749 = vmatpush3.bf16.msra.mxu1 %v10747_v2  ;;  %7320 = vmatprep.mubr.bf16.mxu1 %v10757_v20  ;;  %v10763_v34 = vld [vmem:[#allocation5 + $0xce0] sm:$0xff]   ;;  %v10776_v2 = vld [vmem:[#allocation5 + $0xc50] sm:$0xff]  }
 0x1fc   :  { %v9254_v47 = vpop.f32.mrf.mxu0  ;;  %v9294_v52 = vpop.f32.mrf.mxu1  ;;  %7248 = vmatmul.mubr.bf16.vlgmr.msra.gmra.mxu0 %v10738_v51  ;;  %9708 = vmatprep.subr.bf16.mxu0 %v10744_v59  ;;  %v10771_v51 = vld [vmem:[#allocation2 + $0x4cc] ss:$260 sps:$4 sm:$0xff]   ;;  %v10774_v59 = vld [vmem:[#allocation5 + $0xc18] sm:$0xff]  }
 0x1fd   :  { %v11269_v49 = vadd.f32 %v9292_v35, %v6608_v44  ;;  %v9255_v45 = vadd.f32 %v9254_v47, %v9253_v40  ;;  %v9295_v57 = vadd.f32 %v9294_v52, %v9293_v43  ;;  %9709 = vmatpush3.bf16.msra.mxu0 %v10746_v0  ;;  %9750 = vmatprep.subr.bf16.mxu1 %v10749_v7  ;;  %v10764_v35 = vld [vmem:[#allocation5 + $0xc20] sm:$0xff]   ;;  %v10769_v52 = vld [vmem:[#allocation2 + $0x4c8] ss:$260 sps:$4 sm:$0xff]   ;;  %v10775_v0 = vld [vmem:[#allocation5 + $0xc98] sm:$0xff]  }
 0x1fe   :  { %v9256_v63 = vpop.f32.mrf.mxu0  ;;  %9710 = vmatprep.subr.bf16.mxu0 %v10748_v1  ;;  %7255 = vmatprep.mubr.bf16.mxu0 %v10754_v18  ;;  %v10768_v47 = vld [vmem:[#allocation2 + $0x4c4] ss:$260 sps:$4 sm:$0xff]   ;;  %v10777_v1 = vld [vmem:[#allocation5 + $0xcd0] sm:$0xff]  }
 0x1ff   :  { %v6611_v56 = vadd.f32 %v9255_v45, %v11248_v4  ;;  %v9296_v58 = vpop.f32.mrf.mxu1  ;;  %9751 = vmatpush3.bf16.msra.mxu1 %v10751_v14  ;;  %v10778_v7 = vld [vmem:[#allocation5 + $0xc10] sm:$0xff]   ;;  %v10780_v14 = vld [vmem:[#allocation2 + $0x6c8] ss:$260 sps:$4 sm:$0xff]  }
 0x200   :  { %v9257_v12 = vpop.f32.mrf.mxu0  ;;  %v10787_v20 = vld [vmem:[#allocation5 + $0xcc8] sm:$0xff]  }
 0x201   :  { %v11272_v61 = vadd.f32 %v9295_v57, %v6611_v56  ;;  %v9258_v3 = vadd.f32 %v9257_v12, %v9256_v63  ;;  %v9297_v4 = vpop.f32.mrf.mxu1  ;;  %9711 = vmatpush3.bf16.msra.mxu0 %v10750_v8  ;;  %v10773_v56 = vld [vmem:[#allocation5 + $0xcd8] sm:$0xff]   ;;  %v10779_v8 = vld [vmem:[#allocation5 + $0xc90] sm:$0xff]  }
 0x202   :  { %v9298_v6 = vadd.f32 %v9297_v4, %v9296_v58  ;;  %v9259_v9 = vpop.f32.mrf.mxu0  ;;  %7321 = vmatmul.mubr.bf16.gmra.mxu1 %v10755_v17  ;;  %9712 = vmatprep.subr.bf16.mxu0 %v10758_v28  ;;  %v10786_v17 = vld [vmem:[#allocation5 + $0xc48] sm:$0xff]  }
 0x203   :  { %v6616_v11 = vadd.f32 %v9258_v3, %v11251_v23  ;;  %v9299_v5 = vpop.f32.mrf.mxu1  ;;  %v10759_v23 = vld [vmem:[#allocation5 + $0xce8] sm:$0xff]   ;;  %7328 = vmatprep.mubr.bf16.mxu1 %v10771_v51  ;;  %v10800_v51 = vld [vmem:[#allocation5 + $0xd78] sm:$0xff]  }
 0x204   :  { %v9260_v22 = vpop.f32.mrf.mxu0  ;;  %7256 = vmatmul.mubr.bf16.gmra.mxu0 %v10752_v10  ;;  %9752 = vmatprep.subr.bf16.mxu1 %v10759_v23  ;;  %v10788_v28 = vld [vmem:[#allocation5 + $0xc08] sm:$0xff]  }
 0x205   :  { %v11275_v13 = vadd.f32 %v9298_v6, %v6616_v11  ;;  %v9261_v15 = vadd.f32 %v9260_v22, %v9259_v9  ;;  %v9300_v16 = vpop.f32.mrf.mxu1  ;;  %9713 = vmatpush3.bf16.msra.mxu0 %v10760_v30  ;;  %9753 = vmatpush3.bf16.msra.mxu1 %v10761_v27  ;;  %v10782_v22 = vld [vmem:[#allocation2 + $0x6cc] ss:$260 sps:$4 sm:$0xff]   ;;  %v10790_v30 = vld [vmem:[#allocation5 + $0xc40] sm:$0xff]  }
 0x206   :  { %v9301_v26 = vadd.f32 %v9300_v16, %v9299_v5  ;;  %9714 = vmatprep.subr.bf16.mxu0 %v10762_v36  ;;  %9754 = vmatprep.subr.bf16.mxu1 %v10763_v34  ;;  %v10785_v16 = vld [vmem:[#allocation2 + $0x6d4] ss:$260 sps:$4 sm:$0xff]  }
 0x207   :  { %v6619_v19 = vadd.f32 %v9261_v15, %v11254_v37  ;;  %v9262_v29 = vpop.f32.mrf.mxu0  ;;  %7263 = vmatprep.mubr.bf16.mxu0 %v10768_v47  ;;  %v10783_v15 = vld [vmem:[#allocation2 + $0x6d0] ss:$260 sps:$4 sm:$0xff]  }
 0x208   :  { %v9302_v25 = vpop.f32.mrf.mxu1  ;;  %v10799_v47 = vld [vmem:[#allocation2 + $0xcc] ss:$260 sps:$4 sm:$0xff]  }
 0x209   :  { %v11278_v24 = vadd.f32 %v9301_v26, %v6619_v19  ;;  %v9263_v32 = vpop.f32.mrf.mxu0  ;;  %9715 = vmatpush3.bf16.msra.mxu0 %v10764_v35  ;;  %9755 = vmatpush3.bf16.msra.mxu1 %v10765_v42  ;;  %v10794_v35 = vld [vmem:[#allocation2 + $0xc0] ss:$260 sps:$4 sm:$0xff]  }
 0x20a   :  { %v9303_v33 = vpop.f32.mrf.mxu1  ;;  %v9264_v37 = vadd.f32 %v9263_v32, %v9262_v29  ;;  %7329 = vmatmul.mubr.bf16.gmra.mxu1 %v10769_v52  ;;  %9716 = vmatprep.subr.bf16.mxu0 %v10772_v55  ;;  %v10789_v29 = vld [vmem:[#allocation5 + $0xc88] sm:$0xff]   ;;  %v10791_v32 = vld [vmem:[#allocation5 + $0xcc0] sm:$0xff]   ;;  %v10802_v55 = vld [vmem:[#allocation5 + $0xd38] sm:$0xff]  }
 0x20b   :  { %v9304_v39 = vadd.f32 %v9303_v33, %v9302_v25  ;;  %v9265_v41 = vpop.f32.mrf.mxu0  ;;  %9756 = vmatprep.subr.bf16.mxu1 %v10773_v56  ;;  %7336 = vmatprep.mubr.bf16.mxu1 %v10785_v16  ;;  %v10803_v56 = vld [vmem:[#allocation5 + $0xdb8] sm:$0xff]  }
 0x20c   :  { %v9305_v38 = vpop.f32.mrf.mxu1  ;;  %v6624_v40 = vadd.f32 %v9264_v37, %v11257_v53  ;;  %7264 = vmatmul.mubr.bf16.gmra.mxu0 %v10766_v48  ;;  %v10792_v37 = vld [vmem:[#allocation5 + $0xc00] sm:$0xff]   ;;  %v10797_v48 = vld [vmem:[#allocation2 + $0xc8] ss:$260 sps:$4 sm:$0xff]  }
 0x20d   :  { %v9266_v44 = vpop.f32.mrf.mxu0  ;;  %9717 = vmatpush3.bf16.msra.mxu0 %v10774_v59  ;;  %9757 = vmatpush3.bf16.msra.mxu1 %v10775_v0  ;;  %v10805_v0 = vld [vmem:[#allocation5 + $0xdf0] sm:$0xff]  }
 0x20e   :  { %v9306_v43 = vpop.f32.mrf.mxu1  ;;  %v11281_v46 = vadd.f32 %v9304_v39, %v6624_v40  ;;  %v9267_v45 = vadd.f32 %v9266_v44, %v9265_v41  ;;  %9718 = vmatprep.subr.bf16.mxu0 %v10776_v2  ;;  %9758 = vmatprep.subr.bf16.mxu1 %v10777_v1  ;;  %v10793_v41 = vld [vmem:[#allocation5 + $0xc80] sm:$0xff]  }
 0x20f   :  { %v9307_v54 = vadd.f32 %v9306_v43, %v9305_v38  ;;  %7271 = vmatprep.mubr.bf16.mxu0 %v10782_v22  ;;  %v10796_v43 = vld [vmem:[#allocation2 + $0xc4] ss:$260 sps:$4 sm:$0xff]   ;;  %v10813_v22 = vld [vmem:[#allocation2 + $0x2d4] ss:$260 sps:$4 sm:$0xff]  }
 0x210   :  { %v6627_v50 = vadd.f32 %v9267_v45, %v11260_v62 }
 0x211   :  { %9719 = vmatpush3.bf16.msra.mxu0 %v10778_v7  ;;  %9759 = vmatpush3.bf16.msra.mxu1 %v10779_v8  ;;  %v10808_v7 = vld [vmem:[#allocation2 + $0x2c8] ss:$260 sps:$4 sm:$0xff]  }
 0x212   :  { %v11284_v57 = vadd.f32 %v9307_v54, %v6627_v50  ;;  %7337 = vmatmul.mubr.bf16.gmra.mxu1 %v10783_v15  ;;  %9720 = vmatprep.subr.bf16.mxu0 %v10786_v17  ;;  %v10816_v17 = vld [vmem:[#allocation5 + $0xd28] sm:$0xff]  }
 0x213   :  { %9760 = vmatprep.subr.bf16.mxu1 %v10787_v20  ;;  %7442 = vmatprep.mubr.bf16.mxu1 %v10799_v47  ;;  %v10829_v47 = vld [vmem:[#allocation5 + $0xdd8] sm:$0xff]  }
 0x214   :  { %7272 = vmatmul.mubr.bf16.gmra.mxu0 %v10780_v14  ;;  %v10811_v14 = vld [vmem:[#allocation2 + $0x2d0] ss:$260 sps:$4 sm:$0xff]  }
 0x215   :  { %9721 = vmatpush3.bf16.msra.mxu0 %v10788_v28  ;;  %9761 = vmatpush3.bf16.msra.mxu1 %v10789_v29  ;;  %v10817_v28 = vld [vmem:[#allocation5 + $0xda8] sm:$0xff]   ;;  %v10818_v29 = vld [vmem:[#allocation5 + $0xd60] sm:$0xff]  }
 0x216   :  { %9722 = vmatprep.subr.bf16.mxu0 %v10790_v30  ;;  %9762 = vmatprep.subr.bf16.mxu1 %v10791_v32  ;;  %v10819_v30 = vld [vmem:[#allocation5 + $0xde0] sm:$0xff]  }
 0x217   :  { %7377 = vmatprep.mubr.bf16.mxu0 %v10796_v43  ;;  %v10820_v32 = vld [vmem:[#allocation5 + $0xd20] sm:$0xff]  }
 0x219   :  { %v9324_v53 = vpop.f32.mrf.mxu0  ;;  %v9364_v60 = vpop.f32.mrf.mxu1  ;;  %9723 = vmatpush3.bf16.msra.mxu0 %v10792_v37  ;;  %9763 = vmatpush3.bf16.msra.mxu1 %v10793_v41  ;;  %v10821_v37 = vld [vmem:[#allocation5 + $0xda0] sm:$0xff]   ;;  %v10822_v41 = vld [vmem:[#allocation2 + $0x4d0] ss:$260 sps:$4 sm:$0xff]  }
 0x21a   :  { %9788 = vmatprep.subr.bf16.mxu0 %v10800_v51  ;;  %v10830_v51 = vld [vmem:[#allocation5 + $0xd18] sm:$0xff]  }
 0x21b   :  { %v9325_v63 = vpop.f32.mrf.mxu0  ;;  %v9365_v12 = vpop.f32.mrf.mxu1 }
 0x21c   :  { %v9326_v58 = vadd.f32 %v9325_v63, %v9324_v53  ;;  %v9366_v4 = vadd.f32 %v9365_v12, %v9364_v60  ;;  %7378 = vmatmul.mubr.bf16.vlgmr.msra.gmra.mxu0 %v10794_v35  ;;  %7443 = vmatmul.mubr.bf16.vlgmr.msra.gmra.mxu1 %v10797_v48  ;;  %v10804_v60 = vld [vmem:[#allocation5 + $0xd70] sm:$0xff]   ;;  %v10828_v48 = vld [vmem:[#allocation5 + $0xd58] sm:$0xff]  }
 0x21d   :  { %v9327_v62 = vpop.f32.mrf.mxu0  ;;  %v9367_v6 = vpop.f32.mrf.mxu1  ;;  %9789 = vmatpush3.bf16.msra.mxu0 %v10802_v55  ;;  %v10806_v12 = vld [vmem:[#allocation5 + $0xd30] sm:$0xff]   ;;  %7450 = vmatprep.mubr.bf16.mxu1 %v10813_v22  ;;  %v10842_v22 = vld [vmem:[#allocation5 + $0xd48] sm:$0xff]  }
 0x21e   :  { %v6730_v3 = vadd.f32 %v9326_v58, %v11263_v21  ;;  %9790 = vmatprep.subr.bf16.mxu0 %v10804_v60 }
 0x21f   :  { %v9328_v9 = vpop.f32.mrf.mxu0  ;;  %v9368_v10 = vpop.f32.mrf.mxu1 }
 0x220   :  { %v11287_v11 = vadd.f32 %v9366_v4, %v6730_v3  ;;  %v9329_v5 = vadd.f32 %v9328_v9, %v9327_v62  ;;  %v9369_v21 = vadd.f32 %v9368_v10, %v9367_v6  ;;  %v10807_v3 = vld [vmem:[#allocation5 + $0xdb0] sm:$0xff]  }
 0x221   :  { %v9330_v26 = vpop.f32.mrf.mxu0  ;;  %v9370_v23 = vpop.f32.mrf.mxu1  ;;  %9791 = vmatpush3.bf16.msra.mxu0 %v10806_v12  ;;  %v10810_v6 = vld [vmem:[#allocation2 + $0x2cc] ss:$260 sps:$4 sm:$0xff]  }
 0x222   :  { %v6733_v18 = vadd.f32 %v9329_v5, %v11266_v31  ;;  %7385 = vmatprep.mubr.bf16.mxu0 %v10810_v6  ;;  %v10839_v6 = vld [vmem:[#allocation2 + $0x6e0] ss:$260 sps:$4 sm:$0xff]  }
 0x223   :  { %v9331_v25 = vpop.f32.mrf.mxu0  ;;  %v9371_v31 = vpop.f32.mrf.mxu1 }
 0x224   :  { %v11290_v19 = vadd.f32 %v9369_v21, %v6733_v18  ;;  %v9332_v27 = vadd.f32 %v9331_v25, %v9330_v26  ;;  %v9372_v33 = vadd.f32 %v9371_v31, %v9370_v23  ;;  %7386 = vmatmul.mubr.bf16.gmra.mxu0 %v10808_v7  ;;  %v10815_v18 = vld [vmem:[#allocation5 + $0xde8] sm:$0xff]   ;;  %7451 = vmatmul.mubr.bf16.gmra.mxu1 %v10811_v14  ;;  %v10838_v7 = vld [vmem:[#allocation2 + $0x6dc] ss:$260 sps:$4 sm:$0xff]  }
 0x225   :  { %v9333_v36 = vpop.f32.mrf.mxu0  ;;  %v9373_v34 = vpop.f32.mrf.mxu1 }
 0x226   :  { %v6738_v39 = vadd.f32 %v9332_v27, %v11269_v49  ;;  %v10801_v49 = vld [vmem:[#allocation5 + $0xdf8] sm:$0xff]  }
 0x227   :  { %v9334_v38 = vpop.f32.mrf.mxu0  ;;  %v9374_v44 = vpop.f32.mrf.mxu1  ;;  %9828 = vmatprep.subr.bf16.mxu1 %v10801_v49 }
 0x228   :  { %v11293_v40 = vadd.f32 %v9372_v33, %v6738_v39  ;;  %v9335_v42 = vadd.f32 %v9334_v38, %v9333_v36  ;;  %v9375_v52 = vadd.f32 %v9374_v44, %v9373_v34  ;;  %9829 = vmatpush3.bf16.msra.mxu1 %v10803_v56  ;;  %v10824_v38 = vld [vmem:[#allocation2 + $0x4d4] ss:$260 sps:$4 sm:$0xff]   ;;  %v10827_v44 = vld [vmem:[#allocation2 + $0x4dc] ss:$260 sps:$4 sm:$0xff]  }
 0x229   :  { %v9336_v54 = vpop.f32.mrf.mxu0  ;;  %v9376_v53 = vpop.f32.mrf.mxu1  ;;  %9830 = vmatprep.subr.bf16.mxu1 %v10805_v0  ;;  %7393 = vmatprep.mubr.bf16.mxu0 %v10824_v38  ;;  %v10855_v38 = vld [vmem:[#allocation2 + $0xdc] ss:$260 sps:$4 sm:$0xff]  }
 0x22a   :  { %v6741_v45 = vadd.f32 %v9335_v42, %v11272_v61  ;;  %v10825_v42 = vld [vmem:[#allocation2 + $0x4d8] ss:$260 sps:$4 sm:$0xff]   ;;  %7458 = vmatprep.mubr.bf16.mxu1 %v10827_v44 }
 0x22b   :  { %v9337_v59 = vpop.f32.mrf.mxu0  ;;  %v9377_v61 = vpop.f32.mrf.mxu1 }
 0x22c   :  { %v11296_v50 = vadd.f32 %v9375_v52, %v6741_v45  ;;  %v9338_v63 = vadd.f32 %v9337_v59, %v9336_v54  ;;  %v9378_v58 = vadd.f32 %v9377_v61, %v9376_v53  ;;  %9831 = vmatpush3.bf16.msra.mxu1 %v10807_v3  ;;  %7394 = vmatmul.mubr.bf16.gmra.mxu0 %v10822_v41  ;;  %v10831_v54 = vld [vmem:[#allocation5 + $0xd98] sm:$0xff]   ;;  %v10832_v53 = vld [vmem:[#allocation5 + $0xd50] sm:$0xff]  }
 0x22d   :  { %v9339_v2 = vpop.f32.mrf.mxu0  ;;  %v9379_v1 = vpop.f32.mrf.mxu1  ;;  %9832 = vmatprep.subr.bf16.mxu1 %v10815_v18  ;;  %7459 = vmatmul.mubr.bf16.gmra.mxu1 %v10825_v42  ;;  %v10833_v59 = vld [vmem:[#allocation5 + $0xdd0] sm:$0xff]   ;;  %v10845_v18 = vld [vmem:[#allocation5 + $0xd88] sm:$0xff]   ;;  %v10853_v41 = vld [vmem:[#allocation2 + $0xd8] ss:$260 sps:$4 sm:$0xff]  }
 0x22e   :  { %v6746_v62 = vadd.f32 %v9338_v63, %v11275_v13  ;;  %v10814_v13 = vld [vmem:[#allocation5 + $0xd68] sm:$0xff]   ;;  %v10834_v61 = vld [vmem:[#allocation5 + $0xd10] sm:$0xff]   ;;  %7401 = vmatprep.mubr.bf16.mxu0 %v10838_v7 }
 0x22f   :  { %v9340_v4 = vpop.f32.mrf.mxu0  ;;  %v9380_v5 = vpop.f32.mrf.mxu1  ;;  %9792 = vmatprep.subr.bf16.mxu0 %v10814_v13  ;;  %v10844_v13 = vld [vmem:[#allocation5 + $0xd08] sm:$0xff]  }
 0x230   :  { %v11299_v9 = vadd.f32 %v9378_v58, %v6746_v62  ;;  %v9341_v8 = vadd.f32 %v9340_v4, %v9339_v2  ;;  %v9381_v15 = vadd.f32 %v9380_v5, %v9379_v1  ;;  %9793 = vmatpush3.bf16.msra.mxu0 %v10816_v17  ;;  %9833 = vmatpush3.bf16.msra.mxu1 %v10817_v28  ;;  %v10835_v2 = vld [vmem:[#allocation5 + $0xd90] sm:$0xff]   ;;  %v10836_v62 = vld [vmem:[#allocation2 + $0x6d8] ss:$260 sps:$4 sm:$0xff]   ;;  %v10847_v28 = vld [vmem:[#allocation5 + $0xdc0] sm:$0xff]  }
 0x231   :  { %v9342_v16 = vpop.f32.mrf.mxu0  ;;  %v9382_v20 = vpop.f32.mrf.mxu1  ;;  %9794 = vmatprep.subr.bf16.mxu0 %v10818_v29  ;;  %9834 = vmatprep.subr.bf16.mxu1 %v10819_v30 }
 0x232   :  { %v6749_v10 = vadd.f32 %v9341_v8, %v11278_v24  ;;  %v10841_v8 = vld [vmem:[#allocation2 + $0x6e4] ss:$260 sps:$4 sm:$0xff]  }
 0x233   :  { %v9343_v26 = vpop.f32.mrf.mxu0  ;;  %v9383_v25 = vpop.f32.mrf.mxu1  ;;  %7466 = vmatprep.mubr.bf16.mxu1 %v10841_v8  ;;  %v10871_v8 = vld [vmem:[#allocation5 + $0xee8] sm:$0xff]  }
 0x234   :  { %v11302_v21 = vadd.f32 %v9381_v15, %v6749_v10  ;;  %v9344_v23 = vadd.f32 %v9343_v26, %v9342_v16  ;;  %v9384_v31 = vadd.f32 %v9383_v25, %v9382_v20  ;;  %9795 = vmatpush3.bf16.msra.mxu0 %v10820_v32  ;;  %9835 = vmatpush3.bf16.msra.mxu1 %v10821_v37  ;;  %v10846_v20 = vld [vmem:[#allocation5 + $0xd40] sm:$0xff]   ;;  %v10850_v32 = vld [vmem:[#allocation2 + $0xd0] ss:$260 sps:$4 sm:$0xff]  }
 0x235   :  { %v9345_v24 = vpop.f32.mrf.mxu0  ;;  %v9385_v33 = vpop.f32.mrf.mxu1  ;;  %9796 = vmatprep.subr.bf16.mxu0 %v10828_v48  ;;  %9836 = vmatprep.subr.bf16.mxu1 %v10829_v47  ;;  %v10848_v25 = vld [vmem:[#allocation5 + $0xd00] sm:$0xff]   ;;  %v10858_v48 = vld [vmem:[#allocation5 + $0xe38] sm:$0xff]  }
 0x236   :  { %v6754_v27 = vadd.f32 %v9344_v23, %v11281_v46  ;;  %7402 = vmatmul.mubr.bf16.gmra.mxu0 %v10836_v62  ;;  %7467 = vmatmul.mubr.bf16.gmra.mxu1 %v10839_v6  ;;  %v10870_v6 = vld [vmem:[#allocation5 + $0xe68] sm:$0xff]  }
 0x237   :  { %v9346_v36 = vpop.f32.mrf.mxu0  ;;  %v9386_v35 = vpop.f32.mrf.mxu1  ;;  %7572 = vmatprep.mubr.bf16.mxu1 %v10855_v38  ;;  %v10884_v38 = vld [vmem:[#allocation5 + $0xe58] sm:$0xff]  }
 0x238   :  { %v11305_v39 = vadd.f32 %v9384_v31, %v6754_v27  ;;  %v9347_v34 = vadd.f32 %v9346_v36, %v9345_v24  ;;  %v9387_v46 = vadd.f32 %v9386_v35, %v9385_v33  ;;  %9797 = vmatpush3.bf16.msra.mxu0 %v10830_v51  ;;  %9837 = vmatpush3.bf16.msra.mxu1 %v10831_v54  ;;  %v10849_v27 = vld [vmem:[#allocation5 + $0xd80] sm:$0xff]   ;;  %v10852_v33 = vld [vmem:[#allocation2 + $0xd4] ss:$260 sps:$4 sm:$0xff]  }
 0x239   :  { %9798 = vmatprep.subr.bf16.mxu0 %v10832_v53  ;;  %9838 = vmatprep.subr.bf16.mxu1 %v10833_v59  ;;  %v10859_v51 = vld [vmem:[#allocation5 + $0xeb8] sm:$0xff]   ;;  %v10860_v54 = vld [vmem:[#allocation5 + $0xe70] sm:$0xff]  }
 0x23a   :  { %v6757_v43 = vadd.f32 %v9347_v34, %v11284_v57  ;;  %v9404_v52 = vpop.f32.mrf.mxu0  ;;  %v9444_v49 = vpop.f32.mrf.mxu1  ;;  %7507 = vmatprep.mubr.bf16.mxu0 %v10852_v33  ;;  %v10861_v53 = vld [vmem:[#allocation5 + $0xef0] sm:$0xff]   ;;  %v10881_v33 = vld [vmem:[#allocation2 + $0x4e8] ss:$260 sps:$4 sm:$0xff]  }
 0x23b   :  { %v10862_v59 = vld [vmem:[#allocation5 + $0xe30] sm:$0xff]  }
 0x23c   :  { %v11308_v45 = vadd.f32 %v9387_v46, %v6757_v43  ;;  %v9405_v55 = vpop.f32.mrf.mxu0  ;;  %v9445_v57 = vpop.f32.mrf.mxu1  ;;  %9799 = vmatpush3.bf16.msra.mxu0 %v10834_v61  ;;  %9839 = vmatpush3.bf16.msra.mxu1 %v10835_v2  ;;  %v10857_v43 = vld [vmem:[#allocation5 + $0xef8] sm:$0xff]   ;;  %v10863_v61 = vld [vmem:[#allocation5 + $0xeb0] sm:$0xff]  }
 0x23d   :  { %v9406_v56 = vadd.f32 %v9405_v55, %v9404_v52  ;;  %v9446_v60 = vadd.f32 %v9445_v57, %v9444_v49  ;;  %9800 = vmatprep.subr.bf16.mxu0 %v10842_v22  ;;  %v10864_v2 = vld [vmem:[#allocation2 + $0x2d8] ss:$260 sps:$4 sm:$0xff]   ;;  %v10872_v22 = vld [vmem:[#allocation5 + $0xe28] sm:$0xff]  }
 0x23e   :  { %v9407_v63 = vpop.f32.mrf.mxu0  ;;  %v9447_v58 = vpop.f32.mrf.mxu1 }
 0x23f   :  { %v6860_v0 = vadd.f32 %v9406_v56, %v11287_v11  ;;  %v10843_v11 = vld [vmem:[#allocation5 + $0xdc8] sm:$0xff]  }
 0x240   :  { %v9408_v12 = vpop.f32.mrf.mxu0  ;;  %v9448_v4 = vpop.f32.mrf.mxu1  ;;  %9840 = vmatprep.subr.bf16.mxu1 %v10843_v11  ;;  %9801 = vmatpush3.bf16.msra.mxu0 %v10844_v13 }
 0x241   :  { %v11311_v1 = vadd.f32 %v9446_v60, %v6860_v0  ;;  %v9409_v3 = vadd.f32 %v9408_v12, %v9407_v63  ;;  %v9449_v14 = vadd.f32 %v9448_v4, %v9447_v58  ;;  %9841 = vmatpush3.bf16.msra.mxu1 %v10845_v18  ;;  %9802 = vmatprep.subr.bf16.mxu0 %v10846_v20  ;;  %v10866_v12 = vld [vmem:[#allocation2 + $0x2dc] ss:$260 sps:$4 sm:$0xff]   ;;  %v10869_v4 = vld [vmem:[#allocation2 + $0x2e4] ss:$260 sps:$4 sm:$0xff]  }
 0x242   :  { %v9410_v15 = vpop.f32.mrf.mxu0  ;;  %v9450_v16 = vpop.f32.mrf.mxu1  ;;  %9842 = vmatprep.subr.bf16.mxu1 %v10847_v28 }
 0x243   :  { %v6863_v5 = vadd.f32 %v9409_v3, %v11290_v19  ;;  %v10867_v3 = vld [vmem:[#allocation2 + $0x2e0] ss:$260 sps:$4 sm:$0xff]  }
 0x244   :  { %v9411_v17 = vpop.f32.mrf.mxu0  ;;  %v9451_v19 = vpop.f32.mrf.mxu1  ;;  %9803 = vmatpush3.bf16.msra.mxu0 %v10848_v25 }
 0x245   :  { %v11314_v10 = vadd.f32 %v9449_v14, %v6863_v5  ;;  %v9412_v26 = vadd.f32 %v9411_v17, %v9410_v15  ;;  %v9452_v23 = vadd.f32 %v9451_v19, %v9450_v16  ;;  %9843 = vmatpush3.bf16.msra.mxu1 %v10849_v27  ;;  %v10873_v15 = vld [vmem:[#allocation5 + $0xea8] sm:$0xff]   ;;  %v10874_v16 = vld [vmem:[#allocation5 + $0xe60] sm:$0xff]  }
 0x246   :  { %v9413_v29 = vpop.f32.mrf.mxu0  ;;  %v9453_v30 = vpop.f32.mrf.mxu1  ;;  %9908 = vmatprep.subr.bf16.mxu1 %v10857_v43  ;;  %v10875_v17 = vld [vmem:[#allocation5 + $0xee0] sm:$0xff]   ;;  %v10887_v43 = vld [vmem:[#allocation5 + $0xe98] sm:$0xff]  }
 0x247   :  { %v6868_v24 = vadd.f32 %v9412_v26, %v11293_v40  ;;  %7508 = vmatmul.mubr.bf16.vlgmr.msra.gmra.mxu0 %v10850_v32  ;;  %v10856_v40 = vld [vmem:[#allocation5 + $0xe78] sm:$0xff]   ;;  %v10876_v19 = vld [vmem:[#allocation5 + $0xe20] sm:$0xff]  }
 0x248   :  { %v9414_v31 = vpop.f32.mrf.mxu0  ;;  %v9454_v34 = vpop.f32.mrf.mxu1  ;;  %7573 = vmatmul.mubr.bf16.vlgmr.msra.gmra.mxu1 %v10853_v41  ;;  %9868 = vmatprep.subr.bf16.mxu0 %v10856_v40  ;;  %v10880_v32 = vld [vmem:[#allocation2 + $0x4e4] ss:$260 sps:$4 sm:$0xff]   ;;  %v10886_v40 = vld [vmem:[#allocation5 + $0xe18] sm:$0xff]  }
 0x249   :  { %v11317_v36 = vadd.f32 %v9452_v23, %v6868_v24  ;;  %v9415_v37 = vadd.f32 %v9414_v31, %v9413_v29  ;;  %v9455_v42 = vadd.f32 %v9454_v34, %v9453_v30  ;;  %9869 = vmatpush3.bf16.msra.mxu0 %v10858_v48  ;;  %9909 = vmatpush3.bf16.msra.mxu1 %v10859_v51  ;;  %v10877_v29 = vld [vmem:[#allocation5 + $0xea0] sm:$0xff]   ;;  %v10889_v51 = vld [vmem:[#allocation5 + $0xed0] sm:$0xff]  }
 0x24a   :  { %v9416_v44 = vpop.f32.mrf.mxu0  ;;  %v9456_v47 = vpop.f32.mrf.mxu1  ;;  %9870 = vmatprep.subr.bf16.mxu0 %v10860_v54  ;;  %9910 = vmatprep.subr.bf16.mxu1 %v10861_v53  ;;  %v10878_v24 = vld [vmem:[#allocation2 + $0x4e0] ss:$260 sps:$4 sm:$0xff]  }
 0x24b   :  { %v6871_v35 = vadd.f32 %v9415_v37, %v11296_v50  ;;  %7515 = vmatprep.mubr.bf16.mxu0 %v10866_v12  ;;  %7580 = vmatprep.mubr.bf16.mxu1 %v10869_v4  ;;  %v10883_v37 = vld [vmem:[#allocation2 + $0x4ec] ss:$260 sps:$4 sm:$0xff]   ;;  %v10897_v12 = vld [vmem:[#allocation2 + $0x6f4] ss:$260 sps:$4 sm:$0xff]  }
 0x24c   :  { %v9417_v52 = vpop.f32.mrf.mxu0  ;;  %v9457_v55 = vpop.f32.mrf.mxu1 }
 0x24d   :  { %v11320_v46 = vadd.f32 %v9455_v42, %v6871_v35  ;;  %v9418_v49 = vadd.f32 %v9417_v52, %v9416_v44  ;;  %v9458_v57 = vadd.f32 %v9457_v55, %v9456_v47  ;;  %9871 = vmatpush3.bf16.msra.mxu0 %v10862_v59  ;;  %9911 = vmatpush3.bf16.msra.mxu1 %v10863_v61  ;;  %v10888_v47 = vld [vmem:[#allocation5 + $0xe50] sm:$0xff]   ;;  %v10892_v59 = vld [vmem:[#allocation2 + $0x6e8] ss:$260 sps:$4 sm:$0xff]  }
 0x24e   :  { %v9419_v50 = vpop.f32.mrf.mxu0  ;;  %v9459_v60 = vpop.f32.mrf.mxu1  ;;  %9872 = vmatprep.subr.bf16.mxu0 %v10870_v6  ;;  %9912 = vmatprep.subr.bf16.mxu1 %v10871_v8  ;;  %v10890_v55 = vld [vmem:[#allocation5 + $0xe10] sm:$0xff]   ;;  %v10900_v6 = vld [vmem:[#allocation5 + $0xe08] sm:$0xff]  }
 0x24f   :  { %v6876_v56 = vadd.f32 %v9418_v49, %v11299_v9  ;;  %7516 = vmatmul.mubr.bf16.gmra.mxu0 %v10864_v2  ;;  %v10895_v2 = vld [vmem:[#allocation2 + $0x6f0] ss:$260 sps:$4 sm:$0xff]  }
 0x250   :  { %v9420_v63 = vpop.f32.mrf.mxu0  ;;  %v9460_v62 = vpop.f32.mrf.mxu1  ;;  %7581 = vmatmul.mubr.bf16.gmra.mxu1 %v10867_v3  ;;  %7523 = vmatprep.mubr.bf16.mxu0 %v10880_v32 }
 0x251   :  { %v11323_v0 = vadd.f32 %v9458_v57, %v6876_v56  ;;  %v9421_v58 = vadd.f32 %v9420_v63, %v9419_v50  ;;  %v9461_v9 = vadd.f32 %v9460_v62, %v9459_v60  ;;  %9873 = vmatpush3.bf16.msra.mxu0 %v10872_v22  ;;  %9913 = vmatpush3.bf16.msra.mxu1 %v10873_v15  ;;  %v10891_v56 = vld [vmem:[#allocation5 + $0xe90] sm:$0xff]   ;;  %v10901_v22 = vld [vmem:[#allocation5 + $0xe88] sm:$0xff]   ;;  %v10902_v15 = vld [vmem:[#allocation5 + $0xe40] sm:$0xff]  }
 0x252   :  { %v9422_v14 = vpop.f32.mrf.mxu0  ;;  %v9462_v11 = vpop.f32.mrf.mxu1  ;;  %9874 = vmatprep.subr.bf16.mxu0 %v10874_v16  ;;  %9914 = vmatprep.subr.bf16.mxu1 %v10875_v17  ;;  %v10894_v60 = vld [vmem:[#allocation2 + $0x6ec] ss:$260 sps:$4 sm:$0xff]   ;;  %v10903_v16 = vld [vmem:[#allocation5 + $0xec0] sm:$0xff]  }
 0x253   :  { %v6879_v7 = vadd.f32 %v9421_v58, %v11302_v21  ;;  %7588 = vmatprep.mubr.bf16.mxu1 %v10883_v37  ;;  %v10904_v17 = vld [vmem:[#allocation5 + $0xe00] sm:$0xff]   ;;  %v10913_v37 = vld [vmem:[#allocation5 + $0xff8] sm:$0xff]  }
 0x254   :  { %v9423_v13 = vpop.f32.mrf.mxu0  ;;  %v9463_v21 = vpop.f32.mrf.mxu1 }
 0x255   :  { %v11326_v5 = vadd.f32 %v9461_v9, %v6879_v7  ;;  %v9424_v18 = vadd.f32 %v9423_v13, %v9422_v14  ;;  %v9464_v20 = vadd.f32 %v9463_v21, %v9462_v11  ;;  %9875 = vmatpush3.bf16.msra.mxu0 %v10876_v19  ;;  %9915 = vmatpush3.bf16.msra.mxu1 %v10877_v29  ;;  %v10899_v7 = vld [vmem:[#allocation5 + $0xec8] sm:$0xff]   ;;  %v10905_v19 = vld [vmem:[#allocation5 + $0xe80] sm:$0xff]  }
 0x256   :  { %v9425_v26 = vpop.f32.mrf.mxu0  ;;  %v9465_v23 = vpop.f32.mrf.mxu1  ;;  %9876 = vmatprep.subr.bf16.mxu0 %v10884_v38  ;;  %v10906_v29 = vld [vmem:[#allocation2 + $0xe0] ss:$260 sps:$4 sm:$0xff]   ;;  %v10914_v38 = vld [vmem:[#allocation5 + $0xf38] sm:$0xff]  }
 0x257   :  { %v6884_v28 = vadd.f32 %v9424_v18, %v11305_v39  ;;  %7524 = vmatmul.mubr.bf16.gmra.mxu0 %v10878_v24  ;;  %v10885_v39 = vld [vmem:[#allocation5 + $0xed8] sm:$0xff]  }
 0x258   :  { %v9426_v25 = vpop.f32.mrf.mxu0  ;;  %v9466_v31 = vpop.f32.mrf.mxu1  ;;  %7589 = vmatmul.mubr.bf16.gmra.mxu1 %v10881_v33  ;;  %9916 = vmatprep.subr.bf16.mxu1 %v10885_v39  ;;  %v10912_v33 = vld [vmem:[#allocation5 + $0xf78] sm:$0xff]  }
 0x259   :  { %v11329_v30 = vadd.f32 %v9464_v20, %v6884_v28  ;;  %v9427_v27 = vadd.f32 %v9426_v25, %v9425_v26  ;;  %v9467_v41 = vadd.f32 %v9466_v31, %v9465_v23  ;;  %9877 = vmatpush3.bf16.msra.mxu0 %v10886_v40  ;;  %9917 = vmatpush3.bf16.msra.mxu1 %v10887_v43  ;;  %v10908_v25 = vld [vmem:[#allocation2 + $0xe4] ss:$260 sps:$4 sm:$0xff]   ;;  %v10911_v31 = vld [vmem:[#allocation2 + $0xec] ss:$260 sps:$4 sm:$0xff]  }
 0x25a   :  { %v9484_v42 = vpop.f32.mrf.mxu0  ;;  %v9524_v44 = vpop.f32.mrf.mxu1  ;;  %9878 = vmatprep.subr.bf16.mxu0 %v10888_v47  ;;  %9918 = vmatprep.subr.bf16.mxu1 %v10889_v51 }
 0x25b   :  { %v6887_v34 = vadd.f32 %v9427_v27, %v11308_v45  ;;  %7531 = vmatprep.mubr.bf16.mxu0 %v10894_v60  ;;  %7596 = vmatprep.mubr.bf16.mxu1 %v10897_v12  ;;  %v10909_v27 = vld [vmem:[#allocation2 + $0xe8] ss:$260 sps:$4 sm:$0xff]  }
 0x25c   :  { %v9485_v48 = vpop.f32.mrf.mxu0  ;;  %v9525_v45 = vpop.f32.mrf.mxu1  ;;  %v10926_v12 = vld [vmem:[#allocation5 + $0xf68] sm:$0xff]  }
 0x25d   :  { %v11332_v35 = vadd.f32 %v9467_v41, %v6887_v34  ;;  %v9486_v52 = vadd.f32 %v9485_v48, %v9484_v42  ;;  %v9526_v49 = vadd.f32 %v9525_v45, %v9524_v44  ;;  %9879 = vmatpush3.bf16.msra.mxu0 %v10890_v55  ;;  %9919 = vmatpush3.bf16.msra.mxu1 %v10891_v56  ;;  %v10915_v42 = vld [vmem:[#allocation5 + $0xfb8] sm:$0xff]   ;;  %v10916_v44 = vld [vmem:[#allocation5 + $0xf70] sm:$0xff]  }
 0x25e   :  { %v9487_v54 = vpop.f32.mrf.mxu0  ;;  %v9527_v53 = vpop.f32.mrf.mxu1  ;;  %9920 = vmatprep.subr.bf16.mxu1 %v10899_v7  ;;  %v10917_v48 = vld [vmem:[#allocation5 + $0xff0] sm:$0xff]   ;;  %v10929_v7 = vld [vmem:[#allocation5 + $0xfa8] sm:$0xff]  }
 0x25f   :  { %v6990_v50 = vadd.f32 %v9486_v52, %v11311_v1  ;;  %7532 = vmatmul.mubr.bf16.gmra.mxu0 %v10892_v59  ;;  %v10898_v1 = vld [vmem:[#allocation5 + $0xe48] sm:$0xff]   ;;  %v10918_v45 = vld [vmem:[#allocation5 + $0xf30] sm:$0xff]  }
 0x260   :  { %v9488_v57 = vpop.f32.mrf.mxu0  ;;  %v9528_v58 = vpop.f32.mrf.mxu1  ;;  %7597 = vmatmul.mubr.bf16.gmra.mxu1 %v10895_v2  ;;  %9880 = vmatprep.subr.bf16.mxu0 %v10898_v1  ;;  %v10922_v59 = vld [vmem:[#allocation2 + $0x2ec] ss:$260 sps:$4 sm:$0xff]  }
 0x261   :  { %v11335_v63 = vadd.f32 %v9526_v49, %v6990_v50  ;;  %v9489_v61 = vadd.f32 %v9488_v57, %v9487_v54  ;;  %v9529_v3 = vadd.f32 %v9528_v58, %v9527_v53  ;;  %9881 = vmatpush3.bf16.msra.mxu0 %v10900_v6  ;;  %9921 = vmatpush3.bf16.msra.mxu1 %v10901_v22  ;;  %v10919_v54 = vld [vmem:[#allocation5 + $0xfb0] sm:$0xff]   ;;  %v10920_v50 = vld [vmem:[#allocation2 + $0x2e8] ss:$260 sps:$4 sm:$0xff]  }
 0x262   :  { %v9490_v4 = vpop.f32.mrf.mxu0  ;;  %v9530_v8 = vpop.f32.mrf.mxu1  ;;  %9882 = vmatprep.subr.bf16.mxu0 %v10902_v15  ;;  %9922 = vmatprep.subr.bf16.mxu1 %v10903_v16  ;;  %v10925_v58 = vld [vmem:[#allocation2 + $0x2f4] ss:$260 sps:$4 sm:$0xff]   ;;  %v10928_v1 = vld [vmem:[#allocation5 + $0xf28] sm:$0xff]  }
 0x263   :  { %v6993_v62 = vadd.f32 %v9489_v61, %v11314_v10  ;;  %7637 = vmatprep.mubr.bf16.mxu0 %v10908_v25  ;;  %7702 = vmatprep.mubr.bf16.mxu1 %v10911_v31  ;;  %v10923_v61 = vld [vmem:[#allocation2 + $0x2f0] ss:$260 sps:$4 sm:$0xff]  }
 0x264   :  { %v9491_v14 = vpop.f32.mrf.mxu0  ;;  %v9531_v13 = vpop.f32.mrf.mxu1 }
 0x265   :  { %v11338_v9 = vadd.f32 %v9529_v3, %v6993_v62  ;;  %v9492_v11 = vadd.f32 %v9491_v14, %v9490_v4  ;;  %v9532_v21 = vadd.f32 %v9531_v13, %v9530_v8  ;;  %9883 = vmatpush3.bf16.msra.mxu0 %v10904_v17  ;;  %9923 = vmatpush3.bf16.msra.mxu1 %v10905_v19  ;;  %v10930_v8 = vld [vmem:[#allocation5 + $0xf60] sm:$0xff]   ;;  %v10934_v17 = vld [vmem:[#allocation2 + $0x4f0] ss:$260 sps:$4 sm:$0xff]  }
 0x266   :  { %v9493_v10 = vpop.f32.mrf.mxu0  ;;  %v9533_v20 = vpop.f32.mrf.mxu1  ;;  %9948 = vmatprep.subr.bf16.mxu0 %v10912_v33  ;;  %9988 = vmatprep.subr.bf16.mxu1 %v10913_v37  ;;  %v10932_v13 = vld [vmem:[#allocation5 + $0xf20] sm:$0xff]   ;;  %v10942_v33 = vld [vmem:[#allocation5 + $0xf18] sm:$0xff]  }
 0x267   :  { %v6998_v18 = vadd.f32 %v9492_v11, %v11317_v36 }
 0x268   :  { %v9494_v26 = vpop.f32.mrf.mxu0  ;;  %v9534_v24 = vpop.f32.mrf.mxu1  ;;  %7638 = vmatmul.mubr.bf16.vlgmr.msra.gmra.mxu0 %v10906_v29  ;;  %7703 = vmatmul.mubr.bf16.vlgmr.msra.gmra.mxu1 %v10909_v27  ;;  %v10937_v29 = vld [vmem:[#allocation2 + $0x4f8] ss:$260 sps:$4 sm:$0xff]  }
 0x269   :  { %v11341_v28 = vadd.f32 %v9532_v21, %v6998_v18  ;;  %v9495_v23 = vadd.f32 %v9494_v26, %v9493_v10  ;;  %v9535_v36 = vadd.f32 %v9534_v24, %v9533_v20  ;;  %9949 = vmatpush3.bf16.msra.mxu0 %v10914_v38  ;;  %9989 = vmatpush3.bf16.msra.mxu1 %v10915_v42  ;;  %v10933_v18 = vld [vmem:[#allocation5 + $0xfa0] sm:$0xff]   ;;  %v10936_v20 = vld [vmem:[#allocation2 + $0x4f4] ss:$260 sps:$4 sm:$0xff]  }
 0x26a   :  { %v9496_v41 = vpop.f32.mrf.mxu0  ;;  %v9536_v39 = vpop.f32.mrf.mxu1  ;;  %9950 = vmatprep.subr.bf16.mxu0 %v10916_v44  ;;  %9990 = vmatprep.subr.bf16.mxu1 %v10917_v48  ;;  %v10939_v24 = vld [vmem:[#allocation2 + $0x4fc] ss:$260 sps:$4 sm:$0xff]   ;;  %v10944_v42 = vld [vmem:[#allocation5 + $0xf50] sm:$0xff]  }
 0x26b   :  { %v7001_v32 = vadd.f32 %v9495_v23, %v11320_v46  ;;  %7645 = vmatprep.mubr.bf16.mxu0 %v10922_v59  ;;  %7710 = vmatprep.mubr.bf16.mxu1 %v10925_v58  ;;  %v10943_v38 = vld [vmem:[#allocation5 + $0xf98] sm:$0xff]   ;;  %v10946_v48 = vld [vmem:[#allocation5 + $0xf10] sm:$0xff]  }
 0x26c   :  { %v9497_v40 = vpop.f32.mrf.mxu0  ;;  %v9537_v46 = vpop.f32.mrf.mxu1 }
 0x26d   :  { %v11344_v34 = vadd.f32 %v9535_v36, %v7001_v32  ;;  %v9498_v43 = vadd.f32 %v9497_v40, %v9496_v41  ;;  %v9538_v47 = vadd.f32 %v9537_v46, %v9536_v39  ;;  %9951 = vmatpush3.bf16.msra.mxu0 %v10918_v45  ;;  %9991 = vmatpush3.bf16.msra.mxu1 %v10919_v54  ;;  %v10941_v32 = vld [vmem:[#allocation5 + $0xfd8] sm:$0xff]   ;;  %v10947_v45 = vld [vmem:[#allocation5 + $0xf90] sm:$0xff]  }
 0x26e   :  { %v9499_v52 = vpop.f32.mrf.mxu0  ;;  %v9539_v49 = vpop.f32.mrf.mxu1  ;;  %9952 = vmatprep.subr.bf16.mxu0 %v10926_v12  ;;  %v10948_v54 = vld [vmem:[#allocation2 + $0x6f8] ss:$260 sps:$4 sm:$0xff]   ;;  %v10956_v12 = vld [vmem:[#allocation5 + $0xf08] sm:$0xff]  }
 0x26f   :  { %v7006_v51 = vadd.f32 %v9498_v43, %v11323_v0  ;;  %v10927_v0 = vld [vmem:[#allocation5 + $0xfe8] sm:$0xff]  }
 0x270   :  { %v9500_v55 = vpop.f32.mrf.mxu0  ;;  %v9540_v57 = vpop.f32.mrf.mxu1  ;;  %7646 = vmatmul.mubr.bf16.gmra.mxu0 %v10920_v50  ;;  %7711 = vmatmul.mubr.bf16.gmra.mxu1 %v10923_v61  ;;  %v10955_v61 = vld [vmem:[#allocation5 + $0xfc8] sm:$0xff]  }
 0x271   :  { %v11347_v53 = vadd.f32 %v9538_v47, %v7006_v51  ;;  %v9501_v56 = vadd.f32 %v9500_v55, %v9499_v52  ;;  %v9541_v60 = vadd.f32 %v9540_v57, %v9539_v49  ;;  %9992 = vmatprep.subr.bf16.mxu1 %v10927_v0  ;;  %9953 = vmatpush3.bf16.msra.mxu0 %v10928_v1  ;;  %v10950_v55 = vld [vmem:[#allocation2 + $0x6fc] ss:$260 sps:$4 sm:$0xff]   ;;  %v10953_v57 = vld [vmem:[#allocation2 + $0x704] ss:$260 sps:$4 sm:$0xff]  }
 0x272   :  { %v9502_v3 = vpop.f32.mrf.mxu0  ;;  %v9542_v4 = vpop.f32.mrf.mxu1  ;;  %9993 = vmatpush3.bf16.msra.mxu1 %v10929_v7  ;;  %9954 = vmatprep.subr.bf16.mxu0 %v10930_v8 }
 0x273   :  { %v7009_v2 = vadd.f32 %v9501_v56, %v11326_v5  ;;  %v10931_v5 = vld [vmem:[#allocation5 + $0xfe0] sm:$0xff]   ;;  %7653 = vmatprep.mubr.bf16.mxu0 %v10936_v20  ;;  %7718 = vmatprep.mubr.bf16.mxu1 %v10939_v24 }
 0x274   :  { %v9503_v6 = vpop.f32.mrf.mxu0  ;;  %v9543_v22 = vpop.f32.mrf.mxu1  ;;  %9994 = vmatprep.subr.bf16.mxu1 %v10931_v5  ;;  %v10951_v56 = vld [vmem:[#allocation2 + $0x700] ss:$260 sps:$4 sm:$0xff]  }
 0x275   :  { %v11350_v62 = vadd.f32 %v9541_v60, %v7009_v2  ;;  %v9504_v14 = vadd.f32 %v9503_v6, %v9502_v3  ;;  %v9544_v11 = vadd.f32 %v9543_v22, %v9542_v4  ;;  %9955 = vmatpush3.bf16.msra.mxu0 %v10932_v13  ;;  %v10954_v60 = vld [vmem:[#allocation5 + $0xf48] sm:$0xff]   ;;  %v10958_v4 = vld [vmem:[#allocation5 + $0xf40] sm:$0xff]  }
 0x276   :  { %v9505_v15 = vpop.f32.mrf.mxu0  ;;  %v9545_v16 = vpop.f32.mrf.mxu1  ;;  %9995 = vmatpush3.bf16.msra.mxu1 %v10933_v18  ;;  %v10957_v3 = vld [vmem:[#allocation5 + $0xf88] sm:$0xff]   ;;  %v10959_v6 = vld [vmem:[#allocation5 + $0xfc0] sm:$0xff]  }
 0x277   :  { %v7014_v10 = vadd.f32 %v9504_v14, %v11329_v30  ;;  %v10940_v30 = vld [vmem:[#allocation5 + $0xf58] sm:$0xff]   ;;  %9996 = vmatprep.subr.bf16.mxu1 %v10941_v32  ;;  %v10960_v22 = vld [vmem:[#allocation5 + $0xf00] sm:$0xff]  }
 0x278   :  { %v9506_v21 = vpop.f32.mrf.mxu0  ;;  %v9546_v23 = vpop.f32.mrf.mxu1  ;;  %7654 = vmatmul.mubr.bf16.gmra.mxu0 %v10934_v17  ;;  %7719 = vmatmul.mubr.bf16.gmra.mxu1 %v10937_v29  ;;  %v10964_v17 = vld [vmem:[#allocation2 + $0xf4] ss:$260 sps:$4 sm:$0xff]  }
 0x279   :  { %v11353_v26 = vadd.f32 %v9544_v11, %v7014_v10  ;;  %v9507_v19 = vadd.f32 %v9506_v21, %v9505_v15  ;;  %v9547_v25 = vadd.f32 %v9546_v23, %v9545_v16  ;;  %9956 = vmatprep.subr.bf16.mxu0 %v10940_v30  ;;  %7661 = vmatprep.mubr.bf16.mxu0 %v10950_v55  ;;  %v10961_v15 = vld [vmem:[#allocation5 + $0xf80] sm:$0xff]   ;;  %v10962_v10 = vld [vmem:[#allocation2 + $0xf0] ss:$260 sps:$4 sm:$0xff]   ;;  %v10970_v32 = vld [vmem:[#allocation2 + $0x2f8] ss:$260 sps:$4 sm:$0xff]  }
 0x27a   :  { %v9564_v31 = vpop.f32.mrf.mxu0  ;;  %v9604_v37 = vpop.f32.mrf.mxu1  ;;  %9957 = vmatpush3.bf16.msra.mxu0 %v10942_v33  ;;  %9997 = vmatpush3.bf16.msra.mxu1 %v10943_v38  ;;  %v10967_v23 = vld [vmem:[#allocation2 + $0xfc] ss:$260 sps:$4 sm:$0xff]   ;;  %v10976_v38 = vld [vmem:[#allocation5 + $0x1028] sm:$0xff]  }
 0x27b   :  { %v7017_v27 = vadd.f32 %v9507_v19, %v11332_v35  ;;  %v10945_v35 = vld [vmem:[#allocation5 + $0xfd0] sm:$0xff]   ;;  %9958 = vmatprep.subr.bf16.mxu0 %v10944_v42  ;;  %7726 = vmatprep.mubr.bf16.mxu1 %v10953_v57  ;;  %v10965_v19 = vld [vmem:[#allocation2 + $0xf8] ss:$260 sps:$4 sm:$0xff]   ;;  %v10978_v57 = vld [vmem:[#allocation2 + $0x500] ss:$260 sps:$4 sm:$0xff]  }
 0x27c   :  { %v9565_v41 = vpop.f32.mrf.mxu0  ;;  %v9605_v40 = vpop.f32.mrf.mxu1  ;;  %9998 = vmatprep.subr.bf16.mxu1 %v10945_v35  ;;  %v10972_v30 = vld [vmem:[#allocation2 + $0x2fc] ss:$260 sps:$4 sm:$0xff]  }
 0x27d   :  { %v11356_v36 = vadd.f32 %v9547_v25, %v7017_v27  ;;  %v9566_v39 = vadd.f32 %v9565_v41, %v9564_v31  ;;  %v9606_v46 = vadd.f32 %v9605_v40, %v9604_v37  ;;  %v10968_v25 = vld [vmem:[#allocation5 + $0x1038] sm:$0xff]   ;;  %v10975_v37 = vld [vmem:[#allocation2 + $0x304] ss:$260 sps:$4 sm:$0xff]  }
 0x27e   :  { %v9567_v44 = vpop.f32.mrf.mxu0  ;;  %v9607_v47 = vpop.f32.mrf.mxu1  ;;  %9959 = vmatpush3.bf16.msra.mxu0 %v10946_v48  ;;  %9999 = vmatpush3.bf16.msra.mxu1 %v10947_v45  ;;  %v10973_v40 = vld [vmem:[#allocation2 + $0x300] ss:$260 sps:$4 sm:$0xff]  }
 0x27f   :  { %v7120_v43 = vadd.f32 %v9566_v39, %v11335_v63  ;;  %9960 = vmatprep.subr.bf16.mxu0 %v10954_v60  ;;  %10000 = vmatprep.subr.bf16.mxu1 %v10955_v61  ;;  %v10977_v48 = vld [vmem:[#allocation5 + $0x1020] sm:$0xff]   ;;  %v10988_v61 = vld [vmem:[#allocation2 + $0x70c] ss:$260 sps:$4 sm:$0xff]  }
 0x280   :  { %v9568_v52 = vpop.f32.mrf.mxu0  ;;  %v9608_v50 = vpop.f32.mrf.mxu1  ;;  %7662 = vmatmul.mubr.bf16.gmra.mxu0 %v10948_v54  ;;  %7727 = vmatmul.mubr.bf16.gmra.mxu1 %v10951_v56 }
 0x281   :  { %v11359_v51 = vadd.f32 %v9606_v46, %v7120_v43  ;;  %v9569_v49 = vadd.f32 %v9568_v52, %v9567_v44  ;;  %v9609_v63 = vadd.f32 %v9608_v50, %v9607_v47  ;;  %7767 = vmatprep.mubr.bf16.mxu0 %v10964_v17  ;;  %7832 = vmatprep.mubr.bf16.mxu1 %v10967_v23  ;;  %v10980_v43 = vld [vmem:[#allocation2 + $0x504] ss:$260 sps:$4 sm:$0xff]   ;;  %v10983_v47 = vld [vmem:[#allocation2 + $0x50c] ss:$260 sps:$4 sm:$0xff]   ;;  %v10984_v50 = vld [vmem:[#allocation5 + $0x1018] sm:$0xff]  }
 0x282   :  { %v9570_v2 = vpop.f32.mrf.mxu0  ;;  %v9610_v0 = vpop.f32.mrf.mxu1  ;;  %9961 = vmatpush3.bf16.msra.mxu0 %v10956_v12  ;;  %10001 = vmatpush3.bf16.msra.mxu1 %v10957_v3  ;;  %v10991_v12 = vld [vmem:[#allocation2 + $0x714] ss:$260 sps:$4 sm:$0xff]  }
 0x283   :  { %v7123_v59 = vadd.f32 %v9569_v49, %v11338_v9  ;;  %9962 = vmatprep.subr.bf16.mxu0 %v10958_v4  ;;  %10002 = vmatprep.subr.bf16.mxu1 %v10959_v6 }
 0x284   :  { %v9571_v1 = vpop.f32.mrf.mxu0  ;;  %v9611_v9 = vpop.f32.mrf.mxu1 }
 0x285   :  { %v11362_v58 = vadd.f32 %v9609_v63, %v7123_v59  ;;  %v9572_v7 = vadd.f32 %v9571_v1, %v9570_v2  ;;  %v9612_v8 = vadd.f32 %v9611_v9, %v9610_v0  ;;  %v10981_v59 = vld [vmem:[#allocation2 + $0x508] ss:$260 sps:$4 sm:$0xff]  }
 0x286   :  { %v9573_v14 = vpop.f32.mrf.mxu0  ;;  %v9613_v11 = vpop.f32.mrf.mxu1  ;;  %9963 = vmatpush3.bf16.msra.mxu0 %v10960_v22  ;;  %10003 = vmatpush3.bf16.msra.mxu1 %v10961_v15  ;;  %v10992_v22 = vld [vmem:[#allocation5 + $0x1008] sm:$0xff]   ;;  %v10989_v15 = vld [vmem:[#allocation2 + $0x710] ss:$260 sps:$4 sm:$0xff]  }
 0x287   :  { %v7128_v5 = vadd.f32 %v9572_v7, %v11341_v28  ;;  %v10969_v28 = vld [vmem:[#allocation5 + $0x1030] sm:$0xff]   ;;  %10040 = vmatprep.subr.bf16.mxu0 %v10968_v25  ;;  %10064 = vmatprep.subr.bf16.mxu1 %v10968_v25 }
 0x288   :  { %v9574_v13 = vpop.f32.mrf.mxu0  ;;  %v9614_v21 = vpop.f32.mrf.mxu1 }
 0x289   :  { %v11365_v16 = vadd.f32 %v9612_v8, %v7128_v5  ;;  %v9575_v18 = vadd.f32 %v9574_v13, %v9573_v14  ;;  %v9615_v20 = vadd.f32 %v9614_v21, %v9613_v11  ;;  %7768 = vmatmul.mubr.bf16.vlgmr.msra.gmra.mxu0 %v10962_v10  ;;  %7833 = vmatmul.mubr.bf16.vlgmr.msra.gmra.mxu1 %v10965_v19  ;;  %v10994_v13 = vld [vmem:[#allocation2 + $0x100] ss:$260 sps:$4 sm:$0xff]   ;;  %v10995_v21 = vld [vmem:[#allocation2 + $0x510] ss:$260 sps:$4 sm:$0xff]  }
 0x28a   :  { %v9616_v31 = vpop.f32.mrf.mxu1  ;;  %10041 = vmatpush3.bf16.msra.mxu0 %v10968_v25  ;;  %10072 = vmatpush3.bf16.msra.mxu1 %v10968_v25 }
 0x28b   :  { %v7131_v29 = vadd.f32 %v9575_v18, %v11344_v34  ;;  %10042 = vmatprep.subr.bf16.mxu0 %v10969_v28  ;;  %10065 = vmatprep.subr.bf16.mxu1 %v10969_v28 }
 0x28c   :  { %v9617_v41 = vpop.f32.mrf.mxu1  ;;  %7775 = vmatprep.mubr.bf16.mxu0 %v10972_v30  ;;  %7840 = vmatprep.mubr.bf16.mxu1 %v10975_v37  ;;  %v10996_v37 = vld [vmem:[#allocation2 + $0x308] ss:$260 sps:$4 sm:$0xff]  }
 0x28d   :  { %v11368_v24 = vadd.f32 %v9615_v20, %v7131_v29  ;;  %v9618_v39 = vadd.f32 %v9617_v41, %v9616_v31  ;;  %v10993_v20 = vld [vmem:[#allocation5 + $0x1000] sm:$0xff]   ;;  %v10997_v41 = vld [vmem:[#allocation2 + $0x718] ss:$260 sps:$4 sm:$0xff]  }
 0x28e   :  { %v9619_v35 = vpop.f32.mrf.mxu1  ;;  %10043 = vmatpush3.bf16.msra.mxu0 %v10969_v28  ;;  %10073 = vmatpush3.bf16.msra.mxu1 %v10969_v28 }
 0x28f   :  { %10044 = vmatprep.subr.bf16.mxu0 %v10976_v38  ;;  %10066 = vmatprep.subr.bf16.mxu1 %v10976_v38 }
 0x290   :  { %v9620_v49 = vpop.f32.mrf.mxu1 }
 0x291   :  { %7776 = vmatmul.mubr.bf16.gmra.mxu0 %v10970_v32  ;;  %v9621_v54 = vadd.f32 %v9620_v49, %v9619_v35  ;;  %7841 = vmatmul.mubr.bf16.gmra.mxu1 %v10973_v40 }
 0x292   :  { %7783 = vmatprep.mubr.bf16.mxu0 %v10980_v43  ;;  %10045 = vmatpush3.bf16.msra.mxu0 %v10976_v38 }
 0x293   :  { %7848 = vmatprep.mubr.bf16.mxu1 %v10983_v47  ;;  %10074 = vmatpush3.bf16.msra.mxu1 %v10976_v38 }
 0x294   :  { %10046 = vmatprep.subr.bf16.mxu0 %v10977_v48  ;;  %10067 = vmatprep.subr.bf16.mxu1 %v10977_v48 }
 0x296   :  { %10047 = vmatpush3.bf16.msra.mxu0 %v10977_v48 }
 0x297   :  { %10075 = vmatpush3.bf16.msra.mxu1 %v10977_v48  ;;  %10048 = vmatprep.subr.bf16.mxu0 %v10984_v50 }
 0x298   :  { %10068 = vmatprep.subr.bf16.mxu1 %v10984_v50 }
 0x299   :  { %7784 = vmatmul.mubr.bf16.gmra.mxu0 %v10978_v57  ;;  %7849 = vmatmul.mubr.bf16.gmra.mxu1 %v10981_v59 }
 0x29a   :  { %7791 = vmatprep.mubr.bf16.mxu0 %v10988_v61  ;;  %10049 = vmatpush3.bf16.msra.mxu0 %v10984_v50 }
 0x29b   :  { %7856 = vmatprep.mubr.bf16.mxu1 %v10991_v12  ;;  %10076 = vmatpush3.bf16.msra.mxu1 %v10984_v50 }
 0x29c   :  { %v9576_v27 = vpop.f32.mrf.mxu0 }
 0x29e   :  { %v9577_v33 = vpop.f32.mrf.mxu0 }
 0x29f   :  { %v9578_v34 = vadd.f32 %v9577_v33, %v9576_v27 }
 0x2a0   :  { %v9579_v42 = vpop.f32.mrf.mxu0 }
 0x2a1   :  { %v7136_v44 = vadd.f32 %v9578_v34, %v11347_v53  ;;  %7857 = vmatmul.mubr.bf16.gmra.mxu1 %v10989_v15 }
 0x2a2   :  { %v9580_v46 = vpop.f32.mrf.mxu0  ;;  %10060 = vmatprep.mubr.bf16.mxu1 %v10995_v21 }
 0x2a3   :  { %v11371_v52 = vadd.f32 %v9618_v39, %v7136_v44  ;;  %v9581_v45 = vadd.f32 %v9580_v46, %v9579_v42  ;;  %v9622_v63 = vpop.f32.mrf.mxu1 }
 0x2a4   :  { %v9582_v53 = vpop.f32.mrf.mxu0 }
 0x2a5   :  { %v7139_v55 = vadd.f32 %v9581_v45, %v11350_v62  ;;  %v9623_v0 = vpop.f32.mrf.mxu1  ;;  %v10985_v62 = vld [vmem:[#allocation5 + $0x1010] sm:$0xff]  }
 0x2a6   :  { %v9583_v60 = vpop.f32.mrf.mxu0  ;;  %v9624_v4 = vadd.f32 %v9623_v0, %v9622_v63  ;;  %10050 = vmatprep.subr.bf16.mxu0 %v10985_v62  ;;  %10069 = vmatprep.subr.bf16.mxu1 %v10985_v62 }
 0x2a7   :  { %v11374_v56 = vadd.f32 %v9621_v54, %v7139_v55  ;;  %v9584_v2 = vadd.f32 %v9583_v60, %v9582_v53  ;;  %v9625_v7 = vpop.f32.mrf.mxu1  ;;  %10051 = vmatpush3.bf16.msra.mxu0 %v10985_v62  ;;  %10077 = vmatpush3.bf16.msra.mxu1 %v10985_v62 }
 0x2a8   :  { %v9585_v3 = vpop.f32.mrf.mxu0  ;;  %10052 = vmatprep.subr.bf16.mxu0 %v10992_v22  ;;  %10070 = vmatprep.subr.bf16.mxu1 %v10992_v22 }
 0x2a9   :  { %v7144_v1 = vadd.f32 %v9584_v2, %v11353_v26  ;;  %v9626_v14 = vpop.f32.mrf.mxu1  ;;  %v10986_v26 = vld [vmem:[#allocation2 + $0x708] ss:$260 sps:$4 sm:$0xff]  }
 0x2aa   :  { %v9586_v9 = vpop.f32.mrf.mxu0  ;;  %v9627_v11 = vadd.f32 %v9626_v14, %v9625_v7  ;;  %7792 = vmatmul.mubr.bf16.gmra.mxu0 %v10986_v26 }
 0x2ab   :  { %v11377_v6 = vadd.f32 %v9624_v4, %v7144_v1  ;;  %v9587_v8 = vadd.f32 %v9586_v9, %v9585_v3  ;;  %10056 = vmatprep.mubr.bf16.mxu0 %v10994_v13  ;;  %10053 = vmatpush3.bf16.msra.mxu0 %v10992_v22 }
 0x2ac   :  { %10078 = vmatpush3.bf16.msra.mxu1 %v10992_v22  ;;  %10054 = vmatprep.subr.bf16.mxu0 %v10993_v20 }
 0x2ad   :  { %v7147_v5 = vadd.f32 %v9587_v8, %v11356_v36  ;;  %10071 = vmatprep.subr.bf16.mxu1 %v10993_v20 }
 0x2af   :  { %v11380_v10 = vadd.f32 %v9627_v11, %v7147_v5  ;;  %10055 = vmatpush3.bf16.msra.mxu0 %v10993_v20 }
 0x2b0   :  { %10079 = vmatpush3.bf16.msra.mxu1 %v10993_v20 }
 0x2b2   :  { %10057 = vmatmul.mubr.bf16.vlgmr.msra.gmra.mxu0 %v10996_v37 }
 0x2b3   :  { %10061 = vmatmul.mubr.bf16.vlgmr.msra.gmra.mxu1 %v10997_v41 }
 0x2ba   :  { %v9684_v17 = vpop.f32.mrf.mxu1 }
 0x2bc   :  { %v9644_v18 = vpop.f32.mrf.mxu0  ;;  %v9685_v29 = vpop.f32.mrf.mxu1 }
 0x2bd   :  { %v9686_v36 = vadd.f32 %v9685_v29, %v9684_v17 }
 0x2be   :  { %v9645_v19 = vpop.f32.mrf.mxu0  ;;  %v9687_v27 = vpop.f32.mrf.mxu1 }
 0x2bf   :  { %v9646_v23 = vadd.f32 %v9645_v19, %v9644_v18 }
 0x2c0   :  { %v9647_v25 = vpop.f32.mrf.mxu0  ;;  %v9688_v33 = vpop.f32.mrf.mxu1 }
 0x2c1   :  { %v7250_v28 = vadd.f32 %v9646_v23, %v11359_v51  ;;  %v9689_v34 = vadd.f32 %v9688_v33, %v9687_v27 }
 0x2c2   :  { %v9648_v30 = vpop.f32.mrf.mxu0  ;;  %v9690_v51 = vpop.f32.mrf.mxu1 }
 0x2c3   :  { %v11383_v31 = vadd.f32 %v9686_v36, %v7250_v28  ;;  %v9649_v32 = vadd.f32 %v9648_v30, %v9647_v25 }
 0x2c4   :  { %v9650_v42 = vpop.f32.mrf.mxu0  ;;  %v9691_v35 = vpop.f32.mrf.mxu1 }
 0x2c5   :  { %v7253_v38 = vadd.f32 %v9649_v32, %v11362_v58  ;;  %v9692_v43 = vadd.f32 %v9691_v35, %v9690_v51 }
 0x2c6   :  { %v9651_v40 = vpop.f32.mrf.mxu0  ;;  %v9693_v47 = vpop.f32.mrf.mxu1 }
 0x2c7   :  { %v11386_v39 = vadd.f32 %v9689_v34, %v7253_v38  ;;  %v9652_v44 = vadd.f32 %v9651_v40, %v9650_v42 }
 0x2c8   :  { %v9653_v46 = vpop.f32.mrf.mxu0  ;;  %v9694_v55 = vpop.f32.mrf.mxu1 }
 0x2c9   :  { %v7258_v48 = vadd.f32 %v9652_v44, %v11365_v16  ;;  %v9695_v58 = vadd.f32 %v9694_v55, %v9693_v47 }
 0x2ca   :  { %v9654_v45 = vpop.f32.mrf.mxu0  ;;  %v9696_v59 = vpop.f32.mrf.mxu1 }
 0x2cb   :  { %v7323_v49 = vadd.f32 %v9692_v43, %v7258_v48  ;;  %v9655_v54 = vadd.f32 %v9654_v45, %v9653_v46 }
 0x2cc   :  { %v9656_v50 = vpop.f32.mrf.mxu0  ;;  %v9697_v61 = vpop.f32.mrf.mxu1 }
 0x2cd   :  { %v7261_v53 = vadd.f32 %v9655_v54, %v11368_v24  ;;  %v9698_v0 = vadd.f32 %v9697_v61, %v9696_v59 }
 0x2ce   :  { %v9657_v63 = vpop.f32.mrf.mxu0  ;;  %v9699_v3 = vpop.f32.mrf.mxu1 }
 0x2cf   :  { %v7326_v57 = vadd.f32 %v9695_v58, %v7261_v53  ;;  %v9658_v60 = vadd.f32 %v9657_v63, %v9656_v50 }
 0x2d0   :  { %v9659_v2 = vpop.f32.mrf.mxu0  ;;  %v9700_v4 = vpop.f32.mrf.mxu1 }
 0x2d1   :  { %v7266_v12 = vadd.f32 %v9658_v60, %v11371_v52  ;;  %v9701_v9 = vadd.f32 %v9700_v4, %v9699_v3 }
 0x2d2   :  { %v9660_v16 = vpop.f32.mrf.mxu0  ;;  %v9702_v14 = vpop.f32.mrf.mxu1 }
 0x2d3   :  { %v7331_v62 = vadd.f32 %v9698_v0, %v7266_v12  ;;  %v9661_v1 = vadd.f32 %v9660_v16, %v9659_v2 }
 0x2d4   :  { %v9662_v24 = vpop.f32.mrf.mxu0  ;;  %v9703_v11 = vpop.f32.mrf.mxu1 }
 0x2d5   :  { %v7269_v7 = vadd.f32 %v9661_v1, %v11374_v56  ;;  %v9704_v26 = vadd.f32 %v9703_v11, %v9702_v14 }
 0x2d6   :  { %v9663_v22 = vpop.f32.mrf.mxu0  ;;  %v9705_v13 = vpop.f32.mrf.mxu1 }
 0x2d7   :  { %v11392_v8 = vadd.f32 %v9701_v9, %v7269_v7  ;;  %v9664_v5 = vadd.f32 %v9663_v22, %v9662_v24 }
 0x2d8   :  { %v9665_v15 = vpop.f32.mrf.mxu0  ;;  %v9706_v20 = vpop.f32.mrf.mxu1 }
 0x2d9   :  { %v7274_v52 = vadd.f32 %v9664_v5, %v11377_v6  ;;  %v9707_v19 = vadd.f32 %v9706_v20, %v9705_v13 }
 0x2da   :  { %v9666_v18 = vpop.f32.mrf.mxu0 }
 0x2db   :  { %v7339_v21 = vadd.f32 %v9704_v26, %v7274_v52  ;;  %v9667_v17 = vadd.f32 %v9666_v18, %v9665_v15 }
 0x2dc   :  { %v9724_v29 = vpop.f32.mrf.mxu0  ;;  %v9764_v36 = vpop.f32.mrf.mxu1 }
 0x2dd   :  { %v7277_v56 = vadd.f32 %v9667_v17, %v11380_v10 }
 0x2de   :  { %v9725_v25 = vpop.f32.mrf.mxu0  ;;  %v9765_v27 = vpop.f32.mrf.mxu1 }
 0x2df   :  { %v11396_v23 = vadd.f32 %v9707_v19, %v7277_v56  ;;  %v9726_v28 = vadd.f32 %v9725_v25, %v9724_v29  ;;  %v9766_v30 = vadd.f32 %v9765_v27, %v9764_v36 }
 0x2e0   :  { %v9727_v32 = vpop.f32.mrf.mxu0  ;;  %v9767_v6 = vpop.f32.mrf.mxu1 }
 0x2e1   :  { %v7380_v33 = vadd.f32 %v9726_v28, %v11383_v31 }
 0x2e2   :  { %v9728_v37 = vpop.f32.mrf.mxu0  ;;  %v9768_v38 = vpop.f32.mrf.mxu1 }
 0x2e3   :  { %v7445_v34 = vadd.f32 %v9766_v30, %v7380_v33  ;;  %v9729_v41 = vadd.f32 %v9728_v37, %v9727_v32  ;;  %v9769_v42 = vadd.f32 %v9768_v38, %v9767_v6 }
 0x2e4   :  { %v9730_v10 = vpop.f32.mrf.mxu0  ;;  %v9770_v44 = vpop.f32.mrf.mxu1 }
 0x2e5   :  { %v7383_v51 = vadd.f32 %v9729_v41, %v11386_v39 }
 0x2e6   :  { %v9731_v35 = vpop.f32.mrf.mxu0  ;;  %v9771_v46 = vpop.f32.mrf.mxu1 }
 0x2e7   :  { %v7448_v40 = vadd.f32 %v9769_v42, %v7383_v51  ;;  %v9732_v43 = vadd.f32 %v9731_v35, %v9730_v10  ;;  %v9772_v45 = vadd.f32 %v9771_v46, %v9770_v44 }
 0x2e8   :  { %v9733_v48 = vpop.f32.mrf.mxu0  ;;  %v9773_v54 = vpop.f32.mrf.mxu1 }
 0x2e9   :  { %v7388_v47 = vadd.f32 %v9732_v43, %v7323_v49 }
 0x2ea   :  { %v9734_v55 = vpop.f32.mrf.mxu0  ;;  %v9774_v53 = vpop.f32.mrf.mxu1 }
 0x2eb   :  { %v7453_v31 = vadd.f32 %v9772_v45, %v7388_v47  ;;  %v9735_v58 = vadd.f32 %v9734_v55, %v9733_v48  ;;  %v9775_v59 = vadd.f32 %v9774_v53, %v9773_v54 }
 0x2ec   :  { %v9736_v60 = vpop.f32.mrf.mxu0 }
 0x2ed   :  { %v7391_v50 = vadd.f32 %v9735_v58, %v7326_v57  ;;  %v9776_v39 = vpop.f32.mrf.mxu1 }
 0x2ee   :  { %v9737_v61 = vpop.f32.mrf.mxu0 }
 0x2ef   :  { %v11400_v63 = vadd.f32 %v9775_v59, %v7391_v50  ;;  %v9738_v2 = vadd.f32 %v9737_v61, %v9736_v60  ;;  %v9777_v12 = vpop.f32.mrf.mxu1 }
 0x2f0   :  { %v9778_v0 = vadd.f32 %v9777_v12, %v9776_v39  ;;  %v9739_v3 = vpop.f32.mrf.mxu0 }
 0x2f1   :  { %v7396_v16 = vadd.f32 %v9738_v2, %v7331_v62  ;;  %v9779_v1 = vpop.f32.mrf.mxu1 }
 0x2f2   :  { %v9740_v49 = vpop.f32.mrf.mxu0 }
 0x2f3   :  { %v7461_v4 = vadd.f32 %v9778_v0, %v7396_v16  ;;  %v9741_v7 = vadd.f32 %v9740_v49, %v9739_v3  ;;  %v9780_v9 = vpop.f32.mrf.mxu1 }
 0x2f4   :  { %v9781_v24 = vadd.f32 %v9780_v9, %v9779_v1 }
 0x2f5   :  { %v7399_v14 = vadd.f32 %v9741_v7, %v11392_v8 }
 0x2f6   :  { %v9742_v22 = vpop.f32.mrf.mxu0  ;;  %v9782_v5 = vpop.f32.mrf.mxu1 }
 0x2f7   :  { %v11403_v57 = vadd.f32 %v9781_v24, %v7399_v14 }
 0x2f8   :  { %v9743_v11 = vpop.f32.mrf.mxu0  ;;  %v9783_v15 = vpop.f32.mrf.mxu1 }
 0x2f9   :  { %v9744_v26 = vadd.f32 %v9743_v11, %v9742_v22  ;;  %v9784_v52 = vadd.f32 %v9783_v15, %v9782_v5 }
 0x2fa   :  { %v9745_v13 = vpop.f32.mrf.mxu0  ;;  %v9785_v17 = vpop.f32.mrf.mxu1 }
 0x2fb   :  { %v7404_v18 = vadd.f32 %v9744_v26, %v7339_v21 }
 0x2fc   :  { %v9746_v62 = vpop.f32.mrf.mxu0  ;;  %v9786_v56 = vpop.f32.mrf.mxu1 }
 0x2fd   :  { %v11405_v20 = vadd.f32 %v9784_v52, %v7404_v18  ;;  %v9747_v19 = vadd.f32 %v9746_v62, %v9745_v13  ;;  %v9787_v29 = vadd.f32 %v9786_v56, %v9785_v17 }
 0x2ff   :  { %v7407_v36 = vadd.f32 %v9747_v19, %v11396_v23 }
 0x301   :  { %v11408_v25 = vadd.f32 %v9787_v29, %v7407_v36 }
 0x307   :  { %v9804_v8 = vpop.f32.mrf.mxu0 }
 0x308   :  { %v9844_v28 = vpop.f32.mrf.mxu1 }
 0x309   :  { %v9805_v27 = vpop.f32.mrf.mxu0 }
 0x30a   :  { %v9806_v30 = vadd.f32 %v9805_v27, %v9804_v8  ;;  %v9845_v32 = vpop.f32.mrf.mxu1 }
 0x30b   :  { %v9807_v33 = vpop.f32.mrf.mxu0  ;;  %v9846_v37 = vadd.f32 %v9845_v32, %v9844_v28 }
 0x30c   :  { %v7510_v6 = vadd.f32 %v9806_v30, %v7445_v34  ;;  %v9847_v21 = vpop.f32.mrf.mxu1 }
 0x30d   :  { %v9808_v41 = vpop.f32.mrf.mxu0 }
 0x30e   :  { %v11410_v38 = vadd.f32 %v9846_v37, %v7510_v6  ;;  %v9809_v42 = vadd.f32 %v9808_v41, %v9807_v33  ;;  %v9848_v51 = vpop.f32.mrf.mxu1 }
 0x30f   :  { %v9849_v44 = vadd.f32 %v9848_v51, %v9847_v21  ;;  %v9810_v23 = vpop.f32.mrf.mxu0 }
 0x310   :  { %v7513_v10 = vadd.f32 %v9809_v42, %v7448_v40  ;;  %v9850_v43 = vpop.f32.mrf.mxu1 }
 0x311   :  { %v9811_v46 = vpop.f32.mrf.mxu0 }
 0x312   :  { %v11412_v35 = vadd.f32 %v9849_v44, %v7513_v10  ;;  %v9812_v48 = vadd.f32 %v9811_v46, %v9810_v23  ;;  %v9851_v47 = vpop.f32.mrf.mxu1 }
 0x313   :  { %v9852_v45 = vadd.f32 %v9851_v47, %v9850_v43  ;;  %v9813_v54 = vpop.f32.mrf.mxu0 }
 0x314   :  { %v7518_v55 = vadd.f32 %v9812_v48, %v7453_v31  ;;  %v9853_v34 = vpop.f32.mrf.mxu1 }
 0x315   :  { %v9814_v58 = vpop.f32.mrf.mxu0 }
 0x316   :  { %v11414_v53 = vadd.f32 %v9852_v45, %v7518_v55  ;;  %v9815_v50 = vadd.f32 %v9814_v58, %v9813_v54  ;;  %v9854_v59 = vpop.f32.mrf.mxu1 }
 0x317   :  { %v9855_v60 = vadd.f32 %v9854_v59, %v9853_v34  ;;  %v9816_v61 = vpop.f32.mrf.mxu0 }
 0x318   :  { %v7521_v40 = vadd.f32 %v9815_v50, %v11400_v63  ;;  %v9856_v2 = vpop.f32.mrf.mxu1 }
 0x319   :  { %v9817_v12 = vpop.f32.mrf.mxu0 }
 0x31a   :  { %v11417_v39 = vadd.f32 %v9855_v60, %v7521_v40  ;;  %v9818_v0 = vadd.f32 %v9817_v12, %v9816_v61  ;;  %v9857_v3 = vpop.f32.mrf.mxu1 }
 0x31b   :  { %v9858_v16 = vadd.f32 %v9857_v3, %v9856_v2  ;;  %v9819_v1 = vpop.f32.mrf.mxu0 }
 0x31c   :  { %v7526_v49 = vadd.f32 %v9818_v0, %v7461_v4  ;;  %v9859_v31 = vpop.f32.mrf.mxu1 }
 0x31d   :  { %v9820_v7 = vpop.f32.mrf.mxu0 }
 0x31e   :  { %v11419_v9 = vadd.f32 %v9858_v16, %v7526_v49  ;;  %v9821_v24 = vadd.f32 %v9820_v7, %v9819_v1  ;;  %v9860_v14 = vpop.f32.mrf.mxu1 }
 0x31f   :  { %v9861_v22 = vadd.f32 %v9860_v14, %v9859_v31  ;;  %v9822_v63 = vpop.f32.mrf.mxu0 }
 0x320   :  { %v7529_v5 = vadd.f32 %v9821_v24, %v11403_v57  ;;  %v9862_v26 = vpop.f32.mrf.mxu1 }
 0x321   :  { %v9823_v15 = vpop.f32.mrf.mxu0 }
 0x322   :  { %v11422_v11 = vadd.f32 %v9861_v22, %v7529_v5  ;;  %v9863_v52 = vpop.f32.mrf.mxu1  ;;  %v9824_v14 = vadd.f32 %v9823_v15, %v9822_v63 }
 0x323   :  { %v9825_v13 = vpop.f32.mrf.mxu0 }
 0x324   :  { %11535 = vst [vmem:[#allocation12_spill] sm:$0xff] %v11422_v11  ;;  %v11424_v18 = vpop.f32.mrf.mxu1 }
 0x325   :  { %v9826_v17 = vpop.f32.mrf.mxu0 }
 0x326   :  { %v11426_v4 = vpop.f32.mrf.mxu1 }
 0x328   :  { %v9884_v62 = vpop.f32.mrf.mxu0  ;;  %v11428_v19 = vpop.f32.mrf.mxu1 }
 0x32a   :  { %v9885_v56 = vpop.f32.mrf.mxu0  ;;  %v11430_v29 = vpop.f32.mrf.mxu1 }
 0x32c   :  { %v11432_v36 = vpop.f32.mrf.mxu0  ;;  %v11434_v57 = vpop.f32.mrf.mxu1 }
 0x32e   :  { %v9888_v8 = vpop.f32.mrf.mxu0  ;;  %v11436_v28 = vpop.f32.mrf.mxu1 }
 0x330   :  { %v9890_v27 = vpop.f32.mrf.mxu0  ;;  %v11438_v30 = vpop.f32.mrf.mxu1 }
 0x332   :  { %v9891_v32 = vpop.f32.mrf.mxu0  ;;  %v11440_v33 = vpop.f32.mrf.mxu1 }
 0x334   :  { %v9893_v6 = vpop.f32.mrf.mxu0  ;;  %v11442_v37 = vpop.f32.mrf.mxu1 }
 0x336   :  { %v9894_v21 = vpop.f32.mrf.mxu0  ;;  %v11444_v41 = vpop.f32.mrf.mxu1 }
 0x337   :  { %v9895_v63 = vadd.f32 %v9894_v21, %v9893_v6 }
 0x338   :  { %v9896_v42 = vpop.f32.mrf.mxu0  ;;  %v11446_v51 = vpop.f32.mrf.mxu1 }
 0x339   :  { %v7651_v6 = vadd.f32 %v9895_v63, %v11417_v39 }
 0x33a   :  { %v9897_v10 = vpop.f32.mrf.mxu0  ;;  %v11448_v44 = vpop.f32.mrf.mxu1 }
 0x33c   :  { %v11450_v23 = vpop.f32.mrf.mxu0  ;;  %v11452_v43 = vpop.f32.mrf.mxu1 }
 0x33d   :  { %11536 = vst [vmem:[#allocation13_spill] sm:$0xff] %v11452_v43  ;;  %v9892_v43 = vadd.f32 %v9891_v32, %v9890_v27 }
 0x33e   :  { %v9900_v46 = vpop.f32.mrf.mxu0  ;;  %v11454_v48 = vpop.f32.mrf.mxu1 }
 0x33f   :  { %11537 = vst [vmem:[#allocation14_spill] sm:$0xff] %v11454_v48  ;;  %v9901_v39 = vadd.f32 %v9900_v46, %v11450_v23 }
 0x340   :  { %v9902_v47 = vpop.f32.mrf.mxu0  ;;  %v9942_v45 = vpop.f32.mrf.mxu1 }
 0x342   :  { %v9903_v54 = vpop.f32.mrf.mxu0  ;;  %v9943_v55 = vpop.f32.mrf.mxu1 }
 0x343   :  { %v9904_v15 = vadd.f32 %v9903_v54, %v9902_v47 }
 0x344   :  { %v9905_v34 = vpop.f32.mrf.mxu0  ;;  %v11456_v58 = vpop.f32.mrf.mxu1 }
 0x346   :  { %v9906_v50 = vpop.f32.mrf.mxu0  ;;  %v11458_v59 = vpop.f32.mrf.mxu1 }
 0x347   :  { %11538 = vst [vmem:[#allocation15_spill] sm:$0xff] %v11458_v59  ;;  %v9898_v59 = vadd.f32 %v9897_v10, %v9896_v42 }
 0x349   :  { %v9964_v60 = vpop.f32.mrf.mxu0  ;;  %v11460_v40 = vpop.f32.mrf.mxu1 }
 0x34a   :  { %11539 = vst [vmem:[#allocation16_spill] sm:$0xff] %v11460_v40  ;;  %v9886_v40 = vadd.f32 %v9885_v56, %v9884_v62  ;;  %v9867_v62 = vadd.f32 %v11426_v4, %v11424_v18  ;;  %v9907_v56 = vadd.f32 %v9906_v50, %v9905_v34  ;;  %v9929_v18 = vadd.f32 %v11436_v28, %v11434_v57 }
 0x34b   :  { %v9965_v61 = vpop.f32.mrf.mxu0  ;;  %v11462_v2 = vpop.f32.mrf.mxu1  ;;  %v9932_v4 = vadd.f32 %v11440_v33, %v11438_v30  ;;  %v9938_v57 = vadd.f32 %v11448_v44, %v11446_v51 }
 0x34c   :  { %11540 = vst [vmem:[#allocation17_spill] sm:$0xff] %v11462_v2  ;;  %v9827_v2 = vadd.f32 %v9826_v17, %v9825_v13  ;;  %v9966_v47 = vadd.f32 %v9965_v61, %v9964_v60 }
 0x34d   :  { %v11464_v12 = vpop.f32.mrf.mxu0  ;;  %v11466_v0 = vpop.f32.mrf.mxu1 }
 0x34e   :  { %11541 = vst [vmem:[#allocation18_spill] sm:$0xff] %v11464_v12  ;;  %11542 = vst [vmem:[#allocation19_spill] sm:$0xff] %v11466_v0  ;;  %v7537_v11 = vadd.f32 %v9827_v2, %v11408_v25  ;;  %v7648_v25 = vadd.f32 %v9892_v43, %v11414_v53  ;;  %v11551_v2 = vld [vmem:[#allocation14_spill] sm:$0xff] }
 0x34f   :  { %v11468_v3 = vpop.f32.mrf.mxu0  ;;  %v11470_v16 = vpop.f32.mrf.mxu1 }
 0x350   :  { %11543 = vst [vmem:[#allocation20_spill] sm:$0xff] %v11468_v3  ;;  %11544 = vst [vmem:[#allocation21_spill] sm:$0xff] %v11470_v16  ;;  %v7534_v3 = vadd.f32 %v9824_v14, %v11405_v20  ;;  %v9864_v16 = vadd.f32 %v9863_v52, %v9862_v26  ;;  %v9926_v20 = vadd.f32 %v11430_v29, %v11428_v19 }
 0x351   :  { %v9970_v1 = vpop.f32.mrf.mxu0  ;;  %v11472_v49 = vpop.f32.mrf.mxu1  ;;  %v9889_v26 = vadd.f32 %v9888_v8, %v11432_v36  ;;  %v7602_v27 = vadd.f32 %v9867_v62, %v7537_v11  ;;  %v7656_v19 = vadd.f32 %v9898_v59, %v11419_v9  ;;  %v9935_v11 = vadd.f32 %v11444_v41, %v11442_v37  ;;  %v11548_v59 = vld [vmem:[#allocation15_spill] sm:$0xff] }
 0x352   :  { %11545 = vst [vmem:[#allocation22_spill] sm:$0xff] %v11472_v49  ;;  %v7599_v17 = vadd.f32 %v9864_v16, %v7534_v3  ;;  %v9944_v8 = vadd.f32 %v9943_v55, %v9942_v45  ;;  %v7713_v43 = vadd.f32 %v9932_v4, %v7648_v25  ;;  %v9947_v37 = vadd.f32 %v11548_v59, %v11456_v58  ;;  %v11549_v45 = vld [vmem:[#allocation12_spill] sm:$0xff]  ;;  %v7933_v59 = vld [vmem:[#allocation7 + $0x18] sm:$0xff] }
 0x353   :  { %v9971_v31 = vpop.f32.mrf.mxu0  ;;  %v11474_v7 = vpop.f32.mrf.mxu1  ;;  %v7643_v53 = vadd.f32 %v9889_v26, %v11412_v35  ;;  %v7667_v28 = vadd.f32 %v9907_v56, %v7602_v27  ;;  %v7716_v33 = vadd.f32 %v9935_v11, %v7651_v6  ;;  %v7721_v35 = vadd.f32 %v9938_v57, %v7656_v19  ;;  %v11557_v26 = vld [vmem:[#allocation17_spill] sm:$0xff] }
 0x354   :  { %11546 = vst [vmem:[#allocation23_spill] sm:$0xff] %v11474_v7  ;;  %v7640_v7 = vadd.f32 %v9886_v40, %v11410_v38  ;;  %v7664_v21 = vadd.f32 %v9904_v15, %v7599_v17  ;;  %v9972_v29 = vadd.f32 %v9971_v31, %v9970_v1  ;;  %v7659_v55 = vadd.f32 %v9901_v39, %v11549_v45  ;;  %v11550_v40 = vld [vmem:[#allocation13_spill] sm:$0xff] }
 0x355   :  { %v9973_v24 = vpop.f32.mrf.mxu0  ;;  %v11476_v22 = vpop.f32.mrf.mxu1  ;;  %v9941_v51 = vadd.f32 %v11551_v2, %v11550_v40  ;;  %v7732_v3 = vadd.f32 %v9947_v37, %v7667_v28  ;;  %v7708_v62 = vadd.f32 %v9929_v18, %v7643_v53  ;;  %v7931_v2 = vld [vmem:[#allocation7 + $0x8] sm:$0xff] }
 0x356   :  { %11547 = vst [vmem:[#allocation24_spill] sm:$0xff] %v11476_v22  ;;  %v7705_v32 = vadd.f32 %v9926_v20, %v7640_v7  ;;  %v7729_v9 = vadd.f32 %v9944_v8, %v7664_v21  ;;  %v7778_v41 = vadd.f32 %v9972_v29, %v7713_v43  ;;  %v11556_v20 = vld [vmem:[#allocation16_spill] sm:$0xff]  ;;  %v7932_v29 = vld [vmem:[#allocation7 + $0x10] sm:$0xff] }
 0x357   :  { %v9974_v5 = vpop.f32.mrf.mxu0  ;;  %v11478_v12 = vpop.f32.mrf.mxu1  ;;  %v11553_v1 = vld [vmem:[#allocation20_spill] sm:$0xff]  ;;  %v10006_v25 = vadd.f32 %v11557_v26, %v11556_v20  ;;  %v7724_v6 = vadd.f32 %v9941_v51, %v7659_v55 }
 0x358   :  { %v9975_v23 = vadd.f32 %v9974_v5, %v9973_v24  ;;  %v7770_v16 = vadd.f32 %v9966_v47, %v7705_v32  ;;  %v7930_v43 = vld [vmem:[#allocation7] sm:$0xff]  ;;  %v11559_v47 = vld [vmem:[#allocation19_spill] sm:$0xff] }
 0x359   :  { %v9976_v0 = vpop.f32.mrf.mxu0  ;;  %v11481_v48 = vpop.f32.mrf.mxu1  ;;  %v11554_v31 = vld [vmem:[#allocation22_spill] sm:$0xff] }
 0x35a   :  { %v7781_v56 = vadd.f32 %v9975_v23, %v7716_v33  ;;  %v7835_v8 = vadd.f32 %v10006_v25, %v7770_v16 }
 0x35b   :  { %v9977_v49 = vpop.f32.mrf.mxu0  ;;  %v10017_v22 = vpop.f32.mrf.mxu1  ;;  %v11555_v7 = vld [vmem:[#allocation23_spill] sm:$0xff] }
 0x35c   :  { %v9978_v54 = vadd.f32 %v9977_v49, %v9976_v0  ;;  %v11552_v0 = vld [vmem:[#allocation18_spill] sm:$0xff]  ;;  %v10012_v14 = vadd.f32 %v11555_v7, %v11554_v31  ;;  %v10018_v32 = vadd.f32 %v10017_v22, %v11481_v48 }
 0x35d   :  { %v9979_v13 = vpop.f32.mrf.mxu0  ;;  %v11490_v52 = vpop.f32.mrf.mxu1  ;;  %v9969_v49 = vadd.f32 %v11553_v1, %v11552_v0  ;;  %v11558_v11 = vld [vmem:[#allocation24_spill] sm:$0xff] }
 0x35e   :  { %v7786_v63 = vadd.f32 %v9978_v54, %v7721_v35  ;;  %v7843_v27 = vadd.f32 %v10012_v14, %v7778_v41 }
 0x35f   :  { %v9980_v38 = vpop.f32.mrf.mxu0  ;;  %v11494_v42 = vpop.f32.mrf.mxu1 }
 0x360   :  { %v9981_v24 = vadd.f32 %v9980_v38, %v9979_v13  ;;  %v10015_v13 = vadd.f32 %v11478_v12, %v11558_v11  ;;  %v7851_v57 = vadd.f32 %v10018_v32, %v7786_v63 }
 0x361   :  { %v10022_v10 = vpop.f32.mrf.mxu1 }
 0x362   :  { %v7789_v18 = vadd.f32 %v9981_v24, %v7724_v6  ;;  %v7846_v54 = vadd.f32 %v10015_v13, %v7781_v56 }
 0x363   :  { %v10023_v50 = vpop.f32.mrf.mxu1 }
 0x364   :  { %v10024_v60 = vadd.f32 %v10023_v50, %v10022_v10 }
 0x365   :  { %v10025_v61 = vpop.f32.mrf.mxu1 }
 0x367   :  { %v10026_v15 = vpop.f32.mrf.mxu1 }
 0x368   :  { %v10027_v4 = vadd.f32 %v10026_v15, %v10025_v61 }
 0x36a   :  { %v9982_v36 = vpop.f32.mrf.mxu0 }
 0x36c   :  { %v9983_v30 = vpop.f32.mrf.mxu0 }
 0x36d   :  { %v9984_v34 = vadd.f32 %v9983_v30, %v9982_v36  ;;  %v7773_v36 = vadd.f32 %v9969_v49, %v7708_v62  ;;  %v11560_v30 = vld [vmem:[#allocation21_spill] sm:$0xff] }
 0x36e   :  { %v9985_v46 = vpop.f32.mrf.mxu0  ;;  %v10009_v48 = vadd.f32 %v11560_v30, %v11559_v47 }
 0x36f   :  { %v7794_v44 = vadd.f32 %v9984_v34, %v7729_v9  ;;  %v10021_v34 = vadd.f32 %v11494_v42, %v11490_v52 }
 0x370   :  { %v9986_v58 = vpop.f32.mrf.mxu0 }
 0x371   :  { %v9987_v5 = vadd.f32 %v9986_v58, %v9985_v46  ;;  %v7859_v17 = vadd.f32 %v10024_v60, %v7794_v44  ;;  %v7838_v46 = vadd.f32 %v10009_v48, %v7773_v36  ;;  %v7854_v51 = vadd.f32 %v10021_v34, %v7789_v18 }
 0x372   :  { %v10058_v19 = vpop.f32.mrf.mxu0 }
 0x373   :  { %v7797_v21 = vadd.f32 %v9987_v5, %v7732_v3  ;;  %v7908_v38 = vadd.f32 %v10058_v19, %v7843_v27  ;;  %v10062_v39 = vpop.f32.mrf.mxu1 }
 0x374   :  { %v7924_v53 = vadd.f32 %v10062_v39, %v7859_v17  ;;  %v7899_v10 = vpop.f32.mrf.mxu0 }
 0x375   :  { %v7862_v28 = vadd.f32 %v10027_v4, %v7797_v21  ;;  %v7936_v22 = vadd.f32 %v7932_v29, %v7908_v38  ;;  %v7900_v33 = vadd.f32 %v7899_v10, %v7835_v8  ;;  %v7915_v9 = vpop.f32.mrf.mxu1 }
 0x376   :  { %v7940_v12 = vadd.f32 %v7932_v29, %v7924_v53  ;;  %v7916_v50 = vadd.f32 %v7915_v9, %v7851_v57  ;;  %v10059_v35 = vpop.f32.mrf.mxu0 }
 0x377   :  { %7944 = vst [vmem:[#allocation8 + $0x10] sm:$0xff] %v7936_v22  ;;  %v7934_v37 = vadd.f32 %v7930_v43, %v7900_v33  ;;  %v7911_v41 = vadd.f32 %v10059_v35, %v7846_v54  ;;  %v10063_v23 = vpop.f32.mrf.mxu1 }
 0x378   :  { %7948 = vst [vmem:[#allocation8 + $0x30] sm:$0xff] %v7940_v12  ;;  %v7938_v45 = vadd.f32 %v7930_v43, %v7916_v50  ;;  %v7927_v55 = vadd.f32 %v10063_v23, %v7862_v28  ;;  %v7902_v40 = vpop.f32.mrf.mxu0 }
 0x379   :  { %7942 = vst [vmem:[#allocation8] sm:$0xff] %v7934_v37  ;;  %v7937_v44 = vadd.f32 %v7933_v59, %v7911_v41  ;;  %v7903_v60 = vadd.f32 %v7902_v40, %v7838_v46  ;;  %v7918_v61 = vpop.f32.mrf.mxu1 }
 0x37a   :  { %7946 = vst [vmem:[#allocation8 + $0x20] sm:$0xff] %v7938_v45  ;;  %v7941_v52 = vadd.f32 %v7933_v59, %v7927_v55  ;;  %v7919_v42 = vadd.f32 %v7918_v61, %v7854_v51 }
 0x37b   :  { %7945 = vst [vmem:[#allocation8 + $0x18] sm:$0xff] %v7937_v44  ;;  %v7935_v3 = vadd.f32 %v7931_v2, %v7903_v60 }
 0x37c   :  { %7949 = vst [vmem:[#allocation8 + $0x38] sm:$0xff] %v7941_v52  ;;  %v7939_v16 = vadd.f32 %v7931_v2, %v7919_v42 }
 0x37d   :  { %7943 = vst [vmem:[#allocation8 + $0x8] sm:$0xff] %v7935_v3 }
 0x37e   :  { %7947 = vst [vmem:[#allocation8 + $0x28] sm:$0xff] %v7939_v16 }
 0x37f   :  { %11069 = shalt.err (!%p11066_p5)
}
 0x380   :  { %7961 = dma.vmem_to_hbm [thread:$0]  %s7956_s2, 1024, %s11534_s3, [#allocation4], %s11091_s28, %s11091_s28, %s11092_s29  }
 0x381   :  { %11082 = dma.done.wait [#allocation4], 1024  }
 0x382   :  { %11083 = vsyncadd [#allocation4], 4294966272 }
 0x383   :  { %7965 = vsyncpa [#allocation3], 1 }
 0x384   :  { %7966 = vsyncpa [#allocation6], 1 }
 0x385   :  { %7967 = vsyncpa [#allocation4], 1 }

</bundles_post_ra>
